<compile_context>
chip_gen: v6e
topology: v6e:2x2x1
jax: 0.10.0
libtpu: 0.0.40
codegen_flags: <defaults>
</compile_context>

<pallas_src>
import jax
import jax.numpy as jnp
from jax.experimental import pallas as pl
from jax.experimental.pallas import tpu as pltpu


def _round_up(n: int, m: int) -> int:
    return ((n + m - 1) // m) * m


def _mlp_softmax_kernel(x_ref, w1_ref, b1_ref, w2_ref, b2_ref, w3_ref, b3_ref, o_ref):
    # x arrives f32 (no wrapper cast pass); cast to bf16 in-register for the MXU.
    x = x_ref[...].astype(jnp.bfloat16)

    # fc1 + ReLU  (dropout == identity in eval mode)
    h1 = jnp.dot(x, w1_ref[...], preferred_element_type=jnp.float32) + b1_ref[...]
    h1 = jnp.maximum(h1, 0.0).astype(jnp.bfloat16)

    # fc2 + ReLU
    h2 = jnp.dot(h1, w2_ref[...], preferred_element_type=jnp.float32) + b2_ref[...]
    h2 = jnp.maximum(h2, 0.0).astype(jnp.bfloat16)

    # fc3: padded output columns carry b3 == -1e30 (set in prepare_params),
    # so exp() zeroes them and the softmax normalizes over real classes only.
    logits = jnp.dot(h2, w3_ref[...], preferred_element_type=jnp.float32) + b3_ref[...]

    # softmax over dim=1 (feature axis)
    m = jnp.max(logits, axis=-1, keepdims=True)
    e = jnp.exp(logits - m)
    denom = jnp.sum(e, axis=-1, keepdims=True)
    o_ref[...] = (e * pl.reciprocal(denom, approx=True)).astype(o_ref.dtype)


def prepare_params(params):
    """One-time pad + cast of weights/biases (reuse the result across forward calls).

    Weights -> bf16, lane-padded; biases -> f32; b3's padded columns get -1e30 so the
    kernel needs no per-step masking. Weights are stored as (in_dim, out_dim) = W.T.
    """
    F, H = params["w1"].shape
    O = params["w3"].shape[1]
    Fp, Hp, Op = _round_up(F, 128), _round_up(H, 128), _round_up(O, 128)

    def pad2(a, rows, cols, dtype, fill=0.0):
        a = a.astype(dtype)
        return jnp.pad(a, ((0, rows - a.shape[0]), (0, cols - a.shape[1])),
                       constant_values=fill)

    return {
        "w1": pad2(params["w1"], Fp, Hp, jnp.bfloat16),
        "b1": pad2(params["b1"], 1, Hp, jnp.float32),
        "w2": pad2(params["w2"], Hp, Fp, jnp.bfloat16),
        "b2": pad2(params["b2"], 1, Fp, jnp.float32),
        "w3": pad2(params["w3"], Fp, Op, jnp.bfloat16),
        # Large finite negative (not -inf) in the padded logit columns.
        "b3": pad2(params["b3"], 1, Op, jnp.float32, fill=-1e30),
        "dims": (F, H, O, Fp, Hp, Op),
    }


def custom_linear_forward(x, prep, *, tm=None):
    """x: (B, in_features) f32.  prep: output of prepare_params().

    Returns the lane-dense PADDED output (Bp, Op) in bf16; slice [:B, :out_features]
    lazily in the consumer (avoids an extra HBM read/write pass here).
    """
    B, F = x.shape
    F0, H, O, Fp, Hp, Op = prep["dims"]
    assert F == F0, f"expected in_features={F0}, got {F}"

    device_kind = jax.devices()[0].device_kind.lower()
    is_v7 = "v7" in device_kind

    # Generation-aware VMEM ceiling (don't clamp v5e/v6e to the v7x 64 MiB).
    try:
        vmem_cap = int(pltpu.get_tpu_info().vmem_capacity_bytes)
    except Exception:
        vmem_cap = (64 << 20) if is_v7 else (128 << 20)
    ceiling = max(vmem_cap - (16 << 20), 32 << 20)

    # Batch tile: big on v5e/v6e (mem-bound, fewer steps); <=128 on v7x so each of the
    # 2 TensorCores gets >=2 grid steps. Multiple of 16 for bf16 (16,128) packing.
    if tm is None:
        tm = 128 if is_v7 else 512
    TM = _round_up(min(tm, _round_up(B, 16)), 16)
    Bp = _round_up(B, TM)
    n_steps = Bp // TM

    # Pad x only if needed (zeros are harmless: they only feed sliced-off rows /
    # multiply zero-padded weight rows).
    xp = x if (Bp, Fp) == (B, F) else jnp.pad(x, ((0, Bp - B), (0, Fp - F)))

    # VMEM budget: single-buffered resident weights/biases, double-buffered x/out
    # tiles, plus f32/bf16 intermediates.
    wbytes = (Fp * Hp + Hp * Fp + Fp * Op) * 2
    bbytes = (Hp + Fp + Op) * 4
    io_bytes = 2 * TM * Fp * 4 + 2 * TM * Op * 2
    interm_bytes = TM * (Hp + Fp + Op) * 4 + TM * (Fp + Hp + Fp) * 2
    need = wbytes + bbytes + io_bytes + interm_bytes
    if need > ceiling:
        # TODO(synk): fall back to a hidden/contraction-tiled kernel (second
        # "arbitrary" grid axis + f32 VMEM accumulator) instead of erroring.
        raise ValueError(
            f"resident-weight MLP needs ~{need >> 20} MiB VMEM, "
            f"only ~{ceiling >> 20} MiB available on {device_kind}")
    vmem_limit = int(min(max(need + need // 2 + (4 << 20), 32 << 20), ceiling))

    cost = pl.CostEstimate(
        flops=2 * Bp * (Fp * Hp + Hp * Fp + Fp * Op),
        transcendentals=Bp * Op,
        bytes_accessed=wbytes + bbytes + Bp * Fp * 4 + Bp * Op * 2,
    )

    def build(semantics, single_buffer_weights):
        res = {"pipeline_mode": pl.Buffered(1)} if single_buffer_weights else {}
        return pl.pallas_call(
            _mlp_softmax_kernel,
            out_shape=jax.ShapeDtypeStruct((Bp, Op), jnp.bfloat16),
            grid=(n_steps,),
            in_specs=[
                pl.BlockSpec((TM, Fp), lambda i: (i, 0)),         # x (f32), batch-tiled
                pl.BlockSpec((Fp, Hp), lambda i: (0, 0), **res),  # w1: VMEM-resident
                pl.BlockSpec((1, Hp), lambda i: (0, 0), **res),   # b1
                pl.BlockSpec((Hp, Fp), lambda i: (0, 0), **res),  # w2
                pl.BlockSpec((1, Fp), lambda i: (0, 0), **res),   # b2
                pl.BlockSpec((Fp, Op), lambda i: (0, 0), **res),  # w3
                pl.BlockSpec((1, Op), lambda i: (0, 0), **res),   # b3 (padded cols -1e30)
            ],
            out_specs=pl.BlockSpec((TM, Op), lambda i: (i, 0)),
            compiler_params=pltpu.CompilerParams(
                dimension_semantics=semantics,
                vmem_limit_bytes=vmem_limit,
            ),
            cost_estimate=cost,
        )

    # Preferred config first; fall back gracefully if CORE_PARALLEL / Buffered(1)
    # are not supported by the local toolchain.
    configs = []
    if is_v7 and n_steps >= 2:
        configs.append(((pltpu.CORE_PARALLEL,), True))
    configs.append((("parallel",), True))
    configs.append((("parallel",), False))

    last_err = None
    for semantics, single_buf in configs:
        try:
            return build(semantics, single_buf)(
                xp, prep["w1"], prep["b1"], prep["w2"], prep["b2"], prep["w3"], prep["b3"])
        except Exception as e:  # fallback path
            last_err = e
    raise last_err


def init_params(key, in_features, out_features):
    """Deterministic init. Weights stored as (in_dim, out_dim) = PyTorch W.T."""
    hidden = in_features * 2
    k1, k2, k3, k4, k5, k6 = jax.random.split(key, 6)
    s1 = 1.0 / jnp.sqrt(in_features)
    s2 = 1.0 / jnp.sqrt(hidden)
    s3 = 1.0 / jnp.sqrt(in_features)
    return {
        "w1": jax.random.uniform(k1, (in_features, hidden), jnp.float32, -s1, s1),
        "b1": jax.random.uniform(k2, (1, hidden), jnp.float32, -s1, s1),
        "w2": jax.random.uniform(k3, (hidden, in_features), jnp.float32, -s2, s2),
        "b2": jax.random.uniform(k4, (1, in_features), jnp.float32, -s2, s2),
        "w3": jax.random.uniform(k5, (in_features, out_features), jnp.float32, -s3, s3),
        "b3": jax.random.uniform(k6, (1, out_features), jnp.float32, -s3, s3),
    }


def _reference(x, p):
    """Pure-JAX reference mirroring the kernel math (bf16 operands, f32 accumulate)."""
    xb = x.astype(jnp.bfloat16)
    w1 = p["w1"].astype(jnp.bfloat16)
    w2 = p["w2"].astype(jnp.bfloat16)
    w3 = p["w3"].astype(jnp.bfloat16)
    h1 = jnp.maximum(jnp.dot(xb, w1, preferred_element_type=jnp.float32) + p["b1"], 0.0)
    h1 = h1.astype(jnp.bfloat16)
    h2 = jnp.maximum(jnp.dot(h1, w2, preferred_element_type=jnp.float32) + p["b2"], 0.0)
    h2 = h2.astype(jnp.bfloat16)
    logits = jnp.dot(h2, w3, preferred_element_type=jnp.float32) + p["b3"]
    return jax.nn.softmax(logits, axis=1)


if __name__ == "__main__":
    # Lane-friendly demo: in_features already lane-aligned, out_features exercises the
    # padded-column (b3 = -1e30) path; B=512 exercises the batch grid.
    B, IN_F, OUT_F = 512, 128, 64

    key = jax.random.PRNGKey(0)
    kx, kp = jax.random.split(key)
    x = jax.random.normal(kx, (B, IN_F), dtype=jnp.float32)
    params = init_params(kp, IN_F, OUT_F)
    prep = prepare_params(params)                 # one-time pad + cast, reused per call

    out_padded = custom_linear_forward(x, prep)   # (Bp, Op) bf16, padded
    out_padded = jax.block_until_ready(out_padded)
    out = out_padded[:B, :OUT_F].astype(jnp.float32)   # consumer-side lazy slice

    ref = _reference(x, params)
    assert out.shape == (B, OUT_F)
    max_err = float(jnp.max(jnp.abs(out - ref)))
    assert jnp.allclose(out, ref, atol=1e-2, rtol=5e-2), max_err
    assert jnp.allclose(jnp.sum(out, axis=1), 1.0, atol=2e-2)

    # Exercise the multi-step batch grid explicitly (TM=128 -> 4 grid steps).
    out_small = custom_linear_forward(x, prep, tm=128)
    out_small = jax.block_until_ready(out_small)
    assert jnp.allclose(out_small[:B, :OUT_F].astype(jnp.float32), out, atol=1e-2)

    print("KERNEL_OK")
</pallas_src>

<mosaic_0001>
module attributes {stable_mosaic.version = 11 : i64} {
  func.func @_mlp_softmax_kernel(%arg0: i32, %arg1: memref<512x128xf32, #tpu.memory_space<vmem>>, %arg2: memref<128x256xbf16, #tpu.memory_space<vmem>>, %arg3: memref<1x256xf32, #tpu.memory_space<vmem>>, %arg4: memref<256x128xbf16, #tpu.memory_space<vmem>>, %arg5: memref<1x128xf32, #tpu.memory_space<vmem>>, %arg6: memref<128x128xbf16, #tpu.memory_space<vmem>>, %arg7: memref<1x128xf32, #tpu.memory_space<vmem>>, %arg8: memref<512x128xbf16, #tpu.memory_space<vmem>>) attributes {dimension_semantics = [#tpu.dimension_semantics<parallel>], iteration_bounds = array<i64: 1>, scalar_prefetch = 0 : i64, scratch_operands = 0 : i64, tpu.core_type = #tpu.core_type<tc>, window_params = [{transform_indices = @transform_0, window_bounds = array<i64: 512, 128>}, {pipeline_mode = #tpu.pipeline_mode<synchronous>, transform_indices = @transform_1, window_bounds = array<i64: 128, 256>}, {pipeline_mode = #tpu.pipeline_mode<synchronous>, transform_indices = @transform_2, window_bounds = array<i64: 1, 256>}, {pipeline_mode = #tpu.pipeline_mode<synchronous>, transform_indices = @transform_3, window_bounds = array<i64: 256, 128>}, {pipeline_mode = #tpu.pipeline_mode<synchronous>, transform_indices = @transform_4, window_bounds = array<i64: 1, 128>}, {pipeline_mode = #tpu.pipeline_mode<synchronous>, transform_indices = @transform_5, window_bounds = array<i64: 128, 128>}, {pipeline_mode = #tpu.pipeline_mode<synchronous>, transform_indices = @transform_6, window_bounds = array<i64: 1, 128>}, {transform_indices = @transform_7, window_bounds = array<i64: 512, 128>}]} {
    %c0 = arith.constant 0 : index
    %c0_0 = arith.constant 0 : index
    %0 = vector.load %arg1[%c0, %c0_0] : memref<512x128xf32, #tpu.memory_space<vmem>>, vector<512x128xf32>
    %1 = arith.truncf %0 : vector<512x128xf32> to vector<512x128xbf16>
    %c0_1 = arith.constant 0 : index
    %c0_2 = arith.constant 0 : index
    %2 = vector.load %arg2[%c0_1, %c0_2] : memref<128x256xbf16, #tpu.memory_space<vmem>>, vector<128x256xbf16>
    %cst = arith.constant dense<0.000000e+00> : vector<512x256xf32>
    %3 = tpu.matmul %1, %2, %cst {dimension_numbers = #tpu.dot_dimension_numbers<[1], [0], [0], [1], [0, 0, 1, 1], [], []>} : vector<512x128xbf16>, vector<128x256xbf16>, vector<512x256xf32> -> vector<512x256xf32>
    %c0_3 = arith.constant 0 : index
    %c0_4 = arith.constant 0 : index
    %4 = vector.load %arg3[%c0_3, %c0_4] : memref<1x256xf32, #tpu.memory_space<vmem>>, vector<1x256xf32>
    %5 = vector.broadcast %4 : vector<1x256xf32> to vector<512x256xf32>
    %6 = arith.addf %3, %5 : vector<512x256xf32>
    %cst_5 = arith.constant 0.000000e+00 : f32
    %7 = vector.broadcast %cst_5 : f32 to vector<512x256xf32>
    %8 = arith.maximumf %6, %7 : vector<512x256xf32>
    %9 = arith.truncf %8 : vector<512x256xf32> to vector<512x256xbf16>
    %c0_6 = arith.constant 0 : index
    %c0_7 = arith.constant 0 : index
    %10 = vector.load %arg4[%c0_6, %c0_7] : memref<256x128xbf16, #tpu.memory_space<vmem>>, vector<256x128xbf16>
    %cst_8 = arith.constant dense<0.000000e+00> : vector<512x128xf32>
    %11 = tpu.matmul %9, %10, %cst_8 {dimension_numbers = #tpu.dot_dimension_numbers<[1], [0], [0], [1], [0, 0, 1, 1], [], []>} : vector<512x256xbf16>, vector<256x128xbf16>, vector<512x128xf32> -> vector<512x128xf32>
    %c0_9 = arith.constant 0 : index
    %c0_10 = arith.constant 0 : index
    %12 = vector.load %arg5[%c0_9, %c0_10] : memref<1x128xf32, #tpu.memory_space<vmem>>, vector<1x128xf32>
    %13 = vector.broadcast %12 : vector<1x128xf32> to vector<512x128xf32>
    %14 = arith.addf %11, %13 : vector<512x128xf32>
    %cst_11 = arith.constant 0.000000e+00 : f32
    %15 = vector.broadcast %cst_11 : f32 to vector<512x128xf32>
    %16 = arith.maximumf %14, %15 : vector<512x128xf32>
    %17 = arith.truncf %16 : vector<512x128xf32> to vector<512x128xbf16>
    %c0_12 = arith.constant 0 : index
    %c0_13 = arith.constant 0 : index
    %18 = vector.load %arg6[%c0_12, %c0_13] : memref<128x128xbf16, #tpu.memory_space<vmem>>, vector<128x128xbf16>
    %cst_14 = arith.constant dense<0.000000e+00> : vector<512x128xf32>
    %19 = tpu.matmul %17, %18, %cst_14 {dimension_numbers = #tpu.dot_dimension_numbers<[1], [0], [0], [1], [0, 0, 1, 1], [], []>} : vector<512x128xbf16>, vector<128x128xbf16>, vector<512x128xf32> -> vector<512x128xf32>
    %c0_15 = arith.constant 0 : index
    %c0_16 = arith.constant 0 : index
    %20 = vector.load %arg7[%c0_15, %c0_16] : memref<1x128xf32, #tpu.memory_space<vmem>>, vector<1x128xf32>
    %21 = vector.broadcast %20 : vector<1x128xf32> to vector<512x128xf32>
    %22 = arith.addf %19, %21 : vector<512x128xf32>
    %cst_17 = arith.constant dense<0xFF800000> : vector<512xf32>
    %23 = vector.multi_reduction <maximumf>, %22, %cst_17 [1] : vector<512x128xf32> to vector<512xf32>
    %24 = vector.shape_cast %23 : vector<512xf32> to vector<512x1xf32>
    %25 = vector.broadcast %24 : vector<512x1xf32> to vector<512x128xf32>
    %26 = arith.subf %22, %25 : vector<512x128xf32>
    %27 = math.exp %26 : vector<512x128xf32>
    %cst_18 = arith.constant dense<0.000000e+00> : vector<512xf32>
    %28 = vector.multi_reduction <add>, %27, %cst_18 [1] : vector<512x128xf32> to vector<512xf32>
    %29 = vector.shape_cast %28 : vector<512xf32> to vector<512x1xf32>
    %30 = tpu.reciprocal %29 {approx = true} : vector<512x1xf32> -> vector<512x1xf32>
    %31 = vector.broadcast %30 : vector<512x1xf32> to vector<512x128xf32>
    %32 = arith.mulf %27, %31 : vector<512x128xf32>
    %33 = arith.truncf %32 : vector<512x128xf32> to vector<512x128xbf16>
    %c0_19 = arith.constant 0 : index
    %c0_20 = arith.constant 0 : index
    %34 = vector.load %arg8[%c0_19, %c0_20] : memref<512x128xbf16, #tpu.memory_space<vmem>>, vector<512x128xbf16>
    tpu.vector_store %arg8[%c0_19, %c0_20], %33 {strides = array<i32>} : memref<512x128xbf16, #tpu.memory_space<vmem>>, vector<512x128xbf16>,
    return
  }
  func.func @transform_0(%arg0: i32) -> (i32, i32) {
    %c0_i32 = arith.constant 0 : i32
    %c0_i32_0 = arith.constant 0 : i32
    return %arg0, %c0_i32 : i32, i32
  }
  func.func @transform_1(%arg0: i32) -> (i32, i32) {
    %c0_i32 = arith.constant 0 : i32
    %c0_i32_0 = arith.constant 0 : i32
    %c0_i32_1 = arith.constant 0 : i32
    return %c0_i32, %c0_i32_0 : i32, i32
  }
  func.func @transform_2(%arg0: i32) -> (i32, i32) {
    %c0_i32 = arith.constant 0 : i32
    %c0_i32_0 = arith.constant 0 : i32
    %c0_i32_1 = arith.constant 0 : i32
    return %c0_i32, %c0_i32_0 : i32, i32
  }
  func.func @transform_3(%arg0: i32) -> (i32, i32) {
    %c0_i32 = arith.constant 0 : i32
    %c0_i32_0 = arith.constant 0 : i32
    %c0_i32_1 = arith.constant 0 : i32
    return %c0_i32, %c0_i32_0 : i32, i32
  }
  func.func @transform_4(%arg0: i32) -> (i32, i32) {
    %c0_i32 = arith.constant 0 : i32
    %c0_i32_0 = arith.constant 0 : i32
    %c0_i32_1 = arith.constant 0 : i32
    return %c0_i32, %c0_i32_0 : i32, i32
  }
  func.func @transform_5(%arg0: i32) -> (i32, i32) {
    %c0_i32 = arith.constant 0 : i32
    %c0_i32_0 = arith.constant 0 : i32
    %c0_i32_1 = arith.constant 0 : i32
    return %c0_i32, %c0_i32_0 : i32, i32
  }
  func.func @transform_6(%arg0: i32) -> (i32, i32) {
    %c0_i32 = arith.constant 0 : i32
    %c0_i32_0 = arith.constant 0 : i32
    %c0_i32_1 = arith.constant 0 : i32
    return %c0_i32, %c0_i32_0 : i32, i32
  }
  func.func @transform_7(%arg0: i32) -> (i32, i32) {
    %c0_i32 = arith.constant 0 : i32
    %c0_i32_0 = arith.constant 0 : i32
    return %arg0, %c0_i32 : i32, i32
  }
}

module attributes {stable_mosaic.version = 11 : i64} {
  func.func @_mlp_softmax_kernel(%arg0: i32, %arg1: memref<512x128xf32, #tpu.memory_space<vmem>>, %arg2: memref<128x256xbf16, #tpu.memory_space<vmem>>, %arg3: memref<1x256xf32, #tpu.memory_space<vmem>>, %arg4: memref<256x128xbf16, #tpu.memory_space<vmem>>, %arg5: memref<1x128xf32, #tpu.memory_space<vmem>>, %arg6: memref<128x128xbf16, #tpu.memory_space<vmem>>, %arg7: memref<1x128xf32, #tpu.memory_space<vmem>>, %arg8: memref<512x128xbf16, #tpu.memory_space<vmem>>) attributes {dimension_semantics = [#tpu.dimension_semantics<parallel>], iteration_bounds = array<i64: 1>, scalar_prefetch = 0 : i64, scratch_operands = 0 : i64, tpu.core_type = #tpu.core_type<tc>, window_params = [{transform_indices = @transform_0, window_bounds = array<i64: 512, 128>}, {pipeline_mode = #tpu.pipeline_mode<synchronous>, transform_indices = @transform_1, window_bounds = array<i64: 128, 256>}, {pipeline_mode = #tpu.pipeline_mode<synchronous>, transform_indices = @transform_2, window_bounds = array<i64: 1, 256>}, {pipeline_mode = #tpu.pipeline_mode<synchronous>, transform_indices = @transform_3, window_bounds = array<i64: 256, 128>}, {pipeline_mode = #tpu.pipeline_mode<synchronous>, transform_indices = @transform_4, window_bounds = array<i64: 1, 128>}, {pipeline_mode = #tpu.pipeline_mode<synchronous>, transform_indices = @transform_5, window_bounds = array<i64: 128, 128>}, {pipeline_mode = #tpu.pipeline_mode<synchronous>, transform_indices = @transform_6, window_bounds = array<i64: 1, 128>}, {transform_indices = @transform_7, window_bounds = array<i64: 512, 128>}]} {
    %c0 = arith.constant 0 : index
    %c0_0 = arith.constant 0 : index
    %0 = vector.load %arg1[%c0, %c0_0] : memref<512x128xf32, #tpu.memory_space<vmem>>, vector<512x128xf32>
    %1 = arith.truncf %0 : vector<512x128xf32> to vector<512x128xbf16>
    %c0_1 = arith.constant 0 : index
    %c0_2 = arith.constant 0 : index
    %2 = vector.load %arg2[%c0_1, %c0_2] : memref<128x256xbf16, #tpu.memory_space<vmem>>, vector<128x256xbf16>
    %cst = arith.constant dense<0.000000e+00> : vector<512x256xf32>
    %3 = tpu.matmul %1, %2, %cst {dimension_numbers = #tpu.dot_dimension_numbers<[1], [0], [0], [1], [0, 0, 1, 1], [], []>} : vector<512x128xbf16>, vector<128x256xbf16>, vector<512x256xf32> -> vector<512x256xf32>
    %c0_3 = arith.constant 0 : index
    %c0_4 = arith.constant 0 : index
    %4 = vector.load %arg3[%c0_3, %c0_4] : memref<1x256xf32, #tpu.memory_space<vmem>>, vector<1x256xf32>
    %5 = vector.broadcast %4 : vector<1x256xf32> to vector<512x256xf32>
    %6 = arith.addf %3, %5 : vector<512x256xf32>
    %cst_5 = arith.constant 0.000000e+00 : f32
    %7 = vector.broadcast %cst_5 : f32 to vector<512x256xf32>
    %8 = arith.maximumf %6, %7 : vector<512x256xf32>
    %9 = arith.truncf %8 : vector<512x256xf32> to vector<512x256xbf16>
    %c0_6 = arith.constant 0 : index
    %c0_7 = arith.constant 0 : index
    %10 = vector.load %arg4[%c0_6, %c0_7] : memref<256x128xbf16, #tpu.memory_space<vmem>>, vector<256x128xbf16>
    %cst_8 = arith.constant dense<0.000000e+00> : vector<512x128xf32>
    %11 = tpu.matmul %9, %10, %cst_8 {dimension_numbers = #tpu.dot_dimension_numbers<[1], [0], [0], [1], [0, 0, 1, 1], [], []>} : vector<512x256xbf16>, vector<256x128xbf16>, vector<512x128xf32> -> vector<512x128xf32>
    %c0_9 = arith.constant 0 : index
    %c0_10 = arith.constant 0 : index
    %12 = vector.load %arg5[%c0_9, %c0_10] : memref<1x128xf32, #tpu.memory_space<vmem>>, vector<1x128xf32>
    %13 = vector.broadcast %12 : vector<1x128xf32> to vector<512x128xf32>
    %14 = arith.addf %11, %13 : vector<512x128xf32>
    %cst_11 = arith.constant 0.000000e+00 : f32
    %15 = vector.broadcast %cst_11 : f32 to vector<512x128xf32>
    %16 = arith.maximumf %14, %15 : vector<512x128xf32>
    %17 = arith.truncf %16 : vector<512x128xf32> to vector<512x128xbf16>
    %c0_12 = arith.constant 0 : index
    %c0_13 = arith.constant 0 : index
    %18 = vector.load %arg6[%c0_12, %c0_13] : memref<128x128xbf16, #tpu.memory_space<vmem>>, vector<128x128xbf16>
    %cst_14 = arith.constant dense<0.000000e+00> : vector<512x128xf32>
    %19 = tpu.matmul %17, %18, %cst_14 {dimension_numbers = #tpu.dot_dimension_numbers<[1], [0], [0], [1], [0, 0, 1, 1], [], []>} : vector<512x128xbf16>, vector<128x128xbf16>, vector<512x128xf32> -> vector<512x128xf32>
    %c0_15 = arith.constant 0 : index
    %c0_16 = arith.constant 0 : index
    %20 = vector.load %arg7[%c0_15, %c0_16] : memref<1x128xf32, #tpu.memory_space<vmem>>, vector<1x128xf32>
    %21 = vector.broadcast %20 : vector<1x128xf32> to vector<512x128xf32>
    %22 = arith.addf %19, %21 : vector<512x128xf32>
    %cst_17 = arith.constant dense<0xFF800000> : vector<512xf32>
    %23 = vector.multi_reduction <maximumf>, %22, %cst_17 [1] : vector<512x128xf32> to vector<512xf32>
    %24 = vector.shape_cast %23 : vector<512xf32> to vector<512x1xf32>
    %25 = vector.broadcast %24 : vector<512x1xf32> to vector<512x128xf32>
    %26 = arith.subf %22, %25 : vector<512x128xf32>
    %27 = math.exp %26 : vector<512x128xf32>
    %cst_18 = arith.constant dense<0.000000e+00> : vector<512xf32>
    %28 = vector.multi_reduction <add>, %27, %cst_18 [1] : vector<512x128xf32> to vector<512xf32>
    %29 = vector.shape_cast %28 : vector<512xf32> to vector<512x1xf32>
    %30 = tpu.reciprocal %29 {approx = true} : vector<512x1xf32> -> vector<512x1xf32>
    %31 = vector.broadcast %30 : vector<512x1xf32> to vector<512x128xf32>
    %32 = arith.mulf %27, %31 : vector<512x128xf32>
    %33 = arith.truncf %32 : vector<512x128xf32> to vector<512x128xbf16>
    %c0_19 = arith.constant 0 : index
    %c0_20 = arith.constant 0 : index
    %34 = vector.load %arg8[%c0_19, %c0_20] : memref<512x128xbf16, #tpu.memory_space<vmem>>, vector<512x128xbf16>
    tpu.vector_store %arg8[%c0_19, %c0_20], %33 {strides = array<i32>} : memref<512x128xbf16, #tpu.memory_space<vmem>>, vector<512x128xbf16>,
    return
  }
  func.func @transform_0(%arg0: i32) -> (i32, i32) {
    %c0_i32 = arith.constant 0 : i32
    %c0_i32_0 = arith.constant 0 : i32
    return %arg0, %c0_i32 : i32, i32
  }
  func.func @transform_1(%arg0: i32) -> (i32, i32) {
    %c0_i32 = arith.constant 0 : i32
    %c0_i32_0 = arith.constant 0 : i32
    %c0_i32_1 = arith.constant 0 : i32
    return %c0_i32, %c0_i32_0 : i32, i32
  }
  func.func @transform_2(%arg0: i32) -> (i32, i32) {
    %c0_i32 = arith.constant 0 : i32
    %c0_i32_0 = arith.constant 0 : i32
    %c0_i32_1 = arith.constant 0 : i32
    return %c0_i32, %c0_i32_0 : i32, i32
  }
  func.func @transform_3(%arg0: i32) -> (i32, i32) {
    %c0_i32 = arith.constant 0 : i32
    %c0_i32_0 = arith.constant 0 : i32
    %c0_i32_1 = arith.constant 0 : i32
    return %c0_i32, %c0_i32_0 : i32, i32
  }
  func.func @transform_4(%arg0: i32) -> (i32, i32) {
    %c0_i32 = arith.constant 0 : i32
    %c0_i32_0 = arith.constant 0 : i32
    %c0_i32_1 = arith.constant 0 : i32
    return %c0_i32, %c0_i32_0 : i32, i32
  }
  func.func @transform_5(%arg0: i32) -> (i32, i32) {
    %c0_i32 = arith.constant 0 : i32
    %c0_i32_0 = arith.constant 0 : i32
    %c0_i32_1 = arith.constant 0 : i32
    return %c0_i32, %c0_i32_0 : i32, i32
  }
  func.func @transform_6(%arg0: i32) -> (i32, i32) {
    %c0_i32 = arith.constant 0 : i32
    %c0_i32_0 = arith.constant 0 : i32
    %c0_i32_1 = arith.constant 0 : i32
    return %c0_i32, %c0_i32_0 : i32, i32
  }
  func.func @transform_7(%arg0: i32) -> (i32, i32) {
    %c0_i32 = arith.constant 0 : i32
    %c0_i32_0 = arith.constant 0 : i32
    return %arg0, %c0_i32 : i32, i32
  }
}

</mosaic_0001>

<bundles_post_ra>
// kernel: tpu_custom_call.1
= control target key start
LH: loop header
LB: loop body
LE: loop exit
PB: predicated region body
PF: predicated region fallthrough
CT: control target
= control target key end

     0   :  { %12 = vsyncpa [#allocation3], 0  ;;  %s4549_s0 = inlined_call_operand.hbm [shape: f32[512,128], index: 0, kind: input, shape index: {}]   ;;  %s4550_s1 = inlined_call_operand.hbm [shape: bf16[128,256], index: 1, kind: input, shape index: {}]   ;;  %s4551_s2 = inlined_call_operand.vmem [shape: f32[1,256], index: 2, kind: input, shape index: {}]   ;;  %s4552_s3 = inlined_call_operand.hbm [shape: bf16[256,128], index: 3, kind: input, shape index: {}]   ;;  %s4553_s4 = inlined_call_operand.vmem [shape: f32[1,128], index: 4, kind: input, shape index: {}]   ;;  %s4554_s5 = inlined_call_operand.hbm [shape: bf16[128,128], index: 5, kind: input, shape index: {}]   ;;  %s4555_s6 = inlined_call_operand.vmem [shape: f32[1,128], index: 6, kind: input, shape index: {}]   ;;  %s4556_s7 = inlined_call_operand.hbm [shape: bf16[512,128], index: 7, kind: output, shape index: {}]  }
   0x1   :  { %13 = vsyncpa [#allocation6], 0 }
   0x2   :  { %14 = vsyncpa [#allocation9], 0 }
   0x3   :  { %15 = vsyncpa [#allocation4], 0  ;;  %s3546_s24 = smov [#allocation5]   ;;  %s3547_s26 = smov [#allocation2]  }
   0x4   :  { %s33_s25 = sshll.u32 %s3546_s24, 4  ;;  %s21_s27 = sshll.u32 %s3547_s26, 4  ;;  %s34_s25 = int_to_ptr.vmem [resolvable:$true] %s33_s25  ;;  %s22_s27 = int_to_ptr.vmem [resolvable:$true] %s21_s27 }
   0x5   :  { %s3446_s28 = scalar_lea.vmem %s34_s25, 2048  ;;  %p3451_p1 = scmp.lt.s32.totalorder %s34_s25, %s34_s25 }
   0x6   :  { %p3447_p0 = scmp.ne.s32.totalorder %s34_s25, %s3446_s28  ;;  %p3452_p2 = scmp.lt.s32.totalorder %s3446_s28, %s3446_s28 }
   0x8   :  { %p3453_p3 = por %p3452_p2, %p3451_p1 }
   0xa   :  { %p3454_p4 = pnand %p3453_p3, %p3447_p0 }
   0xc   :  { %3457 = shalt.err (!%p3454_p4)
}
   0xd   :  { %s3548_s29 = smov 128   ;;  %s3549_s30 = smov 8  }
   0xe   :  { %39 = dma.hbm_to_vmem [thread:$0]  %s4550_s1, 2048, %s34_s25, [#allocation6], %s3548_s29, %s3548_s29, %s3549_s30  }
   0xf   :  { %s3466_s10 = scalar_lea.vmem %s22_s27, 8192  ;;  %p3471_p6 = scmp.lt.s32.totalorder %s22_s27, %s22_s27 }
  0x10   :  { %p3467_p5 = scmp.ne.s32.totalorder %s22_s27, %s3466_s10  ;;  %p3472_p7 = scmp.lt.s32.totalorder %s3466_s10, %s3466_s10 }
  0x12   :  { %p3473_p8 = por %p3472_p7, %p3471_p6 }
  0x14   :  { %p3474_p9 = pnand %p3473_p8, %p3467_p5 }
  0x16   :  { %3477 = shalt.err (!%p3474_p9)
}
  0x17   :  { %27 = dma.hbm_to_vmem [thread:$0]  %s4549_s0, 8192, %s22_s27, [#allocation3], %s3548_s29, %s3548_s29, %s3549_s30  }
  0x18   :  { %s3550_s13 = smov [#allocation7]  }
  0x19   :  { %s47_s14 = sshll.u32 %s3550_s13, 4  ;;  %s48_s14 = int_to_ptr.vmem [resolvable:$true] %s47_s14 }
  0x1a   :  { %s3486_s15 = scalar_lea.vmem %s48_s14, 2048  ;;  %p3491_p11 = scmp.lt.s32.totalorder %s48_s14, %s48_s14 }
  0x1b   :  { %p3487_p10 = scmp.ne.s32.totalorder %s48_s14, %s3486_s15  ;;  %p3492_p12 = scmp.lt.s32.totalorder %s3486_s15, %s3486_s15 }
  0x1d   :  { %p3493_p13 = por %p3492_p12, %p3491_p11 }
  0x1f   :  { %p3494_p0 = pnand %p3493_p13, %p3487_p10 }
  0x21   :  { %3497 = shalt.err (!%p3494_p0)
}
  0x22   :  { %s3551_s1 = smov 64   ;;  %s3552_s16 = smov 4  }
  0x23   :  { %53 = dma.hbm_to_vmem [thread:$0]  %s4552_s3, 2048, %s48_s14, [#allocation6], %s3551_s1, %s3551_s1, %s3552_s16  }
  0x24   :  { %s3553_s0 = smov [#allocation8]  }
  0x25   :  { %s61_s19 = sshll.u32 %s3553_s0, 4  ;;  %s62_s19 = int_to_ptr.vmem [resolvable:$true] %s61_s19 }
  0x26   :  { %s3506_s20 = scalar_lea.vmem %s62_s19, 1024  ;;  %p3511_p2 = scmp.lt.s32.totalorder %s62_s19, %s62_s19 }
  0x27   :  { %p3507_p1 = scmp.ne.s32.totalorder %s62_s19, %s3506_s20  ;;  %p3512_p3 = scmp.lt.s32.totalorder %s3506_s20, %s3506_s20 }
  0x29   :  { %p3513_p4 = por %p3512_p3, %p3511_p2 }
  0x2b   :  { %p3514_p5 = pnand %p3513_p4, %p3507_p1 }
  0x2d   :  { %3517 = shalt.err (!%p3514_p5)
}
  0x2e   :  { %67 = dma.hbm_to_vmem [thread:$0]  %s4554_s5, 1024, %s62_s19, [#allocation9], %s3551_s1, %s3551_s1, %s3552_s16  }
  0x2f   :  { %3538 = dma.done.wait [#allocation3], 8192  }
  0x30   :  { %3539 = vsyncadd [#allocation3], 4294959104 }
  0x31   :  { %3540 = dma.done.wait [#allocation6], 4096  }
  0x32   :  { %3541 = vsyncadd [#allocation6], 4294963200 }
  0x33   :  { %3542 = dma.done.wait [#allocation9], 1024  }
  0x34   :  { %3543 = vsyncadd [#allocation9], 4294966272  ;;  %v3554_v0 = vmov 0   ;;  %v3134_v1 = vld [vmem:[#allocation5 + $0x74] ss:$8 sps:$4 sm:$0xff]   ;;  %v83_v17 = vld [vmem:[#allocation2] sm:$0xff] }
  0x35   :  { %319 = vmatprep.mubr.bf16.mxu0 %v3554_v0  ;;  %559 = vmatprep.mubr.bf16.mxu1 %v3554_v0  ;;  %v3136_v2 = vld [vmem:[#allocation5 + $0x70] ss:$8 sps:$4 sm:$0xff]   ;;  %v3137_v3 = vld [vmem:[#allocation5 + $0x64] ss:$8 sps:$4 sm:$0xff]   ;;  %v3139_v4 = vld [vmem:[#allocation5 + $0x60] ss:$8 sps:$4 sm:$0xff]  }
  0x36   :  { %287 = vmatprep.subr.bf16.mxu0 %v3134_v1  ;;  %3108 = vmatprep.subr.bf16.mxu1 %v3134_v1  ;;  %v3140_v5 = vld [vmem:[#allocation5 + $0x54] ss:$8 sps:$4 sm:$0xff]   ;;  %v3142_v6 = vld [vmem:[#allocation5 + $0x50] ss:$8 sps:$4 sm:$0xff]   ;;  %v3143_v7 = vld [vmem:[#allocation5 + $0x44] ss:$8 sps:$4 sm:$0xff]  }
  0x37   :  { %288 = vmatpush1.bf16.msra.mxu0 %v3136_v2  ;;  %3116 = vmatpush1.bf16.msra.mxu1 %v3136_v2  ;;  %v3145_v8 = vld [vmem:[#allocation5 + $0x40] ss:$8 sps:$4 sm:$0xff]   ;;  %v3146_v9 = vld [vmem:[#allocation5 + $0x34] ss:$8 sps:$4 sm:$0xff]   ;;  %v3148_v10 = vld [vmem:[#allocation5 + $0x30] ss:$8 sps:$4 sm:$0xff]  }
  0x38   :  { %289 = vmatprep.subr.bf16.mxu0 %v3137_v3  ;;  %3109 = vmatprep.subr.bf16.mxu1 %v3137_v3  ;;  %v3149_v11 = vld [vmem:[#allocation5 + $0x24] ss:$8 sps:$4 sm:$0xff]   ;;  %v3151_v12 = vld [vmem:[#allocation5 + $0x20] ss:$8 sps:$4 sm:$0xff]   ;;  %v3152_v13 = vld [vmem:[#allocation5 + $0x14] ss:$8 sps:$4 sm:$0xff]  }
  0x39   :  { %v3154_v14 = vld [vmem:[#allocation5 + $0x10] ss:$8 sps:$4 sm:$0xff]   ;;  %v3155_v15 = vld [vmem:[#allocation5 + $0x4] ss:$8 sps:$4 sm:$0xff]   ;;  %v3157_v16 = vld [vmem:[#allocation5] ss:$8 sps:$4 sm:$0xff]  }
  0x3a   :  { %v84_v18 = vld [vmem:[#allocation2 + $0x8] sm:$0xff]  ;;  %v85_v20 = vld [vmem:[#allocation2 + $0x10] sm:$0xff]  ;;  %v86_v21 = vld [vmem:[#allocation2 + $0x18] sm:$0xff] }
  0x3b   :  { %290 = vmatpush1.bf16.msra.mxu0 %v3139_v4  ;;  %3117 = vmatpush1.bf16.msra.mxu1 %v3139_v4  ;;  %v147_v19 = vpack.c.bf16 %v84_v18, %v83_v17  ;;  %v148_v22 = vpack.c.bf16 %v86_v21, %v85_v20  ;;  %v131_v23 = vld [vmem:[#allocation2 + $0x180] sm:$0xff]  ;;  %v132_v24 = vld [vmem:[#allocation2 + $0x188] sm:$0xff]  ;;  %v3158_v26 = vld [vmem:[#allocation7 + $0x38] sm:$0xff]  }
  0x3c   :  { %291 = vmatprep.subr.bf16.mxu0 %v3140_v5  ;;  %3110 = vmatprep.subr.bf16.mxu1 %v3140_v5  ;;  %v171_v25 = vpack.c.bf16 %v132_v24, %v131_v23  ;;  %v87_v27 = vld [vmem:[#allocation2 + $0x20] sm:$0xff]  ;;  %v88_v28 = vld [vmem:[#allocation2 + $0x28] sm:$0xff]  ;;  %v133_v30 = vld [vmem:[#allocation2 + $0x190] sm:$0xff] }
  0x3d   :  { %v149_v29 = vpack.c.bf16 %v88_v28, %v87_v27  ;;  %v134_v31 = vld [vmem:[#allocation2 + $0x198] sm:$0xff]  ;;  %v3159_v33 = vld [vmem:[#allocation7 + $0x30] sm:$0xff]   ;;  %v3160_v36 = vld [vmem:[#allocation7 + $0x28] sm:$0xff]  }
  0x3e   :  { %v172_v32 = vpack.c.bf16 %v134_v31, %v133_v30  ;;  %v89_v34 = vld [vmem:[#allocation2 + $0x30] sm:$0xff]  ;;  %v90_v35 = vld [vmem:[#allocation2 + $0x38] sm:$0xff]  ;;  %v135_v38 = vld [vmem:[#allocation2 + $0x1a0] sm:$0xff] }
  0x3f   :  { %292 = vmatpush1.bf16.msra.mxu0 %v3142_v6  ;;  %3118 = vmatpush1.bf16.msra.mxu1 %v3142_v6  ;;  %v150_v37 = vpack.c.bf16 %v90_v35, %v89_v34  ;;  %v136_v39 = vld [vmem:[#allocation2 + $0x1a8] sm:$0xff]  ;;  %v3161_v41 = vld [vmem:[#allocation7 + $0x20] sm:$0xff]   ;;  %v3162_v44 = vld [vmem:[#allocation7 + $0x18] sm:$0xff]  }
  0x40   :  { %293 = vmatprep.subr.bf16.mxu0 %v3143_v7  ;;  %3111 = vmatprep.subr.bf16.mxu1 %v3143_v7  ;;  %v173_v40 = vpack.c.bf16 %v136_v39, %v135_v38  ;;  %v91_v42 = vld [vmem:[#allocation2 + $0x40] sm:$0xff]  ;;  %v92_v43 = vld [vmem:[#allocation2 + $0x48] sm:$0xff]  ;;  %v137_v46 = vld [vmem:[#allocation2 + $0x1b0] sm:$0xff] }
  0x41   :  { %v151_v45 = vpack.c.bf16 %v92_v43, %v91_v42  ;;  %v138_v47 = vld [vmem:[#allocation2 + $0x1b8] sm:$0xff]  ;;  %v3163_v49 = vld [vmem:[#allocation7 + $0x10] sm:$0xff]   ;;  %v3164_v52 = vld [vmem:[#allocation7 + $0x8] sm:$0xff]  }
  0x42   :  { %v174_v48 = vpack.c.bf16 %v138_v47, %v137_v46  ;;  %v93_v50 = vld [vmem:[#allocation2 + $0x50] sm:$0xff]  ;;  %v94_v51 = vld [vmem:[#allocation2 + $0x58] sm:$0xff]  ;;  %v139_v54 = vld [vmem:[#allocation2 + $0x1c0] sm:$0xff] }
  0x43   :  { %294 = vmatpush1.bf16.msra.mxu0 %v3145_v8  ;;  %3119 = vmatpush1.bf16.msra.mxu1 %v3145_v8  ;;  %v152_v53 = vpack.c.bf16 %v94_v51, %v93_v50  ;;  %v140_v55 = vld [vmem:[#allocation2 + $0x1c8] sm:$0xff]  ;;  %v3165_v57 = vld [vmem:[#allocation7] sm:$0xff]   ;;  %v3166_v60 = vld [vmem:[#allocation7 + $0x78] sm:$0xff]  }
  0x44   :  { %295 = vmatprep.subr.bf16.mxu0 %v3146_v9  ;;  %3112 = vmatprep.subr.bf16.mxu1 %v3146_v9  ;;  %v175_v56 = vpack.c.bf16 %v140_v55, %v139_v54  ;;  %v95_v58 = vld [vmem:[#allocation2 + $0x60] sm:$0xff]  ;;  %v96_v59 = vld [vmem:[#allocation2 + $0x68] sm:$0xff]  ;;  %v141_v62 = vld [vmem:[#allocation2 + $0x1d0] sm:$0xff] }
  0x45   :  { %v153_v61 = vpack.c.bf16 %v96_v59, %v95_v58  ;;  %v142_v63 = vld [vmem:[#allocation2 + $0x1d8] sm:$0xff]  ;;  %v3167_v2 = vld [vmem:[#allocation7 + $0x70] sm:$0xff]   ;;  %v3168_v5 = vld [vmem:[#allocation7 + $0x68] sm:$0xff]  }
  0x46   :  { %v176_v1 = vpack.c.bf16 %v142_v63, %v141_v62  ;;  %v97_v3 = vld [vmem:[#allocation2 + $0x70] sm:$0xff]  ;;  %v98_v4 = vld [vmem:[#allocation2 + $0x78] sm:$0xff]  ;;  %v143_v7 = vld [vmem:[#allocation2 + $0x1e0] sm:$0xff] }
  0x47   :  { %296 = vmatpush1.bf16.msra.mxu0 %v3148_v10  ;;  %3120 = vmatpush1.bf16.msra.mxu1 %v3148_v10  ;;  %v154_v6 = vpack.c.bf16 %v98_v4, %v97_v3  ;;  %v144_v8 = vld [vmem:[#allocation2 + $0x1e8] sm:$0xff]  ;;  %v3169_v10 = vld [vmem:[#allocation7 + $0x60] sm:$0xff]   ;;  %v101_v18 = vld [vmem:[#allocation2 + $0x90] sm:$0xff] }
  0x48   :  { %297 = vmatprep.subr.bf16.mxu0 %v3149_v11  ;;  %3113 = vmatprep.subr.bf16.mxu1 %v3149_v11  ;;  %v177_v9 = vpack.c.bf16 %v144_v8, %v143_v7  ;;  %v99_v11 = vld [vmem:[#allocation2 + $0x80] sm:$0xff]  ;;  %v3171_v20 = vld [vmem:[#allocation7 + $0x50] sm:$0xff]   ;;  %v104_v24 = vld [vmem:[#allocation2 + $0xa8] sm:$0xff]  ;;  %v197_v7 = vlaneseq }
  0x49   :  { %v103_v23 = vld [vmem:[#allocation2 + $0xa0] sm:$0xff]  ;;  %v105_v27 = vld [vmem:[#allocation2 + $0xb0] sm:$0xff]  ;;  %v106_v28 = vld [vmem:[#allocation2 + $0xb8] sm:$0xff] }
  0x4a   :  { %v107_v30 = vld [vmem:[#allocation2 + $0xc0] sm:$0xff]  ;;  %v108_v31 = vld [vmem:[#allocation2 + $0xc8] sm:$0xff]  ;;  %v110_v34 = vld [vmem:[#allocation2 + $0xd8] sm:$0xff]  ;;  %v198_v8 = vshrl.u32 %v197_v7, 7 }
  0x4b   :  { %298 = vmatpush1.bf16.msra.mxu0 %v3151_v12  ;;  %3121 = vmatpush1.bf16.msra.mxu1 %v3151_v12  ;;  %v100_v12 = vld [vmem:[#allocation2 + $0x88] sm:$0xff]  ;;  %v3174_v38 = vld [vmem:[#allocation8 + $0x38] sm:$0xff]   ;;  %v115_v43 = vld [vmem:[#allocation2 + $0x100] sm:$0xff] }
  0x4c   :  { %299 = vmatprep.subr.bf16.mxu0 %v3152_v13  ;;  %3114 = vmatprep.subr.bf16.mxu1 %v3152_v13  ;;  %v3170_v13 = vld [vmem:[#allocation7 + $0x58] sm:$0xff]   ;;  %v117_v46 = vld [vmem:[#allocation2 + $0x110] sm:$0xff]  ;;  %v119_v50 = vld [vmem:[#allocation2 + $0x120] sm:$0xff] }
  0x4d   :  { %v118_v47 = vld [vmem:[#allocation2 + $0x118] sm:$0xff]  ;;  %v120_v51 = vld [vmem:[#allocation2 + $0x128] sm:$0xff]  ;;  %v127_v63 = vld [vmem:[#allocation2 + $0x160] sm:$0xff] }
  0x4e   :  { %v122_v54 = vld [vmem:[#allocation2 + $0x138] sm:$0xff]  ;;  %v3176_v58 = vld [vmem:[#allocation8 + $0x28] sm:$0xff]   ;;  %v129_v3 = vld [vmem:[#allocation2 + $0x170] sm:$0xff] }
  0x4f   :  { %300 = vmatpush1.bf16.msra.mxu0 %v3154_v14  ;;  %3122 = vmatpush1.bf16.msra.mxu1 %v3154_v14  ;;  %v155_v14 = vpack.c.bf16 %v100_v12, %v99_v11  ;;  %v130_v4 = vld [vmem:[#allocation2 + $0x178] sm:$0xff]  ;;  %v195_v11 = vld [vmem:[%s4551_s2] sm:$0x3] }
  0x50   :  { %301 = vmatprep.subr.bf16.mxu0 %v3155_v15  ;;  %3115 = vmatprep.subr.bf16.mxu1 %v3155_v15  ;;  %v145_v15 = vld [vmem:[#allocation2 + $0x1f0] sm:$0xff] }
  0x53   :  { %302 = vmatpush1.bf16.msra.mxu0 %v3157_v16  ;;  %3123 = vmatpush1.bf16.msra.mxu1 %v3157_v16  ;;  %v146_v16 = vld [vmem:[#allocation2 + $0x1f8] sm:$0xff] }
  0x54   :  { %967 = vmatprep.subr.bf16.mxu1 %v3554_v0  ;;  %v178_v17 = vpack.c.bf16 %v146_v16, %v145_v15  ;;  %3028 = vmatprep.subr.bf16.mxu0 %v3174_v38 }
  0x56   :  { %320 = vmatmul.mubr.bf16.vlgmr.msra.gmra.mxu0 %v147_v19  ;;  %560 = vmatmul.mubr.bf16.vlgmr.msra.gmra.mxu1 %v171_v25  ;;  %v102_v19 = vld [vmem:[#allocation2 + $0x98] sm:$0xff]  ;;  %v3173_v25 = vld [vmem:[#allocation7 + $0x40] sm:$0xff]  }
  0x57   :  { %329 = vmatprep.mubr.bf16.mxu0 %v3554_v0  ;;  %569 = vmatprep.mubr.bf16.mxu1 %v3554_v0  ;;  %v156_v21 = vpack.c.bf16 %v102_v19, %v101_v18 }
  0x58   :  { %968 = vmatpush1.bf16.msra.mxu1 %v3158_v26  ;;  %v157_v26 = vpack.c.bf16 %v104_v24, %v103_v23  ;;  %3029 = vmatpush3.bf16.msra.mxu0 %v3174_v38 }
  0x59   :  { %969 = vmatprep.subr.bf16.mxu1 %v3554_v0 }
  0x5c   :  { %970 = vmatpush1.bf16.msra.mxu1 %v3159_v33  ;;  %v109_v33 = vld [vmem:[#allocation2 + $0xd0] sm:$0xff] }
  0x5d   :  { %971 = vmatprep.subr.bf16.mxu1 %v3554_v0  ;;  %v160_v35 = vpack.c.bf16 %v110_v34, %v109_v33 }
  0x5e   :  { %330 = vmatmul.mubr.bf16.gmra.mxu0 %v148_v22  ;;  %570 = vmatmul.mubr.bf16.gmra.mxu1 %v172_v32  ;;  %v3172_v22 = vld [vmem:[#allocation7 + $0x48] sm:$0xff]   ;;  %v159_v32 = vpack.c.bf16 %v108_v31, %v107_v30 }
  0x5f   :  { %339 = vmatprep.mubr.bf16.mxu0 %v3554_v0  ;;  %579 = vmatprep.mubr.bf16.mxu1 %v3554_v0 }
  0x60   :  { %972 = vmatpush1.bf16.msra.mxu1 %v3160_v36  ;;  %v111_v36 = vld [vmem:[#allocation2 + $0xe0] sm:$0xff] }
  0x61   :  { %973 = vmatprep.subr.bf16.mxu1 %v3554_v0 }
  0x64   :  { %974 = vmatpush1.bf16.msra.mxu1 %v3161_v41  ;;  %v114_v41 = vld [vmem:[#allocation2 + $0xf8] sm:$0xff] }
  0x65   :  { %975 = vmatprep.subr.bf16.mxu1 %v3554_v0 }
  0x66   :  { %340 = vmatmul.mubr.bf16.gmra.mxu0 %v149_v29  ;;  %580 = vmatmul.mubr.bf16.gmra.mxu1 %v173_v40  ;;  %v158_v29 = vpack.c.bf16 %v106_v28, %v105_v27  ;;  %v113_v40 = vld [vmem:[#allocation2 + $0xf0] sm:$0xff] }
  0x67   :  { %349 = vmatprep.mubr.bf16.mxu0 %v3554_v0  ;;  %589 = vmatprep.mubr.bf16.mxu1 %v3554_v0  ;;  %v162_v42 = vpack.c.bf16 %v114_v41, %v113_v40 }
  0x68   :  { %976 = vmatpush1.bf16.msra.mxu1 %v3162_v44  ;;  %v116_v44 = vld [vmem:[#allocation2 + $0x108] sm:$0xff] }
  0x69   :  { %977 = vmatprep.subr.bf16.mxu1 %v3554_v0 }
  0x6c   :  { %978 = vmatpush1.bf16.msra.mxu1 %v3163_v49  ;;  %v164_v49 = vpack.c.bf16 %v118_v47, %v117_v46 }
  0x6d   :  { %979 = vmatprep.subr.bf16.mxu1 %v3554_v0 }
  0x6e   :  { %350 = vmatmul.mubr.bf16.gmra.mxu0 %v150_v37  ;;  %590 = vmatmul.mubr.bf16.gmra.mxu1 %v174_v48  ;;  %v112_v37 = vld [vmem:[#allocation2 + $0xe8] sm:$0xff]  ;;  %v3175_v48 = vld [vmem:[#allocation8 + $0x30] sm:$0xff]  }
  0x6f   :  { %359 = vmatprep.mubr.bf16.mxu0 %v3554_v0  ;;  %599 = vmatprep.mubr.bf16.mxu1 %v3554_v0  ;;  %v161_v39 = vpack.c.bf16 %v112_v37, %v111_v36 }
  0x70   :  { %980 = vmatpush1.bf16.msra.mxu1 %v3164_v52  ;;  %3030 = vmatprep.subr.bf16.mxu0 %v3175_v48  ;;  %v165_v52 = vpack.c.bf16 %v120_v51, %v119_v50 }
  0x71   :  { %981 = vmatprep.subr.bf16.mxu1 %v3554_v0  ;;  %3031 = vmatpush3.bf16.msra.mxu0 %v3175_v48 }
  0x72   :  { %3032 = vmatprep.subr.bf16.mxu0 %v3176_v58 }
  0x74   :  { %982 = vmatpush1.bf16.msra.mxu1 %v3165_v57  ;;  %v124_v57 = vld [vmem:[#allocation2 + $0x148] sm:$0xff] }
  0x75   :  { %983 = vmatprep.subr.bf16.mxu1 %v3554_v0  ;;  %3033 = vmatpush3.bf16.msra.mxu0 %v3176_v58 }
  0x76   :  { %360 = vmatmul.mubr.bf16.gmra.mxu0 %v151_v45  ;;  %600 = vmatmul.mubr.bf16.gmra.mxu1 %v175_v56  ;;  %v163_v45 = vpack.c.bf16 %v116_v44, %v115_v43  ;;  %v123_v56 = vld [vmem:[#allocation2 + $0x140] sm:$0xff] }
  0x77   :  { %369 = vmatprep.mubr.bf16.mxu0 %v3554_v0  ;;  %609 = vmatprep.mubr.bf16.mxu1 %v3554_v0  ;;  %v167_v59 = vpack.c.bf16 %v124_v57, %v123_v56 }
  0x78   :  { %984 = vmatpush2.bf16.msra.mxu1 %v3166_v60  ;;  %v125_v60 = vld [vmem:[#allocation2 + $0x150] sm:$0xff] }
  0x79   :  { %985 = vmatprep.subr.bf16.mxu1 %v3554_v0 }
  0x7c   :  { %986 = vmatpush2.bf16.msra.mxu1 %v3167_v2 }
  0x7d   :  { %987 = vmatprep.subr.bf16.mxu1 %v3554_v0 }
  0x7e   :  { %370 = vmatmul.mubr.bf16.gmra.mxu0 %v152_v53  ;;  %610 = vmatmul.mubr.bf16.gmra.mxu1 %v176_v1  ;;  %v121_v53 = vld [vmem:[#allocation2 + $0x130] sm:$0xff]  ;;  %v128_v1 = vld [vmem:[#allocation2 + $0x168] sm:$0xff] }
  0x7f   :  { %379 = vmatprep.mubr.bf16.mxu0 %v3554_v0  ;;  %619 = vmatprep.mubr.bf16.mxu1 %v3554_v0  ;;  %v166_v55 = vpack.c.bf16 %v122_v54, %v121_v53  ;;  %v169_v2 = vpack.c.bf16 %v128_v1, %v127_v63 }
  0x80   :  { %988 = vmatpush2.bf16.msra.mxu1 %v3168_v5  ;;  %v3177_v5 = vld [vmem:[#allocation8 + $0x20] sm:$0xff]  }
  0x81   :  { %989 = vmatprep.subr.bf16.mxu1 %v3554_v0  ;;  %3034 = vmatprep.subr.bf16.mxu0 %v3177_v5 }
  0x82   :  { %3035 = vmatpush3.bf16.msra.mxu0 %v3177_v5  ;;  %v3179_v5 = vld [vmem:[#allocation8 + $0x10] sm:$0xff]  }
  0x84   :  { %990 = vmatpush2.bf16.msra.mxu1 %v3169_v10  ;;  %v199_v10 = vsub.s32 0, %v198_v8 }
  0x85   :  { %991 = vmatprep.subr.bf16.mxu1 %v3554_v0 }
  0x86   :  { %380 = vmatmul.mubr.bf16.gmra.mxu0 %v153_v61  ;;  %620 = vmatmul.mubr.bf16.gmra.mxu1 %v177_v9  ;;  %v126_v61 = vld [vmem:[#allocation2 + $0x158] sm:$0xff]  ;;  %v203_v9 = vsub.s32 1, %v198_v8 }
  0x87   :  { %389 = vmatprep.mubr.bf16.mxu0 %v3554_v0  ;;  %629 = vmatprep.mubr.bf16.mxu1 %v3554_v0  ;;  %v168_v62 = vpack.c.bf16 %v126_v61, %v125_v60 }
  0x88   :  { %992 = vmatpush2.bf16.msra.mxu1 %v3170_v13  ;;  %v3665_v13 = vrot.slane %v195_v11, %v203_v9 }
  0x89   :  { %993 = vmatprep.subr.bf16.mxu1 %v3554_v0 }
  0x8c   :  { %994 = vmatpush2.bf16.msra.mxu1 %v3171_v20 }
  0x8d   :  { %995 = vmatprep.subr.bf16.mxu1 %v3554_v0 }
  0x8e   :  { %390 = vmatmul.mubr.bf16.gmra.mxu0 %v154_v6  ;;  %630 = vmatmul.mubr.bf16.gmra.mxu1 %v178_v17  ;;  %v170_v6 = vpack.c.bf16 %v130_v4, %v129_v3 }
  0x8f   :  { %399 = vmatprep.mubr.bf16.mxu0 %v3554_v0 }
  0x90   :  { %996 = vmatpush2.bf16.msra.mxu1 %v3172_v22 }
  0x91   :  { %997 = vmatprep.subr.bf16.mxu1 %v3554_v0 }
  0x94   :  { %998 = vmatpush2.bf16.msra.mxu1 %v3173_v25  ;;  %v3178_v25 = vld [vmem:[#allocation8 + $0x18] sm:$0xff]  }
  0x95   :  { %3036 = vmatprep.subr.bf16.mxu0 %v3178_v25 }
  0x96   :  { %400 = vmatmul.mubr.bf16.gmra.mxu0 %v155_v14  ;;  %v3667_v14 = vrot.slane %v195_v11, %v199_v10 }
  0x97   :  { %409 = vmatprep.mubr.bf16.mxu0 %v3554_v0  ;;  %3037 = vmatpush3.bf16.msra.mxu0 %v3178_v25 }
  0x98   :  { %3038 = vmatprep.subr.bf16.mxu0 %v3179_v5 }
  0x9b   :  { %3039 = vmatpush3.bf16.msra.mxu0 %v3179_v5 }
  0x9e   :  { %410 = vmatmul.mubr.bf16.gmra.mxu0 %v156_v21 }
  0x9f   :  { %419 = vmatprep.mubr.bf16.mxu0 %v3554_v0 }
  0xa6   :  { %420 = vmatmul.mubr.bf16.gmra.mxu0 %v157_v26 }
  0xa7   :  { %429 = vmatprep.mubr.bf16.mxu0 %v3554_v0 }
  0xae   :  { %430 = vmatmul.mubr.bf16.gmra.mxu0 %v158_v29 }
  0xaf   :  { %439 = vmatprep.mubr.bf16.mxu0 %v3554_v0 }
  0xb6   :  { %440 = vmatmul.mubr.bf16.gmra.mxu0 %v159_v32 }
  0xb7   :  { %449 = vmatprep.mubr.bf16.mxu0 %v3554_v0 }
  0xbe   :  { %450 = vmatmul.mubr.bf16.gmra.mxu0 %v160_v35 }
  0xbf   :  { %459 = vmatprep.mubr.bf16.mxu0 %v3554_v0 }
  0xc6   :  { %460 = vmatmul.mubr.bf16.gmra.mxu0 %v161_v39 }
  0xc7   :  { %469 = vmatprep.mubr.bf16.mxu0 %v3554_v0 }
  0xce   :  { %470 = vmatmul.mubr.bf16.gmra.mxu0 %v162_v42 }
  0xcf   :  { %479 = vmatprep.mubr.bf16.mxu0 %v3554_v0 }
  0xd6   :  { %480 = vmatmul.mubr.bf16.gmra.mxu0 %v163_v45 }
  0xd7   :  { %489 = vmatprep.mubr.bf16.mxu0 %v3554_v0 }
  0xde   :  { %490 = vmatmul.mubr.bf16.gmra.mxu0 %v164_v49 }
  0xdf   :  { %499 = vmatprep.mubr.bf16.mxu0 %v3554_v0 }
  0xe6   :  { %500 = vmatmul.mubr.bf16.gmra.mxu0 %v165_v52 }
  0xe7   :  { %509 = vmatprep.mubr.bf16.mxu0 %v3554_v0 }
  0xee   :  { %510 = vmatmul.mubr.bf16.gmra.mxu0 %v166_v55 }
  0xef   :  { %519 = vmatprep.mubr.bf16.mxu0 %v3554_v0 }
  0xf6   :  { %520 = vmatmul.mubr.bf16.gmra.mxu0 %v167_v59 }
  0xf7   :  { %529 = vmatprep.mubr.bf16.mxu0 %v3554_v0 }
  0xfe   :  { %530 = vmatmul.mubr.bf16.gmra.mxu0 %v168_v62 }
  0xff   :  { %539 = vmatprep.mubr.bf16.mxu0 %v3554_v0 }
 0x106   :  { %540 = vmatmul.mubr.bf16.gmra.mxu0 %v169_v2 }
 0x107   :  { %549 = vmatprep.mubr.bf16.mxu0 %v3554_v0 }
 0x10e   :  { %550 = vmatmul.mubr.bf16.gmra.mxu0 %v170_v6 }
 0x116   :  { %v321_v12 = vpop.f32.mrf.mxu0 }
 0x117   :  { %v322_v18 = vadd.f32 %v321_v12, %v3667_v14 }
 0x118   :  { %v323_v0 = vpop.f32.mrf.mxu0 }
 0x119   :  { %v324_v16 = vadd.f32 %v323_v0, %v3665_v13  ;;  %v640_v26 = vmax.f32 %v322_v18, 0.0 }
 0x11a   :  { %v325_v15 = vpop.f32.mrf.mxu0 }
 0x11b   :  { %v326_v17 = vadd.f32 %v325_v15, %v3667_v14  ;;  %v641_v23 = vmax.f32 %v324_v16, 0.0 }
 0x11c   :  { %v327_v19 = vpop.f32.mrf.mxu0 }
 0x11d   :  { %v328_v20 = vadd.f32 %v327_v19, %v3665_v13  ;;  %v642_v21 = vmax.f32 %v326_v17, 0.0 }
 0x11e   :  { %v331_v22 = vpop.f32.mrf.mxu0 }
 0x11f   :  { %v643_v24 = vmax.f32 %v328_v20, 0.0  ;;  %v768_v29 = vpack.c.bf16 %v642_v21, %v640_v26  ;;  %v332_v33 = vadd.f32 %v331_v22, %v3667_v14 }
 0x120   :  { %v333_v27 = vpop.f32.mrf.mxu0 }
 0x121   :  { %v769_v28 = vpack.c.bf16 %v643_v24, %v641_v23  ;;  %v334_v31 = vadd.f32 %v333_v27, %v3665_v13  ;;  %v644_v40 = vmax.f32 %v332_v33, 0.0 }
 0x122   :  { %v335_v30 = vpop.f32.mrf.mxu0 }
 0x123   :  { %v336_v32 = vadd.f32 %v335_v30, %v3667_v14  ;;  %999 = vmatprep.mubr.bf16.mxu1 %v769_v28  ;;  %v645_v38 = vmax.f32 %v334_v31, 0.0 }
 0x124   :  { %v337_v34 = vpop.f32.mrf.mxu0  ;;  %1000 = vmatmul.mubr.bf16.vlgmr.msra.gmra.mxu1 %v768_v29 }
 0x125   :  { %v338_v35 = vadd.f32 %v337_v34, %v3665_v13  ;;  %v646_v36 = vmax.f32 %v336_v32, 0.0 }
 0x126   :  { %v341_v37 = vpop.f32.mrf.mxu0 }
 0x127   :  { %v647_v39 = vmax.f32 %v338_v35, 0.0  ;;  %v770_v43 = vpack.c.bf16 %v646_v36, %v644_v40  ;;  %v342_v47 = vadd.f32 %v341_v37, %v3667_v14 }
 0x128   :  { %v343_v41 = vpop.f32.mrf.mxu0 }
 0x129   :  { %v771_v42 = vpack.c.bf16 %v647_v39, %v645_v38  ;;  %v344_v45 = vadd.f32 %v343_v41, %v3665_v13  ;;  %v648_v54 = vmax.f32 %v342_v47, 0.0 }
 0x12a   :  { %v345_v44 = vpop.f32.mrf.mxu0 }
 0x12b   :  { %v346_v46 = vadd.f32 %v345_v44, %v3667_v14  ;;  %1007 = vmatprep.mubr.bf16.mxu1 %v771_v42  ;;  %v649_v52 = vmax.f32 %v344_v45, 0.0 }
 0x12c   :  { %v347_v48 = vpop.f32.mrf.mxu0  ;;  %1008 = vmatmul.mubr.bf16.gmra.mxu1 %v770_v43 }
 0x12d   :  { %v348_v49 = vadd.f32 %v347_v48, %v3665_v13  ;;  %v650_v50 = vmax.f32 %v346_v46, 0.0 }
 0x12e   :  { %v351_v51 = vpop.f32.mrf.mxu0 }
 0x12f   :  { %v651_v53 = vmax.f32 %v348_v49, 0.0  ;;  %v772_v57 = vpack.c.bf16 %v650_v50, %v648_v54  ;;  %v352_v61 = vadd.f32 %v351_v51, %v3667_v14  ;;  %v3180_v49 = vld [vmem:[#allocation8 + $0x8] sm:$0xff]  }
 0x130   :  { %v353_v55 = vpop.f32.mrf.mxu0  ;;  %3040 = vmatprep.subr.bf16.mxu0 %v3180_v49 }
 0x131   :  { %v773_v56 = vpack.c.bf16 %v651_v53, %v649_v52  ;;  %v354_v59 = vadd.f32 %v353_v55, %v3665_v13  ;;  %v652_v6 = vmax.f32 %v352_v61, 0.0  ;;  %3041 = vmatpush3.bf16.msra.mxu0 %v3180_v49 }
 0x132   :  { %v355_v58 = vpop.f32.mrf.mxu0 }
 0x133   :  { %v356_v60 = vadd.f32 %v355_v58, %v3667_v14  ;;  %1015 = vmatprep.mubr.bf16.mxu1 %v773_v56  ;;  %v653_v3 = vmax.f32 %v354_v59, 0.0 }
 0x134   :  { %v357_v62 = vpop.f32.mrf.mxu0  ;;  %1016 = vmatmul.mubr.bf16.gmra.mxu1 %v772_v57 }
 0x135   :  { %v358_v63 = vadd.f32 %v357_v62, %v3665_v13  ;;  %v654_v1 = vmax.f32 %v356_v60, 0.0 }
 0x136   :  { %v361_v2 = vpop.f32.mrf.mxu0 }
 0x137   :  { %v655_v4 = vmax.f32 %v358_v63, 0.0  ;;  %v774_v9 = vpack.c.bf16 %v654_v1, %v652_v6  ;;  %v362_v0 = vadd.f32 %v361_v2, %v3667_v14 }
 0x138   :  { %v363_v7 = vpop.f32.mrf.mxu0 }
 0x139   :  { %v775_v8 = vpack.c.bf16 %v655_v4, %v653_v3  ;;  %v364_v11 = vadd.f32 %v363_v7, %v3665_v13  ;;  %v656_v21 = vmax.f32 %v362_v0, 0.0 }
 0x13a   :  { %v365_v10 = vpop.f32.mrf.mxu0 }
 0x13b   :  { %v366_v12 = vadd.f32 %v365_v10, %v3667_v14  ;;  %1023 = vmatprep.mubr.bf16.mxu1 %v775_v8  ;;  %v657_v19 = vmax.f32 %v364_v11, 0.0  ;;  %v3181_v11 = vld [vmem:[#allocation8] sm:$0xff]  }
 0x13c   :  { %v367_v15 = vpop.f32.mrf.mxu0  ;;  %1024 = vmatmul.mubr.bf16.gmra.mxu1 %v774_v9  ;;  %3042 = vmatprep.subr.bf16.mxu0 %v3181_v11 }
 0x13d   :  { %v368_v16 = vadd.f32 %v367_v15, %v3665_v13  ;;  %v658_v17 = vmax.f32 %v366_v12, 0.0  ;;  %3043 = vmatpush3.bf16.msra.mxu0 %v3181_v11 }
 0x13e   :  { %v371_v18 = vpop.f32.mrf.mxu0 }
 0x13f   :  { %v659_v20 = vmax.f32 %v368_v16, 0.0  ;;  %v776_v24 = vpack.c.bf16 %v658_v17, %v656_v21  ;;  %v372_v28 = vadd.f32 %v371_v18, %v3667_v14 }
 0x140   :  { %v373_v22 = vpop.f32.mrf.mxu0 }
 0x141   :  { %v777_v23 = vpack.c.bf16 %v659_v20, %v657_v19  ;;  %v374_v26 = vadd.f32 %v373_v22, %v3665_v13  ;;  %v660_v35 = vmax.f32 %v372_v28, 0.0 }
 0x142   :  { %v375_v25 = vpop.f32.mrf.mxu0 }
 0x143   :  { %v376_v27 = vadd.f32 %v375_v25, %v3667_v14  ;;  %1031 = vmatprep.mubr.bf16.mxu1 %v777_v23  ;;  %v661_v33 = vmax.f32 %v374_v26, 0.0 }
 0x144   :  { %v377_v29 = vpop.f32.mrf.mxu0  ;;  %1032 = vmatmul.mubr.bf16.gmra.mxu1 %v776_v24 }
 0x145   :  { %v378_v30 = vadd.f32 %v377_v29, %v3665_v13  ;;  %v662_v31 = vmax.f32 %v376_v27, 0.0  ;;  %v3709_v29 = vpop.f32.mrf.mxu1 }
 0x146   :  { %v381_v32 = vpop.f32.mrf.mxu0 }
 0x147   :  { %v663_v34 = vmax.f32 %v378_v30, 0.0  ;;  %v778_v38 = vpack.c.bf16 %v662_v31, %v660_v35  ;;  %v382_v42 = vadd.f32 %v381_v32, %v3667_v14 }
 0x148   :  { %v383_v36 = vpop.f32.mrf.mxu0 }
 0x149   :  { %v779_v37 = vpack.c.bf16 %v663_v34, %v661_v33  ;;  %v384_v40 = vadd.f32 %v383_v36, %v3665_v13  ;;  %v664_v50 = vmax.f32 %v382_v42, 0.0 }
 0x14a   :  { %v385_v39 = vpop.f32.mrf.mxu0 }
 0x14b   :  { %v386_v41 = vadd.f32 %v385_v39, %v3667_v14  ;;  %1039 = vmatprep.mubr.bf16.mxu1 %v779_v37  ;;  %v665_v47 = vmax.f32 %v384_v40, 0.0  ;;  %v3711_v37 = vpop.f32.mrf.mxu1 }
 0x14c   :  { %v387_v43 = vpop.f32.mrf.mxu0  ;;  %1040 = vmatmul.mubr.bf16.gmra.mxu1 %v778_v38 }
 0x14d   :  { %v388_v44 = vadd.f32 %v387_v43, %v3665_v13  ;;  %v666_v45 = vmax.f32 %v386_v41, 0.0 }
 0x14e   :  { %v391_v46 = vpop.f32.mrf.mxu0 }
 0x14f   :  { %v667_v48 = vmax.f32 %v388_v44, 0.0  ;;  %v780_v53 = vpack.c.bf16 %v666_v45, %v664_v50  ;;  %v392_v57 = vadd.f32 %v391_v46, %v3667_v14  ;;  %v3717_v45 = vpop.f32.mrf.mxu1 }
 0x150   :  { %v393_v51 = vpop.f32.mrf.mxu0 }
 0x151   :  { %v781_v52 = vpack.c.bf16 %v667_v48, %v665_v47  ;;  %v394_v55 = vadd.f32 %v393_v51, %v3665_v13  ;;  %v668_v1 = vmax.f32 %v392_v57, 0.0 }
 0x152   :  { %v395_v54 = vpop.f32.mrf.mxu0 }
 0x153   :  { %v396_v56 = vadd.f32 %v395_v54, %v3667_v14  ;;  %1047 = vmatprep.mubr.bf16.mxu1 %v781_v52  ;;  %v669_v62 = vmax.f32 %v394_v55, 0.0 }
 0x154   :  { %v397_v58 = vpop.f32.mrf.mxu0  ;;  %1048 = vmatmul.mubr.bf16.gmra.mxu1 %v780_v53  ;;  %v3719_v53 = vpop.f32.mrf.mxu1 }
 0x155   :  { %v398_v59 = vadd.f32 %v397_v58, %v3665_v13  ;;  %v670_v60 = vmax.f32 %v396_v56, 0.0 }
 0x156   :  { %v401_v61 = vpop.f32.mrf.mxu0 }
 0x157   :  { %v671_v63 = vmax.f32 %v398_v59, 0.0  ;;  %v782_v4 = vpack.c.bf16 %v670_v60, %v668_v1  ;;  %v402_v8 = vadd.f32 %v401_v61, %v3667_v14  ;;  %v3725_v61 = vpop.f32.mrf.mxu1 }
 0x158   :  { %v403_v2 = vpop.f32.mrf.mxu0 }
 0x159   :  { %v783_v3 = vpack.c.bf16 %v671_v63, %v669_v62  ;;  %v404_v6 = vadd.f32 %v403_v2, %v3665_v13  ;;  %v672_v17 = vmax.f32 %v402_v8, 0.0 }
 0x15a   :  { %v405_v5 = vpop.f32.mrf.mxu0 }
 0x15b   :  { %v406_v7 = vadd.f32 %v405_v5, %v3667_v14  ;;  %1055 = vmatprep.mubr.bf16.mxu1 %v783_v3  ;;  %v673_v15 = vmax.f32 %v404_v6, 0.0  ;;  %v3727_v6 = vpop.f32.mrf.mxu1 }
 0x15c   :  { %v407_v9 = vpop.f32.mrf.mxu0  ;;  %1056 = vmatmul.mubr.bf16.gmra.mxu1 %v782_v4 }
 0x15d   :  { %v408_v10 = vadd.f32 %v407_v9, %v3665_v13  ;;  %v674_v12 = vmax.f32 %v406_v7, 0.0 }
 0x15e   :  { %v411_v0 = vpop.f32.mrf.mxu0 }
 0x15f   :  { %v675_v16 = vmax.f32 %v408_v10, 0.0  ;;  %v784_v20 = vpack.c.bf16 %v674_v12, %v672_v17  ;;  %v412_v24 = vadd.f32 %v411_v0, %v3667_v14 }
 0x160   :  { %v413_v18 = vpop.f32.mrf.mxu0 }
 0x161   :  { %v785_v19 = vpack.c.bf16 %v675_v16, %v673_v15  ;;  %v414_v22 = vadd.f32 %v413_v18, %v3665_v13  ;;  %v676_v32 = vmax.f32 %v412_v24, 0.0  ;;  %v3733_v15 = vpop.f32.mrf.mxu1 }
 0x162   :  { %v415_v21 = vpop.f32.mrf.mxu0 }
 0x163   :  { %v416_v23 = vadd.f32 %v415_v21, %v3667_v14  ;;  %1063 = vmatprep.mubr.bf16.mxu1 %v785_v19  ;;  %v677_v30 = vmax.f32 %v414_v22, 0.0 }
 0x164   :  { %v417_v25 = vpop.f32.mrf.mxu0  ;;  %1064 = vmatmul.mubr.bf16.gmra.mxu1 %v784_v20 }
 0x165   :  { %v418_v26 = vadd.f32 %v417_v25, %v3665_v13  ;;  %v678_v27 = vmax.f32 %v416_v23, 0.0  ;;  %v3735_v23 = vpop.f32.mrf.mxu1 }
 0x166   :  { %v421_v28 = vpop.f32.mrf.mxu0 }
 0x167   :  { %v679_v31 = vmax.f32 %v418_v26, 0.0  ;;  %v786_v35 = vpack.c.bf16 %v678_v27, %v676_v32  ;;  %v422_v40 = vadd.f32 %v421_v28, %v3667_v14  ;;  %v3741_v32 = vpop.f32.mrf.mxu1 }
 0x168   :  { %v423_v33 = vpop.f32.mrf.mxu0 }
 0x169   :  { %v787_v34 = vpack.c.bf16 %v679_v31, %v677_v30  ;;  %v424_v38 = vadd.f32 %v423_v33, %v3665_v13  ;;  %v680_v48 = vmax.f32 %v422_v40, 0.0 }
 0x16a   :  { %v425_v36 = vpop.f32.mrf.mxu0 }
 0x16b   :  { %v426_v39 = vadd.f32 %v425_v36, %v3667_v14  ;;  %1071 = vmatprep.mubr.bf16.mxu1 %v787_v34  ;;  %v681_v46 = vmax.f32 %v424_v38, 0.0 }
 0x16c   :  { %v427_v41 = vpop.f32.mrf.mxu0  ;;  %1072 = vmatmul.mubr.bf16.gmra.mxu1 %v786_v35 }
 0x16d   :  { %v428_v42 = vadd.f32 %v427_v41, %v3665_v13  ;;  %v682_v43 = vmax.f32 %v426_v39, 0.0  ;;  %v3743_v41 = vpop.f32.mrf.mxu1 }
 0x16e   :  { %v431_v44 = vpop.f32.mrf.mxu0 }
 0x16f   :  { %v683_v47 = vmax.f32 %v428_v42, 0.0  ;;  %v788_v51 = vpack.c.bf16 %v682_v43, %v680_v48  ;;  %v432_v56 = vadd.f32 %v431_v44, %v3667_v14 }
 0x170   :  { %v433_v49 = vpop.f32.mrf.mxu0 }
 0x171   :  { %v789_v50 = vpack.c.bf16 %v683_v47, %v681_v46  ;;  %v434_v54 = vadd.f32 %v433_v49, %v3665_v13  ;;  %v684_v1 = vmax.f32 %v432_v56, 0.0 }
 0x172   :  { %v435_v52 = vpop.f32.mrf.mxu0 }
 0x173   :  { %v436_v55 = vadd.f32 %v435_v52, %v3667_v14  ;;  %1079 = vmatprep.mubr.bf16.mxu1 %v789_v50  ;;  %v685_v62 = vmax.f32 %v434_v54, 0.0  ;;  %v3749_v50 = vpop.f32.mrf.mxu1 }
 0x174   :  { %v437_v57 = vpop.f32.mrf.mxu0  ;;  %1080 = vmatmul.mubr.bf16.gmra.mxu1 %v788_v51 }
 0x175   :  { %v438_v58 = vadd.f32 %v437_v57, %v3665_v13  ;;  %v686_v59 = vmax.f32 %v436_v55, 0.0 }
 0x176   :  { %v441_v60 = vpop.f32.mrf.mxu0 }
 0x177   :  { %v687_v63 = vmax.f32 %v438_v58, 0.0  ;;  %v790_v4 = vpack.c.bf16 %v686_v59, %v684_v1  ;;  %v442_v9 = vadd.f32 %v441_v60, %v3667_v14  ;;  %v3751_v59 = vpop.f32.mrf.mxu1 }
 0x178   :  { %v443_v2 = vpop.f32.mrf.mxu0 }
 0x179   :  { %v791_v3 = vpack.c.bf16 %v687_v63, %v685_v62  ;;  %v444_v7 = vadd.f32 %v443_v2, %v3665_v13  ;;  %v688_v18 = vmax.f32 %v442_v9, 0.0 }
 0x17a   :  { %v445_v5 = vpop.f32.mrf.mxu0 }
 0x17b   :  { %v446_v8 = vadd.f32 %v445_v5, %v3667_v14  ;;  %1087 = vmatprep.mubr.bf16.mxu1 %v791_v3  ;;  %v689_v16 = vmax.f32 %v444_v7, 0.0  ;;  %v3757_v5 = vpop.f32.mrf.mxu1 }
 0x17c   :  { %v447_v10 = vpop.f32.mrf.mxu0  ;;  %1088 = vmatmul.mubr.bf16.gmra.mxu1 %v790_v4 }
 0x17d   :  { %v448_v11 = vadd.f32 %v447_v10, %v3665_v13  ;;  %v690_v12 = vmax.f32 %v446_v8, 0.0 }
 0x17e   :  { %v451_v0 = vpop.f32.mrf.mxu0 }
 0x17f   :  { %v691_v17 = vmax.f32 %v448_v11, 0.0  ;;  %v792_v21 = vpack.c.bf16 %v690_v12, %v688_v18  ;;  %v452_v26 = vadd.f32 %v451_v0, %v3667_v14 }
 0x180   :  { %v453_v19 = vpop.f32.mrf.mxu0 }
 0x181   :  { %v793_v20 = vpack.c.bf16 %v691_v17, %v689_v16  ;;  %v454_v24 = vadd.f32 %v453_v19, %v3665_v13  ;;  %v692_v35 = vmax.f32 %v452_v26, 0.0  ;;  %v3759_v16 = vpop.f32.mrf.mxu1 }
 0x182   :  { %v455_v22 = vpop.f32.mrf.mxu0 }
 0x183   :  { %v456_v25 = vadd.f32 %v455_v22, %v3667_v14  ;;  %1095 = vmatprep.mubr.bf16.mxu1 %v793_v20  ;;  %v693_v33 = vmax.f32 %v454_v24, 0.0 }
 0x184   :  { %v457_v27 = vpop.f32.mrf.mxu0  ;;  %1096 = vmatmul.mubr.bf16.gmra.mxu1 %v792_v21 }
 0x185   :  { %v458_v28 = vadd.f32 %v457_v27, %v3665_v13  ;;  %v694_v30 = vmax.f32 %v456_v25, 0.0  ;;  %v3765_v25 = vpop.f32.mrf.mxu1 }
 0x186   :  { %v461_v31 = vpop.f32.mrf.mxu0 }
 0x187   :  { %v695_v34 = vmax.f32 %v458_v28, 0.0  ;;  %v794_v39 = vpack.c.bf16 %v694_v30, %v692_v35  ;;  %v462_v44 = vadd.f32 %v461_v31, %v3667_v14  ;;  %v3767_v35 = vpop.f32.mrf.mxu1 }
 0x188   :  { %v463_v36 = vpop.f32.mrf.mxu0 }
 0x189   :  { %v795_v38 = vpack.c.bf16 %v695_v34, %v693_v33  ;;  %v464_v42 = vadd.f32 %v463_v36, %v3665_v13  ;;  %v696_v54 = vmax.f32 %v462_v44, 0.0 }
 0x18a   :  { %v465_v40 = vpop.f32.mrf.mxu0 }
 0x18b   :  { %v466_v43 = vadd.f32 %v465_v40, %v3667_v14  ;;  %1103 = vmatprep.mubr.bf16.mxu1 %v795_v38  ;;  %v697_v51 = vmax.f32 %v464_v42, 0.0 }
 0x18c   :  { %v467_v46 = vpop.f32.mrf.mxu0  ;;  %1104 = vmatmul.mubr.bf16.gmra.mxu1 %v794_v39 }
 0x18d   :  { %v468_v47 = vadd.f32 %v467_v46, %v3665_v13  ;;  %v698_v48 = vmax.f32 %v466_v43, 0.0  ;;  %v3773_v46 = vpop.f32.mrf.mxu1 }
 0x18e   :  { %v471_v49 = vpop.f32.mrf.mxu0 }
 0x18f   :  { %v699_v52 = vmax.f32 %v468_v47, 0.0  ;;  %v796_v57 = vpack.c.bf16 %v698_v48, %v696_v54  ;;  %v472_v63 = vadd.f32 %v471_v49, %v3667_v14 }
 0x190   :  { %v473_v55 = vpop.f32.mrf.mxu0 }
 0x191   :  { %v797_v56 = vpack.c.bf16 %v699_v52, %v697_v51  ;;  %v474_v60 = vadd.f32 %v473_v55, %v3665_v13  ;;  %v700_v9 = vmax.f32 %v472_v63, 0.0 }
 0x192   :  { %v475_v58 = vpop.f32.mrf.mxu0 }
 0x193   :  { %v476_v62 = vadd.f32 %v475_v58, %v3667_v14  ;;  %1111 = vmatprep.mubr.bf16.mxu1 %v797_v56  ;;  %v701_v7 = vmax.f32 %v474_v60, 0.0  ;;  %v3775_v56 = vpop.f32.mrf.mxu1 }
 0x194   :  { %v477_v1 = vpop.f32.mrf.mxu0  ;;  %1112 = vmatmul.mubr.bf16.gmra.mxu1 %v796_v57 }
 0x195   :  { %v478_v2 = vadd.f32 %v477_v1, %v3665_v13  ;;  %v702_v3 = vmax.f32 %v476_v62, 0.0 }
 0x196   :  { %v481_v4 = vpop.f32.mrf.mxu0 }
 0x197   :  { %v703_v8 = vmax.f32 %v478_v2, 0.0  ;;  %v798_v12 = vpack.c.bf16 %v702_v3, %v700_v9  ;;  %v482_v19 = vadd.f32 %v481_v4, %v3667_v14  ;;  %v3781_v3 = vpop.f32.mrf.mxu1 }
 0x198   :  { %v483_v10 = vpop.f32.mrf.mxu0 }
 0x199   :  { %v799_v11 = vpack.c.bf16 %v703_v8, %v701_v7  ;;  %v484_v17 = vadd.f32 %v483_v10, %v3665_v13  ;;  %v704_v28 = vmax.f32 %v482_v19, 0.0 }
 0x19a   :  { %v485_v0 = vpop.f32.mrf.mxu0 }
 0x19b   :  { %v486_v18 = vadd.f32 %v485_v0, %v3667_v14  ;;  %1119 = vmatprep.mubr.bf16.mxu1 %v799_v11  ;;  %v705_v26 = vmax.f32 %v484_v17, 0.0  ;;  %v3783_v0 = vpop.f32.mrf.mxu1 }
 0x19c   :  { %v487_v20 = vpop.f32.mrf.mxu0  ;;  %1120 = vmatmul.mubr.bf16.gmra.mxu1 %v798_v12 }
 0x19d   :  { %v488_v21 = vadd.f32 %v487_v20, %v3665_v13  ;;  %v706_v22 = vmax.f32 %v486_v18, 0.0 }
 0x19e   :  { %v491_v24 = vpop.f32.mrf.mxu0 }
 0x19f   :  { %v707_v27 = vmax.f32 %v488_v21, 0.0  ;;  %v800_v33 = vpack.c.bf16 %v706_v22, %v704_v28  ;;  %v492_v39 = vadd.f32 %v491_v24, %v3667_v14 }
 0x1a0   :  { %v493_v30 = vpop.f32.mrf.mxu0 }
 0x1a1   :  { %v801_v31 = vpack.c.bf16 %v707_v27, %v705_v26  ;;  %v494_v36 = vadd.f32 %v493_v30, %v3665_v13  ;;  %v708_v49 = vmax.f32 %v492_v39, 0.0  ;;  %v3789_v26 = vpop.f32.mrf.mxu1 }
 0x1a2   :  { %v495_v34 = vpop.f32.mrf.mxu0 }
 0x1a3   :  { %v496_v38 = vadd.f32 %v495_v34, %v3667_v14  ;;  %1127 = vmatprep.mubr.bf16.mxu1 %v801_v31  ;;  %v709_v47 = vmax.f32 %v494_v36, 0.0 }
 0x1a4   :  { %v497_v40 = vpop.f32.mrf.mxu0  ;;  %1128 = vmatmul.mubr.bf16.gmra.mxu1 %v800_v33 }
 0x1a5   :  { %v498_v42 = vadd.f32 %v497_v40, %v3665_v13  ;;  %v710_v43 = vmax.f32 %v496_v38, 0.0  ;;  %v3791_v38 = vpop.f32.mrf.mxu1 }
 0x1a6   :  { %v501_v44 = vpop.f32.mrf.mxu0 }
 0x1a7   :  { %v711_v48 = vmax.f32 %v498_v42, 0.0  ;;  %v802_v54 = vpack.c.bf16 %v710_v43, %v708_v49  ;;  %v502_v60 = vadd.f32 %v501_v44, %v3667_v14  ;;  %v3797_v49 = vpop.f32.mrf.mxu1 }
 0x1a8   :  { %v503_v51 = vpop.f32.mrf.mxu0 }
 0x1a9   :  { %v803_v52 = vpack.c.bf16 %v711_v48, %v709_v47  ;;  %v504_v57 = vadd.f32 %v503_v51, %v3665_v13  ;;  %v712_v8 = vmax.f32 %v502_v60, 0.0 }
 0x1aa   :  { %v505_v55 = vpop.f32.mrf.mxu0 }
 0x1ab   :  { %v506_v58 = vadd.f32 %v505_v55, %v3667_v14  ;;  %1135 = vmatprep.mubr.bf16.mxu1 %v803_v52  ;;  %v713_v4 = vmax.f32 %v504_v57, 0.0 }
 0x1ac   :  { %v507_v62 = vpop.f32.mrf.mxu0  ;;  %1136 = vmatmul.mubr.bf16.gmra.mxu1 %v802_v54 }
 0x1ad   :  { %v508_v63 = vadd.f32 %v507_v62, %v3665_v13  ;;  %v714_v1 = vmax.f32 %v506_v58, 0.0  ;;  %v3799_v62 = vpop.f32.mrf.mxu1 }
 0x1ae   :  { %v511_v2 = vpop.f32.mrf.mxu0 }
 0x1af   :  { %v715_v7 = vmax.f32 %v508_v63, 0.0  ;;  %v804_v11 = vpack.c.bf16 %v714_v1, %v712_v8  ;;  %v512_v19 = vadd.f32 %v511_v2, %v3667_v14 }
 0x1b0   :  { %v513_v9 = vpop.f32.mrf.mxu0 }
 0x1b1   :  { %v805_v10 = vpack.c.bf16 %v715_v7, %v713_v4  ;;  %v514_v17 = vadd.f32 %v513_v9, %v3665_v13  ;;  %v716_v30 = vmax.f32 %v512_v19, 0.0 }
 0x1b2   :  { %v515_v12 = vpop.f32.mrf.mxu0 }
 0x1b3   :  { %v516_v18 = vadd.f32 %v515_v12, %v3667_v14  ;;  %1143 = vmatprep.mubr.bf16.mxu1 %v805_v10  ;;  %v717_v27 = vmax.f32 %v514_v17, 0.0  ;;  %v3805_v10 = vpop.f32.mrf.mxu1 }
 0x1b4   :  { %v517_v20 = vpop.f32.mrf.mxu0  ;;  %1144 = vmatmul.mubr.bf16.gmra.mxu1 %v804_v11 }
 0x1b5   :  { %v518_v21 = vadd.f32 %v517_v20, %v3665_v13  ;;  %v718_v22 = vmax.f32 %v516_v18, 0.0 }
 0x1b6   :  { %v521_v24 = vpop.f32.mrf.mxu0 }
 0x1b7   :  { %v719_v28 = vmax.f32 %v518_v21, 0.0  ;;  %v806_v34 = vpack.c.bf16 %v718_v22, %v716_v30  ;;  %v522_v42 = vadd.f32 %v521_v24, %v3667_v14  ;;  %v3807_v22 = vpop.f32.mrf.mxu1 }
 0x1b8   :  { %v523_v31 = vpop.f32.mrf.mxu0 }
 0x1b9   :  { %v807_v33 = vpack.c.bf16 %v719_v28, %v717_v27  ;;  %v524_v39 = vadd.f32 %v523_v31, %v3665_v13  ;;  %v720_v54 = vmax.f32 %v522_v42, 0.0 }
 0x1ba   :  { %v525_v36 = vpop.f32.mrf.mxu0 }
 0x1bb   :  { %v526_v40 = vadd.f32 %v525_v36, %v3667_v14  ;;  %1151 = vmatprep.mubr.bf16.mxu1 %v807_v33  ;;  %v721_v51 = vmax.f32 %v524_v39, 0.0  ;;  %v3813_v36 = vpop.f32.mrf.mxu1 }
 0x1bc   :  { %v527_v43 = vpop.f32.mrf.mxu0  ;;  %1152 = vmatmul.mubr.bf16.gmra.mxu1 %v806_v34 }
 0x1bd   :  { %v528_v44 = vadd.f32 %v527_v43, %v3665_v13  ;;  %v722_v47 = vmax.f32 %v526_v40, 0.0 }
 0x1be   :  { %v531_v48 = vpop.f32.mrf.mxu0 }
 0x1bf   :  { %v723_v52 = vmax.f32 %v528_v44, 0.0  ;;  %v808_v58 = vpack.c.bf16 %v722_v47, %v720_v54  ;;  %v532_v2 = vadd.f32 %v531_v48, %v3667_v14  ;;  %v568_v54 = vadd.f32 %v3719_v53, %v3665_v13 }
 0x1c0   :  { %v533_v55 = vpop.f32.mrf.mxu0 }
 0x1c1   :  { %v809_v57 = vpack.c.bf16 %v723_v52, %v721_v51  ;;  %v534_v63 = vadd.f32 %v533_v55, %v3665_v13  ;;  %v724_v17 = vmax.f32 %v532_v2, 0.0  ;;  %v3815_v51 = vpop.f32.mrf.mxu1  ;;  %v564_v52 = vadd.f32 %v3711_v37, %v3665_v13 }
 0x1c2   :  { %v535_v60 = vpop.f32.mrf.mxu0 }
 0x1c3   :  { %v536_v1 = vadd.f32 %v535_v60, %v3667_v14  ;;  %1159 = vmatprep.mubr.bf16.mxu1 %v809_v57  ;;  %v725_v11 = vmax.f32 %v534_v63, 0.0  ;;  %v3825_v2 = vpop.f32.mrf.mxu1 }
 0x1c4   :  { %v537_v4 = vpop.f32.mrf.mxu0  ;;  %1160 = vmatmul.mubr.bf16.gmra.mxu1 %v808_v58 }
 0x1c5   :  { %v538_v7 = vadd.f32 %v537_v4, %v3665_v13  ;;  %v726_v8 = vmax.f32 %v536_v1, 0.0  ;;  %v737_v4 = vmax.f32 %v564_v52, 0.0 }
 0x1c6   :  { %v541_v9 = vpop.f32.mrf.mxu0 }
 0x1c7   :  { %v727_v12 = vmax.f32 %v538_v7, 0.0  ;;  %v810_v20 = vpack.c.bf16 %v726_v8, %v724_v17  ;;  %v542_v28 = vadd.f32 %v541_v9, %v3667_v14  ;;  %v739_v7 = vmax.f32 %v568_v54, 0.0 }
 0x1c8   :  { %v543_v18 = vpop.f32.mrf.mxu0  ;;  %v582_v54 = vadd.f32 %v3741_v32, %v3667_v14 }
 0x1c9   :  { %v811_v19 = vpack.c.bf16 %v727_v12, %v725_v11  ;;  %v544_v24 = vadd.f32 %v543_v18, %v3665_v13  ;;  %v728_v42 = vmax.f32 %v542_v28, 0.0  ;;  %v562_v11 = vadd.f32 %v3709_v29, %v3667_v14  ;;  %v3831_v18 = vpop.f32.mrf.mxu1 }
 0x1ca   :  { %v545_v21 = vpop.f32.mrf.mxu0  ;;  %v566_v12 = vadd.f32 %v3717_v45, %v3667_v14  ;;  %v572_v45 = vadd.f32 %v3725_v61, %v3667_v14 }
 0x1cb   :  { %v546_v27 = vadd.f32 %v545_v21, %v3667_v14  ;;  %1167 = vmatprep.mubr.bf16.mxu1 %v811_v19  ;;  %v729_v39 = vmax.f32 %v544_v24, 0.0  ;;  %v574_v19 = vadd.f32 %v3727_v6, %v3665_v13  ;;  %v817_v21 = vpack.c.bf16 %v739_v7, %v737_v4  ;;  %v3837_v28 = vpop.f32.mrf.mxu1 }
 0x1cc   :  { %v547_v30 = vpop.f32.mrf.mxu0  ;;  %1168 = vmatmul.mubr.bf16.gmra.mxu1 %v810_v20  ;;  %v578_v20 = vadd.f32 %v3735_v23, %v3665_v13  ;;  %v736_v24 = vmax.f32 %v562_v11, 0.0  ;;  %v584_v23 = vadd.f32 %v3743_v41, %v3665_v13  ;;  %v740_v61 = vmax.f32 %v572_v45, 0.0 }
 0x1cd   :  { %v548_v31 = vadd.f32 %v547_v30, %v3665_v13  ;;  %v730_v33 = vmax.f32 %v546_v27, 0.0  ;;  %v738_v27 = vmax.f32 %v566_v12, 0.0  ;;  %v741_v29 = vmax.f32 %v574_v19, 0.0 }
 0x1ce   :  { %v551_v34 = vpop.f32.mrf.mxu0  ;;  %v743_v30 = vmax.f32 %v578_v20, 0.0  ;;  %v596_v12 = vadd.f32 %v3765_v25, %v3667_v14 }
 0x1cf   :  { %v731_v40 = vmax.f32 %v548_v31, 0.0  ;;  %v812_v47 = vpack.c.bf16 %v730_v33, %v728_v42  ;;  %v552_v58 = vadd.f32 %v551_v34, %v3667_v14  ;;  %v576_v31 = vadd.f32 %v3733_v15, %v3667_v14  ;;  %v3843_v33 = vpop.f32.mrf.mxu1 }
 0x1d0   :  { %v553_v43 = vpop.f32.mrf.mxu0  ;;  %v816_v6 = vpack.c.bf16 %v738_v27, %v736_v24  ;;  %v588_v34 = vadd.f32 %v3751_v59, %v3665_v13  ;;  %v604_v24 = vadd.f32 %v3775_v56, %v3665_v13  ;;  %v608_v27 = vadd.f32 %v3783_v0, %v3665_v13 }
 0x1d1   :  { %v813_v44 = vpack.c.bf16 %v731_v40, %v729_v39  ;;  %v554_v55 = vadd.f32 %v553_v43, %v3665_v13  ;;  %v732_v9 = vmax.f32 %v552_v58, 0.0  ;;  %v819_v39 = vpack.c.bf16 %v743_v30, %v741_v29  ;;  %v3852_v40 = vld [vmem:[%s4553_s4] ss:$0 sm:$0xff] }
 0x1d2   :  { %v555_v48 = vpop.f32.mrf.mxu0  ;;  %v742_v43 = vmax.f32 %v576_v31, 0.0  ;;  %v598_v58 = vadd.f32 %v3767_v35, %v3665_v13  ;;  %v592_v35 = vadd.f32 %v3757_v5, %v3667_v14  ;;  %v750_v5 = vmax.f32 %v596_v12, 0.0 }
 0x1d3   :  { %v556_v57 = vadd.f32 %v555_v48, %v3667_v14  ;;  %1175 = vmatprep.mubr.bf16.mxu1 %v813_v44  ;;  %v733_v37 = vmax.f32 %v554_v55, 0.0  ;;  %v745_v44 = vmax.f32 %v584_v23, 0.0  ;;  %v586_v55 = vadd.f32 %v3749_v50, %v3667_v14 }
 0x1d4   :  { %v557_v60 = vpop.f32.mrf.mxu0  ;;  %1176 = vmatmul.mubr.bf16.gmra.mxu1 %v812_v47  ;;  %v747_v47 = vmax.f32 %v588_v34, 0.0  ;;  %v818_v52 = vpack.c.bf16 %v742_v43, %v740_v61  ;;  %v748_v31 = vmax.f32 %v592_v35, 0.0  ;;  %v753_v23 = vmax.f32 %v604_v24, 0.0 }
 0x1d5   :  { %v558_v63 = vadd.f32 %v557_v60, %v3665_v13  ;;  %v734_v1 = vmax.f32 %v556_v57, 0.0  ;;  %v594_v57 = vadd.f32 %v3759_v16, %v3665_v13  ;;  %v755_v34 = vmax.f32 %v608_v27, 0.0 }
 0x1d6   :  { %v821_v4 = vpack.c.bf16 %v747_v47, %v745_v44  ;;  %v822_v61 = vpack.c.bf16 %v750_v5, %v748_v31  ;;  %v602_v0 = vadd.f32 %v3773_v46, %v3667_v14  ;;  %v606_v43 = vadd.f32 %v3781_v3, %v3667_v14 }
 0x1d7   :  { %v735_v8 = vmax.f32 %v558_v63, 0.0  ;;  %v814_v17 = vpack.c.bf16 %v734_v1, %v732_v9  ;;  %v746_v9 = vmax.f32 %v586_v55, 0.0  ;;  %v749_v32 = vmax.f32 %v594_v57, 0.0 }
 0x1d8   :  { %v618_v44 = vadd.f32 %v3799_v62, %v3665_v13  ;;  %v752_v55 = vmax.f32 %v602_v0, 0.0  ;;  %v754_v57 = vmax.f32 %v606_v43, 0.0  ;;  %v634_v24 = vadd.f32 %v3831_v18, %v3665_v13 }
 0x1d9   :  { %v815_v53 = vpack.c.bf16 %v735_v8, %v733_v37  ;;  %v744_v8 = vmax.f32 %v582_v54, 0.0 }
 0x1da   :  { %v824_v62 = vpack.c.bf16 %v754_v57, %v752_v55 }
 0x1db   :  { %1183 = vmatprep.mubr.bf16.mxu1 %v815_v53  ;;  %v751_v53 = vmax.f32 %v598_v58, 0.0  ;;  %v820_v19 = vpack.c.bf16 %v746_v9, %v744_v8  ;;  %v759_v58 = vmax.f32 %v618_v44, 0.0  ;;  %v624_v8 = vadd.f32 %v3807_v22, %v3665_v13 }
 0x1dc   :  { %1184 = vmatmul.mubr.bf16.gmra.mxu1 %v814_v17  ;;  %v628_v9 = vadd.f32 %v3815_v51, %v3665_v13  ;;  %v622_v51 = vadd.f32 %v3805_v10, %v3667_v14 }
 0x1dd   :  { %1191 = vmatprep.mubr.bf16.mxu1 %v817_v21  ;;  %v823_v21 = vpack.c.bf16 %v751_v53, %v749_v32  ;;  %v761_v12 = vmax.f32 %v624_v8, 0.0 }
 0x1e4   :  { %v1001_v42 = vpop.f32.mrf.mxu1  ;;  %1192 = vmatmul.mubr.bf16.gmra.mxu1 %v816_v6 }
 0x1e5   :  { %1199 = vmatprep.mubr.bf16.mxu1 %v819_v39  ;;  %v1002_v48 = vadd.f32 %v3852_v40, %v1001_v42 }
 0x1e6   :  { %v1003_v15 = vpop.f32.mrf.mxu1 }
 0x1e7   :  { %v1256_v63 = vmax.f32 %v1002_v48, 0.0  ;;  %v614_v15 = vadd.f32 %v3791_v38, %v3665_v13 }
 0x1e8   :  { %v1004_v41 = vpop.f32.mrf.mxu1 }
 0x1e9   :  { %v1005_v59 = vadd.f32 %v3852_v40, %v1004_v41  ;;  %v757_v46 = vmax.f32 %v614_v15, 0.0 }
 0x1ea   :  { %v1006_v60 = vpop.f32.mrf.mxu1 }
 0x1eb   :  { %v1257_v1 = vmax.f32 %v1005_v59, 0.0 }
 0x1ec   :  { %v1009_v7 = vpop.f32.mrf.mxu1  ;;  %1200 = vmatmul.mubr.bf16.gmra.mxu1 %v818_v52  ;;  %v825_v52 = vpack.c.bf16 %v755_v34, %v753_v23  ;;  %v765_v34 = vmax.f32 %v634_v24, 0.0 }
 0x1ed   :  { %v1320_v37 = vpack.c.bf16 %v1257_v1, %v1256_v63  ;;  %1207 = vmatprep.mubr.bf16.mxu1 %v821_v4  ;;  %v1010_v50 = vadd.f32 %v3852_v40, %v1009_v7  ;;  %v612_v1 = vadd.f32 %v3789_v26, %v3667_v14  ;;  %v616_v4 = vadd.f32 %v3797_v49, %v3667_v14 }
 0x1ee   :  { %v1011_v11 = vpop.f32.mrf.mxu1 }
 0x1ef   :  { %3044 = vmatprep.mubr.bf16.mxu0 %v1320_v37  ;;  %v1258_v29 = vmax.f32 %v1010_v50, 0.0  ;;  %v827_v37 = vpack.c.bf16 %v759_v58, %v757_v46  ;;  %v758_v35 = vmax.f32 %v616_v4, 0.0 }
 0x1f0   :  { %v1012_v16 = vpop.f32.mrf.mxu1 }
 0x1f1   :  { %v1013_v17 = vadd.f32 %v3852_v40, %v1012_v16  ;;  %v756_v16 = vmax.f32 %v612_v1, 0.0 }
 0x1f2   :  { %v1014_v20 = vpop.f32.mrf.mxu1 }
 0x1f3   :  { %v1259_v30 = vmax.f32 %v1013_v17, 0.0  ;;  %v763_v17 = vmax.f32 %v628_v9, 0.0  ;;  %v826_v20 = vpack.c.bf16 %v758_v35, %v756_v16 }
 0x1f4   :  { %v1017_v45 = vpop.f32.mrf.mxu1  ;;  %1208 = vmatmul.mubr.bf16.gmra.mxu1 %v820_v19 }
 0x1f5   :  { %v1321_v6 = vpack.c.bf16 %v1259_v30, %v1258_v29  ;;  %1215 = vmatprep.mubr.bf16.mxu1 %v823_v21  ;;  %v1018_v39 = vadd.f32 %v3852_v40, %v1017_v45  ;;  %v626_v21 = vadd.f32 %v3813_v36, %v3667_v14  ;;  %v638_v29 = vadd.f32 %v3843_v33, %v3665_v13 }
 0x1f6   :  { %v1019_v25 = vpop.f32.mrf.mxu1  ;;  %v829_v31 = vpack.c.bf16 %v763_v17, %v761_v12  ;;  %v632_v13 = vadd.f32 %v3825_v2, %v3667_v14  ;;  %v636_v33 = vadd.f32 %v3837_v28, %v3667_v14 }
 0x1f7   :  { %3045 = vmatmul.mubr.bf16.vlgmr.msra.gmra.mxu0 %v1321_v6  ;;  %v1260_v48 = vmax.f32 %v1018_v39, 0.0  ;;  %v760_v25 = vmax.f32 %v622_v51, 0.0  ;;  %v762_v23 = vmax.f32 %v626_v21, 0.0  ;;  %v767_v39 = vmax.f32 %v638_v29, 0.0 }
 0x1f8   :  { %v1020_v42 = vpop.f32.mrf.mxu1 }
 0x1f9   :  { %v1021_v56 = vadd.f32 %v3852_v40, %v1020_v42  ;;  %v831_v15 = vpack.c.bf16 %v767_v39, %v765_v34 }
 0x1fa   :  { %v1022_v47 = vpop.f32.mrf.mxu1 }
 0x1fb   :  { %v1261_v41 = vmax.f32 %v1021_v56, 0.0 }
 0x1fc   :  { %v1025_v59 = vpop.f32.mrf.mxu1  ;;  %1216 = vmatmul.mubr.bf16.gmra.mxu1 %v822_v61  ;;  %v828_v61 = vpack.c.bf16 %v762_v23, %v760_v25 }
 0x1fd   :  { %v1322_v54 = vpack.c.bf16 %v1261_v41, %v1260_v48  ;;  %1223 = vmatprep.mubr.bf16.mxu1 %v825_v52  ;;  %v1026_v3 = vadd.f32 %v3852_v40, %v1025_v59  ;;  %v764_v48 = vmax.f32 %v632_v13, 0.0  ;;  %v766_v41 = vmax.f32 %v636_v33, 0.0 }
 0x1fe   :  { %v1027_v60 = vpop.f32.mrf.mxu1 }
 0x1ff   :  { %3048 = vmatprep.mubr.bf16.mxu0 %v1322_v54  ;;  %v1262_v32 = vmax.f32 %v1026_v3, 0.0  ;;  %v830_v55 = vpack.c.bf16 %v766_v41, %v764_v48 }
 0x200   :  { %v1028_v38 = vpop.f32.mrf.mxu1 }
 0x201   :  { %v1029_v63 = vadd.f32 %v3852_v40, %v1028_v38 }
 0x202   :  { %v1030_v7 = vpop.f32.mrf.mxu1 }
 0x203   :  { %v1263_v53 = vmax.f32 %v1029_v63, 0.0 }
 0x204   :  { %v1033_v11 = vpop.f32.mrf.mxu1  ;;  %1224 = vmatmul.mubr.bf16.gmra.mxu1 %v824_v62 }
 0x205   :  { %v1323_v50 = vpack.c.bf16 %v1263_v53, %v1262_v32  ;;  %1231 = vmatprep.mubr.bf16.mxu1 %v827_v37  ;;  %v1034_v49 = vadd.f32 %v3852_v40, %v1033_v11 }
 0x206   :  { %v1035_v26 = vpop.f32.mrf.mxu1 }
 0x207   :  { %3049 = vmatmul.mubr.bf16.gmra.mxu0 %v1323_v50  ;;  %v1264_v30 = vmax.f32 %v1034_v49, 0.0 }
 0x208   :  { %v1036_v19 = vpop.f32.mrf.mxu1 }
 0x209   :  { %v1037_v22 = vadd.f32 %v3852_v40, %v1036_v19 }
 0x20a   :  { %v1038_v27 = vpop.f32.mrf.mxu1 }
 0x20b   :  { %v1265_v45 = vmax.f32 %v1037_v22, 0.0 }
 0x20c   :  { %v1041_v5 = vpop.f32.mrf.mxu1  ;;  %1232 = vmatmul.mubr.bf16.gmra.mxu1 %v826_v20 }
 0x20d   :  { %v1324_v6 = vpack.c.bf16 %v1265_v45, %v1264_v30  ;;  %1239 = vmatprep.mubr.bf16.mxu1 %v829_v31  ;;  %v1042_v36 = vadd.f32 %v3852_v40, %v1041_v5 }
 0x20e   :  { %v1043_v10 = vpop.f32.mrf.mxu1 }
 0x20f   :  { %3052 = vmatprep.mubr.bf16.mxu0 %v1324_v6  ;;  %v1266_v0 = vmax.f32 %v1042_v36, 0.0 }
 0x210   :  { %v1044_v18 = vpop.f32.mrf.mxu1 }
 0x211   :  { %v1045_v42 = vadd.f32 %v3852_v40, %v1044_v18 }
 0x212   :  { %v1046_v56 = vpop.f32.mrf.mxu1 }
 0x213   :  { %v1267_v43 = vmax.f32 %v1045_v42, 0.0 }
 0x214   :  { %v1049_v44 = vpop.f32.mrf.mxu1  ;;  %1240 = vmatmul.mubr.bf16.gmra.mxu1 %v828_v61 }
 0x215   :  { %v1325_v47 = vpack.c.bf16 %v1267_v43, %v1266_v0  ;;  %1247 = vmatprep.mubr.bf16.mxu1 %v831_v15  ;;  %v1050_v59 = vadd.f32 %v3852_v40, %v1049_v44 }
 0x216   :  { %v1051_v52 = vpop.f32.mrf.mxu1 }
 0x217   :  { %3053 = vmatmul.mubr.bf16.gmra.mxu0 %v1325_v47  ;;  %v1268_v14 = vmax.f32 %v1050_v59, 0.0 }
 0x218   :  { %v1052_v54 = vpop.f32.mrf.mxu1 }
 0x219   :  { %v1053_v2 = vadd.f32 %v3852_v40, %v1052_v54 }
 0x21a   :  { %v1054_v57 = vpop.f32.mrf.mxu1 }
 0x21b   :  { %v1269_v28 = vmax.f32 %v1053_v2, 0.0 }
 0x21c   :  { %v1057_v46 = vpop.f32.mrf.mxu1  ;;  %1248 = vmatmul.mubr.bf16.gmra.mxu1 %v830_v55 }
 0x21d   :  { %v1326_v58 = vpack.c.bf16 %v1269_v28, %v1268_v14  ;;  %v1058_v3 = vadd.f32 %v3852_v40, %v1057_v46 }
 0x21e   :  { %v1059_v60 = vpop.f32.mrf.mxu1 }
 0x21f   :  { %3056 = vmatprep.mubr.bf16.mxu0 %v1326_v58  ;;  %v1270_v1 = vmax.f32 %v1058_v3, 0.0 }
 0x220   :  { %v1060_v38 = vpop.f32.mrf.mxu1 }
 0x221   :  { %v1061_v63 = vadd.f32 %v3852_v40, %v1060_v38 }
 0x222   :  { %v1062_v62 = vpop.f32.mrf.mxu1 }
 0x223   :  { %v1271_v4 = vmax.f32 %v1061_v63, 0.0 }
 0x224   :  { %v1065_v7 = vpop.f32.mrf.mxu1 }
 0x225   :  { %v1327_v37 = vpack.c.bf16 %v1271_v4, %v1270_v1  ;;  %v1066_v9 = vadd.f32 %v3852_v40, %v1065_v7 }
 0x226   :  { %v1067_v8 = vpop.f32.mrf.mxu1 }
 0x227   :  { %3057 = vmatmul.mubr.bf16.gmra.mxu0 %v1327_v37  ;;  %v1272_v50 = vmax.f32 %v1066_v9, 0.0 }
 0x228   :  { %v1068_v32 = vpop.f32.mrf.mxu1 }
 0x229   :  { %v1069_v53 = vadd.f32 %v3852_v40, %v1068_v32 }
 0x22a   :  { %v1070_v11 = vpop.f32.mrf.mxu1 }
 0x22b   :  { %v1273_v16 = vmax.f32 %v1069_v53, 0.0 }
 0x22c   :  { %v1073_v35 = vpop.f32.mrf.mxu1 }
 0x22d   :  { %v1328_v26 = vpack.c.bf16 %v1273_v16, %v1272_v50  ;;  %v1074_v17 = vadd.f32 %v3852_v40, %v1073_v35 }
 0x22e   :  { %v1075_v12 = vpop.f32.mrf.mxu1 }
 0x22f   :  { %3060 = vmatprep.mubr.bf16.mxu0 %v1328_v26  ;;  %v1274_v20 = vmax.f32 %v1074_v17, 0.0 }
 0x230   :  { %v1076_v49 = vpop.f32.mrf.mxu1 }
 0x231   :  { %v1077_v19 = vadd.f32 %v3852_v40, %v1076_v49 }
 0x232   :  { %v1078_v22 = vpop.f32.mrf.mxu1 }
 0x233   :  { %v1275_v51 = vmax.f32 %v1077_v19, 0.0 }
 0x234   :  { %v1081_v21 = vpop.f32.mrf.mxu1 }
 0x235   :  { %v1329_v24 = vpack.c.bf16 %v1275_v51, %v1274_v20  ;;  %v1082_v29 = vadd.f32 %v3852_v40, %v1081_v21 }
 0x236   :  { %v1083_v27 = vpop.f32.mrf.mxu1 }
 0x237   :  { %3061 = vmatmul.mubr.bf16.gmra.mxu0 %v1329_v24  ;;  %v1276_v5 = vmax.f32 %v1082_v29, 0.0 }
 0x238   :  { %v1084_v30 = vpop.f32.mrf.mxu1 }
 0x239   :  { %v1085_v45 = vadd.f32 %v3852_v40, %v1084_v30 }
 0x23a   :  { %v1086_v31 = vpop.f32.mrf.mxu1 }
 0x23b   :  { %v1277_v6 = vmax.f32 %v1085_v45, 0.0 }
 0x23c   :  { %v1089_v25 = vpop.f32.mrf.mxu1 }
 0x23d   :  { %v1330_v23 = vpack.c.bf16 %v1277_v6, %v1276_v5  ;;  %v1090_v34 = vadd.f32 %v3852_v40, %v1089_v25 }
 0x23e   :  { %v1091_v10 = vpop.f32.mrf.mxu1 }
 0x23f   :  { %3064 = vmatprep.mubr.bf16.mxu0 %v1330_v23  ;;  %v1278_v42 = vmax.f32 %v1090_v34, 0.0 }
 0x240   :  { %v1092_v39 = vpop.f32.mrf.mxu1 }
 0x241   :  { %v1093_v36 = vadd.f32 %v3852_v40, %v1092_v39 }
 0x242   :  { %v1094_v18 = vpop.f32.mrf.mxu1 }
 0x243   :  { %v1279_v61 = vmax.f32 %v1093_v36, 0.0 }
 0x244   :  { %v1097_v13 = vpop.f32.mrf.mxu1 }
 0x245   :  { %v1331_v33 = vpack.c.bf16 %v1279_v61, %v1278_v42  ;;  %v1098_v0 = vadd.f32 %v3852_v40, %v1097_v13 }
 0x246   :  { %v1099_v56 = vpop.f32.mrf.mxu1 }
 0x247   :  { %3065 = vmatmul.mubr.bf16.gmra.mxu0 %v1331_v33  ;;  %v1280_v47 = vmax.f32 %v1098_v0, 0.0 }
 0x248   :  { %v1100_v43 = vpop.f32.mrf.mxu1 }
 0x249   :  { %v1101_v15 = vadd.f32 %v3852_v40, %v1100_v43 }
 0x24a   :  { %v1102_v44 = vpop.f32.mrf.mxu1 }
 0x24b   :  { %v1281_v48 = vmax.f32 %v1101_v15, 0.0 }
 0x24c   :  { %v1105_v41 = vpop.f32.mrf.mxu1 }
 0x24d   :  { %v1332_v52 = vpack.c.bf16 %v1281_v48, %v1280_v47  ;;  %v1106_v54 = vadd.f32 %v3852_v40, %v1105_v41 }
 0x24e   :  { %v1107_v59 = vpop.f32.mrf.mxu1 }
 0x24f   :  { %3068 = vmatprep.mubr.bf16.mxu0 %v1332_v52  ;;  %v1282_v14 = vmax.f32 %v1106_v54, 0.0 }
 0x250   :  { %v1108_v2 = vpop.f32.mrf.mxu1 }
 0x251   :  { %v1109_v55 = vadd.f32 %v3852_v40, %v1108_v2 }
 0x252   :  { %v1110_v57 = vpop.f32.mrf.mxu1 }
 0x253   :  { %v1283_v28 = vmax.f32 %v1109_v55, 0.0 }
 0x254   :  { %v1113_v46 = vpop.f32.mrf.mxu1 }
 0x255   :  { %v1333_v58 = vpack.c.bf16 %v1283_v28, %v1282_v14  ;;  %v1114_v3 = vadd.f32 %v3852_v40, %v1113_v46 }
 0x256   :  { %v1115_v60 = vpop.f32.mrf.mxu1 }
 0x257   :  { %3069 = vmatmul.mubr.bf16.gmra.mxu0 %v1333_v58  ;;  %v1284_v1 = vmax.f32 %v1114_v3, 0.0 }
 0x258   :  { %v1116_v38 = vpop.f32.mrf.mxu1 }
 0x259   :  { %v1117_v63 = vadd.f32 %v3852_v40, %v1116_v38 }
 0x25a   :  { %v1118_v62 = vpop.f32.mrf.mxu1 }
 0x25b   :  { %v1285_v4 = vmax.f32 %v1117_v63, 0.0 }
 0x25c   :  { %v1121_v7 = vpop.f32.mrf.mxu1 }
 0x25d   :  { %v1334_v37 = vpack.c.bf16 %v1285_v4, %v1284_v1  ;;  %v1122_v9 = vadd.f32 %v3852_v40, %v1121_v7 }
 0x25e   :  { %v1123_v8 = vpop.f32.mrf.mxu1 }
 0x25f   :  { %3072 = vmatprep.mubr.bf16.mxu0 %v1334_v37  ;;  %v1286_v50 = vmax.f32 %v1122_v9, 0.0 }
 0x260   :  { %v1124_v32 = vpop.f32.mrf.mxu1 }
 0x261   :  { %v1125_v53 = vadd.f32 %v3852_v40, %v1124_v32 }
 0x262   :  { %v1126_v11 = vpop.f32.mrf.mxu1 }
 0x263   :  { %v1287_v16 = vmax.f32 %v1125_v53, 0.0 }
 0x264   :  { %v1129_v35 = vpop.f32.mrf.mxu1 }
 0x265   :  { %v1335_v26 = vpack.c.bf16 %v1287_v16, %v1286_v50  ;;  %v1130_v17 = vadd.f32 %v3852_v40, %v1129_v35 }
 0x266   :  { %v1131_v12 = vpop.f32.mrf.mxu1 }
 0x267   :  { %3073 = vmatmul.mubr.bf16.gmra.mxu0 %v1335_v26  ;;  %v1288_v20 = vmax.f32 %v1130_v17, 0.0 }
 0x268   :  { %v1132_v49 = vpop.f32.mrf.mxu1 }
 0x269   :  { %v1133_v19 = vadd.f32 %v3852_v40, %v1132_v49 }
 0x26a   :  { %v1134_v22 = vpop.f32.mrf.mxu1 }
 0x26b   :  { %v1289_v51 = vmax.f32 %v1133_v19, 0.0 }
 0x26c   :  { %v1137_v21 = vpop.f32.mrf.mxu1 }
 0x26d   :  { %v1336_v24 = vpack.c.bf16 %v1289_v51, %v1288_v20  ;;  %v1138_v29 = vadd.f32 %v3852_v40, %v1137_v21 }
 0x26e   :  { %v1139_v27 = vpop.f32.mrf.mxu1 }
 0x26f   :  { %3076 = vmatprep.mubr.bf16.mxu0 %v1336_v24  ;;  %v1290_v5 = vmax.f32 %v1138_v29, 0.0 }
 0x270   :  { %v1140_v30 = vpop.f32.mrf.mxu1 }
 0x271   :  { %v1141_v45 = vadd.f32 %v3852_v40, %v1140_v30 }
 0x272   :  { %v1142_v31 = vpop.f32.mrf.mxu1 }
 0x273   :  { %v1291_v6 = vmax.f32 %v1141_v45, 0.0 }
 0x274   :  { %v1145_v25 = vpop.f32.mrf.mxu1 }
 0x275   :  { %v1337_v23 = vpack.c.bf16 %v1291_v6, %v1290_v5  ;;  %v1146_v34 = vadd.f32 %v3852_v40, %v1145_v25 }
 0x276   :  { %v1147_v10 = vpop.f32.mrf.mxu1 }
 0x277   :  { %3077 = vmatmul.mubr.bf16.gmra.mxu0 %v1337_v23  ;;  %v1292_v42 = vmax.f32 %v1146_v34, 0.0 }
 0x278   :  { %v1148_v39 = vpop.f32.mrf.mxu1 }
 0x279   :  { %v1149_v36 = vadd.f32 %v3852_v40, %v1148_v39 }
 0x27a   :  { %v1150_v18 = vpop.f32.mrf.mxu1 }
 0x27b   :  { %v1293_v61 = vmax.f32 %v1149_v36, 0.0 }
 0x27c   :  { %v1153_v13 = vpop.f32.mrf.mxu1 }
 0x27d   :  { %v1338_v33 = vpack.c.bf16 %v1293_v61, %v1292_v42  ;;  %v1154_v0 = vadd.f32 %v3852_v40, %v1153_v13 }
 0x27e   :  { %v1155_v56 = vpop.f32.mrf.mxu1 }
 0x27f   :  { %3080 = vmatprep.mubr.bf16.mxu0 %v1338_v33  ;;  %v1294_v47 = vmax.f32 %v1154_v0, 0.0  ;;  %v3953_v56 = vld [vmem:[%s4555_s6] ss:$0 sm:$0xff]  ;;  %s3555_s6 = smov [#allocation10]  }
 0x280   :  { %v1156_v43 = vpop.f32.mrf.mxu1  ;;  %s2613_s25 = sshll.u32 %s3555_s6, 4  ;;  %s2614_s25 = int_to_ptr.vmem [resolvable:$true] %s2613_s25 }
 0x281   :  { %v1157_v15 = vadd.f32 %v3852_v40, %v1156_v43  ;;  %s3518_s26 = scalar_lea.vmem %s2614_s25, 4096  ;;  %p3523_p7 = scmp.lt.s32.totalorder %s2614_s25, %s2614_s25 }
 0x282   :  { %v1158_v44 = vpop.f32.mrf.mxu1  ;;  %p3519_p6 = scmp.ne.s32.totalorder %s2614_s25, %s3518_s26  ;;  %p3524_p8 = scmp.lt.s32.totalorder %s3518_s26, %s3518_s26 }
 0x283   :  { %v1295_v48 = vmax.f32 %v1157_v15, 0.0 }
 0x284   :  { %v1161_v41 = vpop.f32.mrf.mxu1  ;;  %p3525_p9 = por %p3524_p8, %p3523_p7 }
 0x285   :  { %v1339_v52 = vpack.c.bf16 %v1295_v48, %v1294_v47  ;;  %v1162_v54 = vadd.f32 %v3852_v40, %v1161_v41 }
 0x286   :  { %v1163_v59 = vpop.f32.mrf.mxu1  ;;  %p3526_p10 = pnand %p3525_p9, %p3519_p6 }
 0x287   :  { %3081 = vmatmul.mubr.bf16.gmra.mxu0 %v1339_v52  ;;  %v1296_v14 = vmax.f32 %v1162_v54, 0.0 }
 0x288   :  { %v1164_v2 = vpop.f32.mrf.mxu1 }
 0x289   :  { %v1165_v55 = vadd.f32 %v3852_v40, %v1164_v2 }
 0x28a   :  { %v1166_v57 = vpop.f32.mrf.mxu1 }
 0x28b   :  { %v1297_v28 = vmax.f32 %v1165_v55, 0.0 }
 0x28c   :  { %v1169_v46 = vpop.f32.mrf.mxu1 }
 0x28d   :  { %v1340_v58 = vpack.c.bf16 %v1297_v28, %v1296_v14  ;;  %v1170_v3 = vadd.f32 %v3852_v40, %v1169_v46 }
 0x28e   :  { %v1171_v60 = vpop.f32.mrf.mxu1 }
 0x28f   :  { %3084 = vmatprep.mubr.bf16.mxu0 %v1340_v58  ;;  %v1298_v1 = vmax.f32 %v1170_v3, 0.0 }
 0x290   :  { %v1172_v38 = vpop.f32.mrf.mxu1 }
 0x291   :  { %v1173_v63 = vadd.f32 %v3852_v40, %v1172_v38 }
 0x292   :  { %v1174_v62 = vpop.f32.mrf.mxu1 }
 0x293   :  { %v1299_v4 = vmax.f32 %v1173_v63, 0.0 }
 0x294   :  { %v1177_v7 = vpop.f32.mrf.mxu1 }
 0x295   :  { %v1341_v37 = vpack.c.bf16 %v1299_v4, %v1298_v1  ;;  %v1178_v9 = vadd.f32 %v3852_v40, %v1177_v7 }
 0x296   :  { %v1179_v8 = vpop.f32.mrf.mxu1 }
 0x297   :  { %3085 = vmatmul.mubr.bf16.gmra.mxu0 %v1341_v37  ;;  %v1300_v50 = vmax.f32 %v1178_v9, 0.0 }
 0x298   :  { %v1180_v32 = vpop.f32.mrf.mxu1 }
 0x299   :  { %v1181_v53 = vadd.f32 %v3852_v40, %v1180_v32 }
 0x29a   :  { %v1182_v11 = vpop.f32.mrf.mxu1 }
 0x29b   :  { %v1301_v16 = vmax.f32 %v1181_v53, 0.0 }
 0x29c   :  { %v1185_v35 = vpop.f32.mrf.mxu1 }
 0x29d   :  { %v1342_v26 = vpack.c.bf16 %v1301_v16, %v1300_v50  ;;  %v1186_v17 = vadd.f32 %v3852_v40, %v1185_v35 }
 0x29e   :  { %v1187_v12 = vpop.f32.mrf.mxu1 }
 0x29f   :  { %3088 = vmatprep.mubr.bf16.mxu0 %v1342_v26  ;;  %v1302_v20 = vmax.f32 %v1186_v17, 0.0 }
 0x2a0   :  { %v1188_v49 = vpop.f32.mrf.mxu1 }
 0x2a1   :  { %v1189_v19 = vadd.f32 %v3852_v40, %v1188_v49 }
 0x2a2   :  { %v1190_v22 = vpop.f32.mrf.mxu1 }
 0x2a3   :  { %v1303_v51 = vmax.f32 %v1189_v19, 0.0 }
 0x2a4   :  { %v1193_v21 = vpop.f32.mrf.mxu1 }
 0x2a5   :  { %v1343_v24 = vpack.c.bf16 %v1303_v51, %v1302_v20  ;;  %v1194_v29 = vadd.f32 %v3852_v40, %v1193_v21 }
 0x2a6   :  { %v1195_v27 = vpop.f32.mrf.mxu1 }
 0x2a7   :  { %3089 = vmatmul.mubr.bf16.gmra.mxu0 %v1343_v24  ;;  %v1304_v5 = vmax.f32 %v1194_v29, 0.0 }
 0x2a8   :  { %v1196_v30 = vpop.f32.mrf.mxu1 }
 0x2a9   :  { %v1197_v45 = vadd.f32 %v3852_v40, %v1196_v30 }
 0x2aa   :  { %v1198_v31 = vpop.f32.mrf.mxu1 }
 0x2ab   :  { %v1305_v6 = vmax.f32 %v1197_v45, 0.0 }
 0x2ac   :  { %v1201_v25 = vpop.f32.mrf.mxu1 }
 0x2ad   :  { %v1344_v23 = vpack.c.bf16 %v1305_v6, %v1304_v5  ;;  %v1202_v34 = vadd.f32 %v3852_v40, %v1201_v25 }
 0x2ae   :  { %v1203_v10 = vpop.f32.mrf.mxu1 }
 0x2af   :  { %3092 = vmatprep.mubr.bf16.mxu0 %v1344_v23  ;;  %v1306_v42 = vmax.f32 %v1202_v34, 0.0 }
 0x2b0   :  { %v1204_v39 = vpop.f32.mrf.mxu1 }
 0x2b1   :  { %v1205_v36 = vadd.f32 %v3852_v40, %v1204_v39 }
 0x2b2   :  { %v1206_v18 = vpop.f32.mrf.mxu1 }
 0x2b3   :  { %v1307_v61 = vmax.f32 %v1205_v36, 0.0 }
 0x2b4   :  { %v1209_v13 = vpop.f32.mrf.mxu1 }
 0x2b5   :  { %v1345_v33 = vpack.c.bf16 %v1307_v61, %v1306_v42  ;;  %v1210_v43 = vadd.f32 %v3852_v40, %v1209_v13 }
 0x2b6   :  { %v1211_v0 = vpop.f32.mrf.mxu1 }
 0x2b7   :  { %v3046_v15 = vpop.f32.mrf.mxu0  ;;  %3093 = vmatmul.mubr.bf16.gmra.mxu0 %v1345_v33  ;;  %v1308_v54 = vmax.f32 %v1210_v43, 0.0 }
 0x2b8   :  { %v3957_v44 = vadd.f32 %v3046_v15, %v3953_v56  ;;  %v1212_v47 = vpop.f32.mrf.mxu1 }
 0x2b9   :  { %v1213_v48 = vadd.f32 %v3852_v40, %v1212_v47  ;;  %v1457_v41 = vpop.f32.mrf.mxu0 }
 0x2ba   :  { %v3961_v52 = vadd.f32 %v3953_v56, %v1457_v41  ;;  %v1214_v59 = vpop.f32.mrf.mxu1  ;;  %1716 = vmax.xlane.f32.xlu1 %v3957_v44 }
 0x2bb   :  { %v1309_v2 = vmax.f32 %v1213_v48, 0.0  ;;  %v3047_v55 = vpop.f32.mrf.mxu0 }
 0x2bc   :  { %v3965_v57 = vadd.f32 %v3047_v55, %v3953_v56  ;;  %v1217_v14 = vpop.f32.mrf.mxu1  ;;  %1712 = vmax.xlane.f32.xlu0 %v3961_v52 }
 0x2bd   :  { %v1346_v28 = vpack.c.bf16 %v1309_v2, %v1308_v54  ;;  %v1460_v46 = vpop.f32.mrf.mxu0  ;;  %v1218_v3 = vadd.f32 %v3852_v40, %v1217_v14 }
 0x2be   :  { %v3969_v58 = vadd.f32 %v3953_v56, %v1460_v46  ;;  %v1219_v60 = vpop.f32.mrf.mxu1  ;;  %1718 = vmax.xlane.f32.xlu1 %v3965_v57 }
 0x2bf   :  { %3096 = vmatprep.mubr.bf16.mxu0 %v1346_v28  ;;  %v1310_v1 = vmax.f32 %v1218_v3, 0.0 }
 0x2c0   :  { %v1220_v38 = vpop.f32.mrf.mxu1  ;;  %1714 = vmax.xlane.f32.xlu0 %v3969_v58 }
 0x2c1   :  { %v1221_v63 = vadd.f32 %v3852_v40, %v1220_v38 }
 0x2c2   :  { %v1222_v62 = vpop.f32.mrf.mxu1 }
 0x2c3   :  { %v1311_v4 = vmax.f32 %v1221_v63, 0.0 }
 0x2c4   :  { %v1225_v7 = vpop.f32.mrf.mxu1 }
 0x2c5   :  { %v1347_v37 = vpack.c.bf16 %v1311_v4, %v1310_v1  ;;  %v1226_v9 = vadd.f32 %v3852_v40, %v1225_v7 }
 0x2c6   :  { %v1227_v8 = vpop.f32.mrf.mxu1 }
 0x2c7   :  { %v3050_v32 = vpop.f32.mrf.mxu0  ;;  %3097 = vmatmul.mubr.bf16.gmra.mxu0 %v1347_v37  ;;  %v1312_v26 = vmax.f32 %v1226_v9, 0.0 }
 0x2c8   :  { %v3977_v53 = vadd.f32 %v3050_v32, %v3953_v56  ;;  %v1228_v11 = vpop.f32.mrf.mxu1 }
 0x2c9   :  { %v1229_v50 = vadd.f32 %v3852_v40, %v1228_v11  ;;  %v1473_v16 = vpop.f32.mrf.mxu0 }
 0x2ca   :  { %v1230_v35 = vpop.f32.mrf.mxu1  ;;  %1724 = vmax.xlane.f32.xlu0 %v3977_v53  ;;  %v3982_v49 = vadd.f32 %v3953_v56, %v1473_v16 }
 0x2cb   :  { %v1313_v12 = vmax.f32 %v1229_v50, 0.0  ;;  %v3051_v17 = vpop.f32.mrf.mxu0 }
 0x2cc   :  { %v3985_v19 = vadd.f32 %v3051_v17, %v3953_v56  ;;  %v1233_v22 = vpop.f32.mrf.mxu1 }
 0x2cd   :  { %v1348_v20 = vpack.c.bf16 %v1313_v12, %v1312_v26  ;;  %v1476_v51 = vpop.f32.mrf.mxu0  ;;  %v1234_v24 = vadd.f32 %v3852_v40, %v1233_v22 }
 0x2ce   :  { %v1235_v21 = vpop.f32.mrf.mxu1  ;;  %1726 = vmax.xlane.f32.xlu1 %v3985_v19  ;;  %1720 = vmax.xlane.f32.xlu0 %v3982_v49  ;;  %v3991_v27 = vadd.f32 %v3953_v56, %v1476_v51 }
 0x2cf   :  { %3100 = vmatprep.mubr.bf16.mxu0 %v1348_v20  ;;  %v1314_v31 = vmax.f32 %v1234_v24, 0.0 }
 0x2d0   :  { %v1236_v29 = vpop.f32.mrf.mxu1 }
 0x2d1   :  { %v1237_v30 = vadd.f32 %v3852_v40, %v1236_v29 }
 0x2d2   :  { %v1238_v45 = vpop.f32.mrf.mxu1  ;;  %1722 = vmax.xlane.f32.xlu1 %v3991_v27 }
 0x2d3   :  { %v1315_v5 = vmax.f32 %v1237_v30, 0.0 }
 0x2d4   :  { %v1241_v6 = vpop.f32.mrf.mxu1 }
 0x2d5   :  { %v1349_v25 = vpack.c.bf16 %v1315_v5, %v1314_v31  ;;  %v1242_v10 = vadd.f32 %v3852_v40, %v1241_v6 }
 0x2d6   :  { %v1243_v23 = vpop.f32.mrf.mxu1 }
 0x2d7   :  { %v3054_v34 = vpop.f32.mrf.mxu0  ;;  %3101 = vmatmul.mubr.bf16.gmra.mxu0 %v1349_v25  ;;  %v1316_v13 = vmax.f32 %v1242_v10, 0.0 }
 0x2d8   :  { %v3997_v39 = vadd.f32 %v3054_v34, %v3953_v56  ;;  %v1244_v36 = vpop.f32.mrf.mxu1 }
 0x2d9   :  { %v1245_v18 = vadd.f32 %v3852_v40, %v1244_v36  ;;  %v1489_v42 = vpop.f32.mrf.mxu0 }
 0x2da   :  { %v1246_v61 = vpop.f32.mrf.mxu1  ;;  %1732 = vmax.xlane.f32.xlu0 %v3997_v39  ;;  %v4002_v43 = vadd.f32 %v3953_v56, %v1489_v42 }
 0x2db   :  { %v1317_v33 = vmax.f32 %v1245_v18, 0.0  ;;  %v3055_v0 = vpop.f32.mrf.mxu0 }
 0x2dc   :  { %v4005_v15 = vadd.f32 %v3055_v0, %v3953_v56  ;;  %v1249_v47 = vpop.f32.mrf.mxu1 }
 0x2dd   :  { %v1350_v48 = vpack.c.bf16 %v1317_v33, %v1316_v13  ;;  %v1492_v41 = vpop.f32.mrf.mxu0  ;;  %v1250_v54 = vadd.f32 %v3852_v40, %v1249_v47 }
 0x2de   :  { %v1251_v59 = vpop.f32.mrf.mxu1  ;;  %1734 = vmax.xlane.f32.xlu1 %v4005_v15  ;;  %1728 = vmax.xlane.f32.xlu0 %v4002_v43  ;;  %v4011_v2 = vadd.f32 %v3953_v56, %v1492_v41 }
 0x2df   :  { %3104 = vmatprep.mubr.bf16.mxu0 %v1350_v48  ;;  %v1318_v46 = vmax.f32 %v1250_v54, 0.0 }
 0x2e0   :  { %v1252_v55 = vpop.f32.mrf.mxu1 }
 0x2e1   :  { %v1253_v14 = vadd.f32 %v3852_v40, %v1252_v55 }
 0x2e2   :  { %v1254_v28 = vpop.f32.mrf.mxu1  ;;  %1730 = vmax.xlane.f32.xlu1 %v4011_v2 }
 0x2e3   :  { %v1319_v60 = vmax.f32 %v1253_v14, 0.0 }
 0x2e5   :  { %v1351_v3 = vpack.c.bf16 %v1319_v60, %v1318_v46 }
 0x2e7   :  { %v3058_v38 = vpop.f32.mrf.mxu0  ;;  %3105 = vmatmul.mubr.bf16.gmra.mxu0 %v1351_v3 }
 0x2e8   :  { %v4016_v63 = vadd.f32 %v3058_v38, %v3953_v56 }
 0x2e9   :  { %v1505_v62 = vpop.f32.mrf.mxu0 }
 0x2ea   :  { %1740 = vmax.xlane.f32.xlu0 %v4016_v63  ;;  %v4020_v4 = vadd.f32 %v3953_v56, %v1505_v62 }
 0x2eb   :  { %v3059_v1 = vpop.f32.mrf.mxu0 }
 0x2ec   :  { %v4023_v40 = vadd.f32 %v3059_v1, %v3953_v56 }
 0x2ed   :  { %v1508_v7 = vpop.f32.mrf.mxu0 }
 0x2ee   :  { %1742 = vmax.xlane.f32.xlu1 %v4023_v40  ;;  %1736 = vmax.xlane.f32.xlu0 %v4020_v4  ;;  %v4028_v37 = vadd.f32 %v3953_v56, %v1508_v7 }
 0x2f2   :  { %1738 = vmax.xlane.f32.xlu1 %v4028_v37 }
 0x2f7   :  { %v3062_v8 = vpop.f32.mrf.mxu0 }
 0x2f8   :  { %v4032_v9 = vadd.f32 %v3062_v8, %v3953_v56 }
 0x2f9   :  { %v1521_v32 = vpop.f32.mrf.mxu0 }
 0x2fa   :  { %1748 = vmax.xlane.f32.xlu0 %v4032_v9  ;;  %v4036_v50 = vadd.f32 %v3953_v56, %v1521_v32 }
 0x2fb   :  { %v3063_v11 = vpop.f32.mrf.mxu0 }
 0x2fc   :  { %v4039_v16 = vadd.f32 %v3063_v11, %v3953_v56 }
 0x2fd   :  { %v1524_v35 = vpop.f32.mrf.mxu0 }
 0x2fe   :  { %1750 = vmax.xlane.f32.xlu1 %v4039_v16  ;;  %1744 = vmax.xlane.f32.xlu0 %v4036_v50  ;;  %v4044_v26 = vadd.f32 %v3953_v56, %v1524_v35 }
 0x302   :  { %1746 = vmax.xlane.f32.xlu1 %v4044_v26 }
 0x307   :  { %v3066_v12 = vpop.f32.mrf.mxu0 }
 0x308   :  { %v4048_v17 = vadd.f32 %v3066_v12, %v3953_v56 }
 0x309   :  { %v1537_v22 = vpop.f32.mrf.mxu0 }
 0x30a   :  { %1756 = vmax.xlane.f32.xlu0 %v4048_v17  ;;  %v4052_v51 = vadd.f32 %v3953_v56, %v1537_v22 }
 0x30b   :  { %v3067_v20 = vpop.f32.mrf.mxu0 }
 0x30c   :  { %v4055_v21 = vadd.f32 %v3067_v20, %v3953_v56 }
 0x30d   :  { %v1540_v24 = vpop.f32.mrf.mxu0 }
 0x30e   :  { %1758 = vmax.xlane.f32.xlu1 %v4055_v21  ;;  %1752 = vmax.xlane.f32.xlu0 %v4052_v51  ;;  %v4060_v29 = vadd.f32 %v3953_v56, %v1540_v24 }
 0x312   :  { %1754 = vmax.xlane.f32.xlu1 %v4060_v29 }
 0x317   :  { %v3070_v30 = vpop.f32.mrf.mxu0 }
 0x318   :  { %v4064_v45 = vadd.f32 %v3070_v30, %v3953_v56 }
 0x319   :  { %v1553_v31 = vpop.f32.mrf.mxu0 }
 0x31a   :  { %1764 = vmax.xlane.f32.xlu0 %v4064_v45  ;;  %v4068_v6 = vadd.f32 %v3953_v56, %v1553_v31 }
 0x31b   :  { %v3071_v5 = vpop.f32.mrf.mxu0 }
 0x31c   :  { %v4071_v25 = vadd.f32 %v3071_v5, %v3953_v56 }
 0x31d   :  { %v1556_v23 = vpop.f32.mrf.mxu0 }
 0x31e   :  { %1766 = vmax.xlane.f32.xlu1 %v4071_v25  ;;  %1760 = vmax.xlane.f32.xlu0 %v4068_v6  ;;  %v4076_v10 = vadd.f32 %v3953_v56, %v1556_v23 }
 0x322   :  { %1762 = vmax.xlane.f32.xlu1 %v4076_v10 }
 0x327   :  { %v3074_v34 = vpop.f32.mrf.mxu0 }
 0x328   :  { %v4080_v36 = vadd.f32 %v3074_v34, %v3953_v56 }
 0x329   :  { %v1569_v18 = vpop.f32.mrf.mxu0 }
 0x32a   :  { %1772 = vmax.xlane.f32.xlu0 %v4080_v36  ;;  %v4084_v61 = vadd.f32 %v3953_v56, %v1569_v18 }
 0x32b   :  { %v3075_v42 = vpop.f32.mrf.mxu0 }
 0x32c   :  { %v4087_v13 = vadd.f32 %v3075_v42, %v3953_v56 }
 0x32d   :  { %v1572_v33 = vpop.f32.mrf.mxu0 }
 0x32e   :  { %1774 = vmax.xlane.f32.xlu1 %v4087_v13  ;;  %1768 = vmax.xlane.f32.xlu0 %v4084_v61  ;;  %v4092_v0 = vadd.f32 %v3953_v56, %v1572_v33 }
 0x332   :  { %1770 = vmax.xlane.f32.xlu1 %v4092_v0 }
 0x337   :  { %v3078_v47 = vpop.f32.mrf.mxu0 }
 0x338   :  { %v4096_v48 = vadd.f32 %v3078_v47, %v3953_v56 }
 0x339   :  { %v1585_v41 = vpop.f32.mrf.mxu0 }
 0x33a   :  { %1780 = vmax.xlane.f32.xlu0 %v4096_v48  ;;  %v4100_v54 = vadd.f32 %v3953_v56, %v1585_v41 }
 0x33b   :  { %v3079_v59 = vpop.f32.mrf.mxu0 }
 0x33c   :  { %v4103_v55 = vadd.f32 %v3079_v59, %v3953_v56 }
 0x33d   :  { %v1588_v14 = vpop.f32.mrf.mxu0 }
 0x33e   :  { %1782 = vmax.xlane.f32.xlu1 %v4103_v55  ;;  %1776 = vmax.xlane.f32.xlu0 %v4100_v54  ;;  %v4108_v28 = vadd.f32 %v3953_v56, %v1588_v14 }
 0x342   :  { %1778 = vmax.xlane.f32.xlu1 %v4108_v28 }
 0x343   :  { %v1717_v46 = vpop.xlane.xlu1 %1716 }
 0x344   :  { %v1842_v60 = vsub.f32 %v3957_v44, %v1717_v46 }
 0x345   :  { %v1713_v3 = vpop.xlane.xlu0 %1712 }
 0x346   :  { %v1908_v38 = vmul.f32 1.442695, %v1842_v60  ;;  %v1840_v62 = vsub.f32 %v3961_v52, %v1713_v3 }
 0x347   :  { %v1719_v1 = vpop.xlane.xlu1 %1718  ;;  %v3082_v7 = vpop.f32.mrf.mxu0 }
 0x348   :  { %3182 = vpow2.f32 %v1908_v38  ;;  %v1904_v8 = vmul.f32 1.442695, %v1840_v62  ;;  %v1843_v32 = vsub.f32 %v3965_v57, %v1719_v1  ;;  %v4115_v11 = vadd.f32 %v3082_v7, %v3953_v56 }
 0x349   :  { %v1601_v35 = vpop.f32.mrf.mxu0  ;;  %v1715_v12 = vpop.xlane.xlu0 %1714 }
 0x34a   :  { %v1910_v22 = vmul.f32 1.442695, %v1843_v32  ;;  %v1841_v20 = vsub.f32 %v3969_v58, %v1715_v12  ;;  %1788 = vmax.xlane.f32.xlu0 %v4115_v11  ;;  %3184 = vpow2.f32 %v1904_v8  ;;  %v4120_v52 = vadd.f32 %v3953_v56, %v1601_v35 }
 0x34b   :  { %v3083_v44 = vpop.f32.mrf.mxu0 }
 0x34c   :  { %3186 = vpow2.f32 %v1910_v22  ;;  %v1906_v24 = vmul.f32 1.442695, %v1841_v20  ;;  %v4123_v30 = vadd.f32 %v3083_v44, %v3953_v56 }
 0x34d   :  { %v1604_v57 = vpop.f32.mrf.mxu0 }
 0x34e   :  { %1790 = vmax.xlane.f32.xlu1 %v4123_v30  ;;  %1784 = vmax.xlane.f32.xlu0 %v4120_v52  ;;  %3188 = vpow2.f32 %v1906_v24  ;;  %v4128_v58 = vadd.f32 %v3953_v56, %v1604_v57 }
 0x352   :  { %1786 = vmax.xlane.f32.xlu1 %v4128_v58 }
 0x353   :  { %v1725_v31 = vpop.xlane.xlu0 %1724 }
 0x354   :  { %v1846_v5 = vsub.f32 %v3977_v53, %v1725_v31 }
 0x355   :  { %v4132_v23 = vpop.eup %3182 }
 0x356   :  { %v1916_v34 = vmul.f32 1.442695, %v1846_v5  ;;  %2036 = vadd.xlane.f32.xlu0 %v4132_v23 }
 0x357   :  { %v1727_v18 = vpop.xlane.xlu1 %1726  ;;  %v3086_v42 = vpop.f32.mrf.mxu0 }
 0x358   :  { %v4135_v33 = vpop.eup %3184  ;;  %3190 = vpow2.f32 %v1916_v34  ;;  %v1847_v47 = vsub.f32 %v3985_v19, %v1727_v18  ;;  %v1721_v41 = vpop.xlane.xlu0 %1720  ;;  %v4144_v38 = vadd.f32 %v3086_v42, %v3953_v56 }
 0x359   :  { %v4138_v59 = vpop.eup %3186  ;;  %v1844_v14 = vsub.f32 %v3982_v49, %v1721_v41  ;;  %v1617_v46 = vpop.f32.mrf.mxu0 }
 0x35a   :  { %v1918_v60 = vmul.f32 1.442695, %v1847_v47  ;;  %2038 = vadd.xlane.f32.xlu1 %v4138_v59  ;;  %2032 = vadd.xlane.f32.xlu0 %v4135_v33  ;;  %v4152_v49 = vadd.f32 %v3953_v56, %v1617_v46 }
 0x35b   :  { %v1912_v53 = vmul.f32 1.442695, %v1844_v14  ;;  %v1723_v3 = vpop.xlane.xlu1 %1722  ;;  %v4147_v19 = vpop.eup %3188 }
 0x35c   :  { %3192 = vpow2.f32 %v1918_v60  ;;  %v1845_v62 = vsub.f32 %v3991_v27, %v1723_v3  ;;  %v3087_v1 = vpop.f32.mrf.mxu0 }
 0x35d   :  { %3194 = vpow2.f32 %v1912_v53  ;;  %v4155_v8 = vadd.f32 %v3087_v1, %v3953_v56 }
 0x35e   :  { %v1914_v7 = vmul.f32 1.442695, %v1845_v62  ;;  %1796 = vmax.xlane.f32.xlu0 %v4144_v38  ;;  %2034 = vadd.xlane.f32.xlu1 %v4147_v19  ;;  %v1620_v32 = vpop.f32.mrf.mxu0 }
 0x35f   :  { %v4160_v35 = vadd.f32 %v3953_v56, %v1620_v32 }
 0x360   :  { %3196 = vpow2.f32 %v1914_v7 }
 0x362   :  { %1792 = vmax.xlane.f32.xlu0 %v4152_v49  ;;  %1798 = vmax.xlane.f32.xlu1 %v4155_v8 }
 0x363   :  { %v1733_v27 = vpop.xlane.xlu0 %1732 }
 0x364   :  { %v1850_v12 = vsub.f32 %v3997_v39, %v1733_v27 }
 0x365   :  { %v4163_v22 = vpop.eup %3190 }
 0x366   :  { %v1924_v20 = vmul.f32 1.442695, %v1850_v12  ;;  %1794 = vmax.xlane.f32.xlu1 %v4160_v35  ;;  %2044 = vadd.xlane.f32.xlu0 %v4163_v22 }
 0x367   :  { %v3090_v44 = vpop.f32.mrf.mxu0  ;;  %v1735_v24 = vpop.xlane.xlu1 %1734 }
 0x368   :  { %3198 = vpow2.f32 %v1924_v20  ;;  %v1851_v57 = vsub.f32 %v4005_v15, %v1735_v24  ;;  %v1729_v31 = vpop.xlane.xlu0 %1728  ;;  %v4179_v15 = vadd.f32 %v3090_v44, %v3953_v56 }
 0x369   :  { %v4168_v5 = vpop.eup %3192  ;;  %v1848_v34 = vsub.f32 %v4002_v43, %v1729_v31  ;;  %v1633_v18 = vpop.f32.mrf.mxu0 }
 0x36a   :  { %v4171_v42 = vpop.eup %3194  ;;  %v1926_v39 = vmul.f32 1.442695, %v1851_v57  ;;  %2046 = vadd.xlane.f32.xlu1 %v4168_v5  ;;  %v4187_v3 = vadd.f32 %v3953_v56, %v1633_v18 }
 0x36b   :  { %v1920_v47 = vmul.f32 1.442695, %v1848_v34  ;;  %2040 = vadd.xlane.f32.xlu0 %v4171_v42  ;;  %v1731_v41 = vpop.xlane.xlu1 %1730  ;;  %v3091_v43 = vpop.f32.mrf.mxu0 }
 0x36c   :  { %3200 = vpow2.f32 %v1926_v39  ;;  %v1849_v14 = vsub.f32 %v4011_v2, %v1731_v41  ;;  %v4184_v53 = vadd.f32 %v3091_v43, %v3953_v56 }
 0x36d   :  { %v4176_v46 = vpop.eup %3196  ;;  %3202 = vpow2.f32 %v1920_v47  ;;  %v1636_v2 = vpop.f32.mrf.mxu0 }
 0x36e   :  { %v1922_v60 = vmul.f32 1.442695, %v1849_v14  ;;  %2042 = vadd.xlane.f32.xlu1 %v4176_v46  ;;  %v4192_v1 = vadd.f32 %v3953_v56, %v1636_v2 }
 0x36f   :  { %1804 = vmax.xlane.f32.xlu0 %v4179_v15 }
 0x370   :  { %3204 = vpow2.f32 %v1922_v60 }
 0x372   :  { %1806 = vmax.xlane.f32.xlu1 %v4184_v53 }
 0x373   :  { %1800 = vmax.xlane.f32.xlu0 %v4187_v3  ;;  %v1741_v62 = vpop.xlane.xlu0 %1740 }
 0x374   :  { %v1854_v7 = vsub.f32 %v4016_v63, %v1741_v62 }
 0x375   :  { %v4195_v32 = vpop.eup %3198 }
 0x376   :  { %v1932_v27 = vmul.f32 1.442695, %v1854_v7  ;;  %1802 = vmax.xlane.f32.xlu1 %v4192_v1 }
 0x377   :  { %2052 = vadd.xlane.f32.xlu0 %v4195_v32  ;;  %v3094_v12 = vpop.f32.mrf.mxu0  ;;  %v1743_v20 = vpop.xlane.xlu1 %1742 }
 0x378   :  { %3206 = vpow2.f32 %v1932_v27  ;;  %v1855_v44 = vsub.f32 %v4023_v40, %v1743_v20  ;;  %v1737_v24 = vpop.xlane.xlu0 %1736  ;;  %v4211_v40 = vadd.f32 %v3094_v12, %v3953_v56 }
 0x379   :  { %v4200_v57 = vpop.eup %3200  ;;  %v1852_v31 = vsub.f32 %v4020_v4, %v1737_v24  ;;  %v1649_v34 = vpop.f32.mrf.mxu0 }
 0x37a   :  { %v4203_v18 = vpop.eup %3202  ;;  %v1934_v63 = vmul.f32 1.442695, %v1855_v44  ;;  %2054 = vadd.xlane.f32.xlu1 %v4200_v57  ;;  %v4219_v2 = vadd.f32 %v3953_v56, %v1649_v34 }
 0x37b   :  { %v1928_v39 = vmul.f32 1.442695, %v1852_v31  ;;  %2048 = vadd.xlane.f32.xlu0 %v4203_v18  ;;  %v1739_v47 = vpop.xlane.xlu1 %1738  ;;  %v3095_v4 = vpop.f32.mrf.mxu0 }
 0x37c   :  { %3208 = vpow2.f32 %v1934_v63  ;;  %v1853_v41 = vsub.f32 %v4028_v37, %v1739_v47  ;;  %v4216_v60 = vadd.f32 %v3095_v4, %v3953_v56 }
 0x37d   :  { %v4208_v14 = vpop.eup %3204  ;;  %3210 = vpow2.f32 %v1928_v39  ;;  %v1652_v37 = vpop.f32.mrf.mxu0 }
 0x37e   :  { %v1930_v43 = vmul.f32 1.442695, %v1853_v41  ;;  %2050 = vadd.xlane.f32.xlu1 %v4208_v14  ;;  %v4224_v7 = vadd.f32 %v3953_v56, %v1652_v37 }
 0x37f   :  { %1812 = vmax.xlane.f32.xlu0 %v4211_v40 }
 0x380   :  { %3212 = vpow2.f32 %v1930_v43 }
 0x382   :  { %1814 = vmax.xlane.f32.xlu1 %v4216_v60 }
 0x383   :  { %1808 = vmax.xlane.f32.xlu0 %v4219_v2  ;;  %v1749_v62 = vpop.xlane.xlu0 %1748 }
 0x384   :  { %v1858_v27 = vsub.f32 %v4032_v9, %v1749_v62 }
 0x385   :  { %v4227_v12 = vpop.eup %3206 }
 0x386   :  { %4569 = vst [vmem:[#allocation15_spill] sm:$0xff] %v4227_v12  ;;  %v1940_v20 = vmul.f32 1.442695, %v1858_v27  ;;  %1810 = vmax.xlane.f32.xlu1 %v4224_v7 }
 0x387   :  { %2060 = vadd.xlane.f32.xlu0 %v4227_v12  ;;  %v3098_v44 = vpop.f32.mrf.mxu0  ;;  %v1751_v24 = vpop.xlane.xlu1 %1750 }
 0x388   :  { %3214 = vpow2.f32 %v1940_v20  ;;  %v1859_v31 = vsub.f32 %v4039_v16, %v1751_v24  ;;  %v1745_v34 = vpop.xlane.xlu0 %1744  ;;  %v4243_v16 = vadd.f32 %v3098_v44, %v3953_v56 }
 0x389   :  { %v4232_v63 = vpop.eup %3208  ;;  %v1856_v39 = vsub.f32 %v4036_v50, %v1745_v34  ;;  %v1665_v47 = vpop.f32.mrf.mxu0 }
 0x38a   :  { %4570 = vst [vmem:[#allocation16_spill] sm:$0xff] %v4232_v63  ;;  %v4235_v41 = vpop.eup %3210  ;;  %v1942_v9 = vmul.f32 1.442695, %v1859_v31  ;;  %2062 = vadd.xlane.f32.xlu1 %v4232_v63  ;;  %v4251_v24 = vadd.f32 %v3953_v56, %v1665_v47 }
 0x38b   :  { %4571 = vst [vmem:[#allocation17_spill] sm:$0xff] %v4235_v41  ;;  %v1936_v4 = vmul.f32 1.442695, %v1856_v39  ;;  %2056 = vadd.xlane.f32.xlu0 %v4235_v41  ;;  %v1747_v43 = vpop.xlane.xlu1 %1746  ;;  %v3099_v50 = vpop.f32.mrf.mxu0 }
 0x38c   :  { %3216 = vpow2.f32 %v1942_v9  ;;  %v1857_v37 = vsub.f32 %v4044_v26, %v1747_v43  ;;  %v4248_v20 = vadd.f32 %v3099_v50, %v3953_v56 }
 0x38d   :  { %v4240_v62 = vpop.eup %3212  ;;  %3218 = vpow2.f32 %v1936_v4  ;;  %v1668_v26 = vpop.f32.mrf.mxu0 }
 0x38e   :  { %4572 = vst [vmem:[#allocation18_spill] sm:$0xff] %v4240_v62  ;;  %v1938_v27 = vmul.f32 1.442695, %v1857_v37  ;;  %2058 = vadd.xlane.f32.xlu1 %v4240_v62  ;;  %v4256_v31 = vadd.f32 %v3953_v56, %v1668_v26 }
 0x38f   :  { %1820 = vmax.xlane.f32.xlu0 %v4243_v16 }
 0x390   :  { %3220 = vpow2.f32 %v1938_v27 }
 0x392   :  { %1822 = vmax.xlane.f32.xlu1 %v4248_v20 }
 0x393   :  { %1816 = vmax.xlane.f32.xlu0 %v4251_v24  ;;  %v1757_v44 = vpop.xlane.xlu0 %1756 }
 0x394   :  { %v1862_v41 = vsub.f32 %v4048_v17, %v1757_v44 }
 0x395   :  { %v4258_v34 = vpop.eup %3214 }
 0x396   :  { %4573 = vst [vmem:[#allocation19_spill] sm:$0xff] %v4258_v34  ;;  %1818 = vmax.xlane.f32.xlu1 %v4256_v31  ;;  %v1948_v12 = vmul.f32 1.442695, %v1862_v41 }
 0x397   :  { %2068 = vadd.xlane.f32.xlu0 %v4258_v34  ;;  %v3102_v39 = vpop.f32.mrf.mxu0  ;;  %v1759_v9 = vpop.xlane.xlu1 %1758 }
 0x398   :  { %v1753_v47 = vpop.xlane.xlu0 %1752  ;;  %v4272_v26 = vadd.f32 %v3102_v39, %v3953_v56  ;;  %v1863_v39 = vsub.f32 %v4055_v21, %v1759_v9 }
 0x399   :  { %v4262_v4 = vpop.eup %3216  ;;  %v1681_v43 = vpop.f32.mrf.mxu0  ;;  %v1860_v50 = vsub.f32 %v4052_v51, %v1753_v47 }
 0x39a   :  { %4574 = vst [vmem:[#allocation20_spill] sm:$0xff] %v4262_v4  ;;  %v4264_v37 = vpop.eup %3218  ;;  %2070 = vadd.xlane.f32.xlu1 %v4262_v4  ;;  %v4282_v51 = vadd.f32 %v3953_v56, %v1681_v43 }
 0x39b   :  { %4575 = vst [vmem:[#allocation21_spill] sm:$0xff] %v4264_v37  ;;  %2064 = vadd.xlane.f32.xlu0 %v4264_v37  ;;  %v3103_v34 = vpop.f32.mrf.mxu0  ;;  %v1755_v62 = vpop.xlane.xlu1 %1754  ;;  %v1944_v63 = vmul.f32 1.442695, %v1860_v50 }
 0x39c   :  { %v4278_v4 = vadd.f32 %v3103_v34, %v3953_v56  ;;  %v1861_v37 = vsub.f32 %v4060_v29, %v1755_v62  ;;  %v1950_v29 = vmul.f32 1.442695, %v1863_v39 }
 0x39d   :  { %v4269_v27 = vpop.eup %3220  ;;  %v1684_v47 = vpop.f32.mrf.mxu0  ;;  %3222 = vpow2.f32 %v1944_v63 }
 0x39e   :  { %2066 = vadd.xlane.f32.xlu1 %v4269_v27  ;;  %v1946_v44 = vmul.f32 1.442695, %v1861_v37  ;;  %v4288_v50 = vadd.f32 %v3953_v56, %v1684_v47  ;;  %3224 = vpow2.f32 %v1948_v12 }
 0x39f   :  { %1828 = vmax.xlane.f32.xlu0 %v4272_v26 }
 0x3a0   :  { %3226 = vpow2.f32 %v1946_v44 }
 0x3a1   :  { %3228 = vpow2.f32 %v1950_v29 }
 0x3a2   :  { %1830 = vmax.xlane.f32.xlu1 %v4278_v4 }
 0x3a3   :  { %1824 = vmax.xlane.f32.xlu0 %v4282_v51  ;;  %v1765_v17 = vpop.xlane.xlu0 %1764 }
 0x3a4   :  { %v1866_v34 = vsub.f32 %v4064_v45, %v1765_v17 }
 0x3a6   :  { %1826 = vmax.xlane.f32.xlu1 %v4288_v50  ;;  %v1956_v62 = vmul.f32 1.442695, %v1866_v34 }
 0x3a7   :  { %v3106_v43 = vpop.f32.mrf.mxu0  ;;  %v1767_v21 = vpop.xlane.xlu1 %1766 }
 0x3a8   :  { %v4293_v41 = vadd.f32 %v3106_v43, %v3953_v56  ;;  %v1867_v9 = vsub.f32 %v4071_v25, %v1767_v21  ;;  %v1761_v63 = vpop.xlane.xlu0 %1760  ;;  %3230 = vpow2.f32 %v1956_v62 }
 0x3a9   :  { %v1864_v37 = vsub.f32 %v4068_v6, %v1761_v63  ;;  %v1697_v47 = vpop.f32.mrf.mxu0 }
 0x3aa   :  { %1836 = vmax.xlane.f32.xlu0 %v4293_v41  ;;  %v1958_v45 = vmul.f32 1.442695, %v1867_v9  ;;  %v4299_v34 = vadd.f32 %v3953_v56, %v1697_v47  ;;  %v4310_v62 = vpop.eup %3222 }
 0x3ab   :  { %v3107_v39 = vpop.f32.mrf.mxu0  ;;  %v1763_v12 = vpop.xlane.xlu1 %1762  ;;  %v1952_v17 = vmul.f32 1.442695, %v1864_v37 }
 0x3ac   :  { %v4302_v44 = vadd.f32 %v3107_v39, %v3953_v56  ;;  %v1865_v25 = vsub.f32 %v4076_v10, %v1763_v12  ;;  %3232 = vpow2.f32 %v1958_v45  ;;  %v4314_v9 = vpop.eup %3224 }
 0x3ad   :  { %v1700_v43 = vpop.f32.mrf.mxu0  ;;  %3234 = vpow2.f32 %v1952_v17  ;;  %v4317_v63 = vpop.eup %3226 }
 0x3ae   :  { %1838 = vmax.xlane.f32.xlu1 %v4302_v44  ;;  %1832 = vmax.xlane.f32.xlu0 %v4299_v34  ;;  %v1954_v6 = vmul.f32 1.442695, %v1865_v25  ;;  %v4308_v29 = vadd.f32 %v3953_v56, %v1700_v43  ;;  %v4321_v56 = vpop.eup %3228 }
 0x3b0   :  { %3236 = vpow2.f32 %v1954_v6 }
 0x3b2   :  { %1834 = vmax.xlane.f32.xlu1 %v4308_v29  ;;  %2072 = vadd.xlane.f32.xlu0 %v4310_v62 }
 0x3b3   :  { %v1773_v21 = vpop.xlane.xlu0 %1772 }
 0x3b4   :  { %v1870_v10 = vsub.f32 %v4080_v36, %v1773_v21 }
 0x3b5   :  { %v4323_v39 = vpop.eup %3230 }
 0x3b6   :  { %v1964_v37 = vmul.f32 1.442695, %v1870_v10  ;;  %2074 = vadd.xlane.f32.xlu1 %v4317_v63  ;;  %2076 = vadd.xlane.f32.xlu0 %v4314_v9 }
 0x3b7   :  { %v1775_v47 = vpop.xlane.xlu1 %1774  ;;  %v1769_v45 = vpop.xlane.xlu0 %1768 }
 0x3b8   :  { %3238 = vpow2.f32 %v1964_v37  ;;  %v1871_v12 = vsub.f32 %v4087_v13, %v1775_v47  ;;  %v1868_v17 = vsub.f32 %v4084_v61, %v1769_v45 }
 0x3b9   :  { %v4329_v6 = vpop.eup %3232 }
 0x3ba   :  { %v1966_v25 = vmul.f32 1.442695, %v1871_v12  ;;  %v1960_v36 = vmul.f32 1.442695, %v1868_v17  ;;  %2078 = vadd.xlane.f32.xlu1 %v4321_v56  ;;  %2084 = vadd.xlane.f32.xlu0 %v4323_v39  ;;  %v4332_v10 = vpop.eup %3234 }
 0x3bb   :  { %v1771_v43 = vpop.xlane.xlu1 %1770 }
 0x3bc   :  { %3240 = vpow2.f32 %v1966_v25  ;;  %v1869_v21 = vsub.f32 %v4092_v0, %v1771_v43 }
 0x3bd   :  { %3242 = vpow2.f32 %v1960_v36  ;;  %v4336_v61 = vpop.eup %3236 }
 0x3be   :  { %v1962_v37 = vmul.f32 1.442695, %v1869_v21  ;;  %2086 = vadd.xlane.f32.xlu1 %v4329_v6  ;;  %2080 = vadd.xlane.f32.xlu0 %v4332_v10  ;;  %4576 = vst [vmem:[#allocation22_spill] sm:$0xff] %v4336_v61 }
 0x3c0   :  { %3244 = vpow2.f32 %v1962_v37 }
 0x3c2   :  { %2082 = vadd.xlane.f32.xlu1 %v4336_v61 }
 0x3c3   :  { %v1781_v13 = vpop.xlane.xlu0 %1780 }
 0x3c4   :  { %v1874_v47 = vsub.f32 %v4096_v48, %v1781_v13 }
 0x3c5   :  { %v4340_v45 = vpop.eup %3238 }
 0x3c6   :  { %v1972_v12 = vmul.f32 1.442695, %v1874_v47  ;;  %2092 = vadd.xlane.f32.xlu0 %v4340_v45 }
 0x3c7   :  { %v1783_v0 = vpop.xlane.xlu1 %1782  ;;  %v1777_v17 = vpop.xlane.xlu0 %1776 }
 0x3c8   :  { %3246 = vpow2.f32 %v1972_v12  ;;  %v1875_v25 = vsub.f32 %v4103_v55, %v1783_v0  ;;  %v1872_v36 = vsub.f32 %v4100_v54, %v1777_v17 }
 0x3c9   :  { %v4345_v43 = vpop.eup %3240 }
 0x3ca   :  { %v4347_v21 = vpop.eup %3242  ;;  %v1974_v37 = vmul.f32 1.442695, %v1875_v25  ;;  %v1968_v61 = vmul.f32 1.442695, %v1872_v36  ;;  %2094 = vadd.xlane.f32.xlu1 %v4345_v43 }
 0x3cb   :  { %2088 = vadd.xlane.f32.xlu0 %v4347_v21  ;;  %v1779_v48 = vpop.xlane.xlu1 %1778 }
 0x3cc   :  { %3248 = vpow2.f32 %v1974_v37  ;;  %v1873_v13 = vsub.f32 %v4108_v28, %v1779_v48 }
 0x3cd   :  { %v4352_v47 = vpop.eup %3244  ;;  %3250 = vpow2.f32 %v1968_v61 }
 0x3ce   :  { %v1970_v55 = vmul.f32 1.442695, %v1873_v13  ;;  %2090 = vadd.xlane.f32.xlu1 %v4352_v47 }
 0x3d0   :  { %3252 = vpow2.f32 %v1970_v55 }
 0x3d3   :  { %v1789_v54 = vpop.xlane.xlu0 %1788 }
 0x3d4   :  { %v1878_v12 = vsub.f32 %v4115_v11, %v1789_v54 }
 0x3d5   :  { %v4356_v0 = vpop.eup %3246 }
 0x3d6   :  { %v1980_v17 = vmul.f32 1.442695, %v1878_v12  ;;  %2100 = vadd.xlane.f32.xlu0 %v4356_v0 }
 0x3d7   :  { %v1791_v25 = vpop.xlane.xlu1 %1790  ;;  %v1785_v36 = vpop.xlane.xlu0 %1784 }
 0x3d8   :  { %3254 = vpow2.f32 %v1980_v17  ;;  %v1879_v28 = vsub.f32 %v4123_v30, %v1791_v25  ;;  %v1876_v37 = vsub.f32 %v4120_v52, %v1785_v36 }
 0x3d9   :  { %v4361_v61 = vpop.eup %3248 }
 0x3da   :  { %v4363_v48 = vpop.eup %3250  ;;  %v1982_v13 = vmul.f32 1.442695, %v1879_v28  ;;  %v1976_v55 = vmul.f32 1.442695, %v1876_v37  ;;  %2102 = vadd.xlane.f32.xlu1 %v4361_v61 }
 0x3db   :  { %2096 = vadd.xlane.f32.xlu0 %v4363_v48  ;;  %v1787_v11 = vpop.xlane.xlu1 %1786 }
 0x3dc   :  { %3256 = vpow2.f32 %v1982_v13  ;;  %v1877_v54 = vsub.f32 %v4128_v58, %v1787_v11 }
 0x3dd   :  { %v4368_v12 = vpop.eup %3252  ;;  %3258 = vpow2.f32 %v1976_v55 }
 0x3de   :  { %v1978_v30 = vmul.f32 1.442695, %v1877_v54  ;;  %2098 = vadd.xlane.f32.xlu1 %v4368_v12 }
 0x3df   :  { %v2037_v52 = vpop.xlane.xlu0 %2036 }
 0x3e0   :  { %3260 = vpow2.f32 %v1978_v30 }
 0x3e1   :  { %3262 = vrcp.f32 %v2037_v52 }
 0x3e3   :  { %v2039_v17 = vpop.xlane.xlu1 %2038  ;;  %v2033_v25 = vpop.xlane.xlu0 %2032 }
 0x3e4   :  { %3264 = vrcp.f32 %v2039_v17 }
 0x3e5   :  { %v4371_v36 = vpop.eup %3254  ;;  %3266 = vrcp.f32 %v2033_v25 }
 0x3e6   :  { %4577 = vst [vmem:[#allocation23_spill] sm:$0xff] %v4371_v36  ;;  %2108 = vadd.xlane.f32.xlu0 %v4371_v36 }
 0x3e7   :  { %v2035_v28 = vpop.xlane.xlu1 %2034  ;;  %v1797_v37 = vpop.xlane.xlu0 %1796 }
 0x3e8   :  { %3268 = vrcp.f32 %v2035_v28  ;;  %v1882_v58 = vsub.f32 %v4144_v38, %v1797_v37 }
 0x3e9   :  { %v4375_v13 = vpop.eup %3256 }
 0x3ea   :  { %4578 = vst [vmem:[#allocation24_spill] sm:$0xff] %v4375_v13  ;;  %v4377_v55 = vpop.eup %3258  ;;  %v1988_v11 = vmul.f32 1.442695, %v1882_v58  ;;  %2110 = vadd.xlane.f32.xlu1 %v4375_v13 }
 0x3eb   :  { %4579 = vst [vmem:[#allocation25_spill] sm:$0xff] %v4377_v55  ;;  %2104 = vadd.xlane.f32.xlu0 %v4377_v55  ;;  %v1799_v54 = vpop.xlane.xlu1 %1798  ;;  %v1793_v30 = vpop.xlane.xlu0 %1792 }
 0x3ec   :  { %3270 = vpow2.f32 %v1988_v11  ;;  %v1883_v52 = vsub.f32 %v4155_v8, %v1799_v54  ;;  %v1880_v17 = vsub.f32 %v4152_v49, %v1793_v30 }
 0x3ed   :  { %v4383_v25 = vpop.eup %3260 }
 0x3ee   :  { %4580 = vst [vmem:[#allocation26_spill] sm:$0xff] %v4383_v25  ;;  %v1990_v28 = vmul.f32 1.442695, %v1883_v52  ;;  %v1984_v38 = vmul.f32 1.442695, %v1880_v17  ;;  %2106 = vadd.xlane.f32.xlu1 %v4383_v25  ;;  %v3263_v37 = vpop.eup %3262 }
 0x3ef   :  { %v1795_v36 = vpop.xlane.xlu1 %1794  ;;  %v2045_v58 = vpop.xlane.xlu0 %2044  ;;  %v2226_v11 = vmul.f32 %v3263_v37, %v4132_v23 }
 0x3f0   :  { %3272 = vpow2.f32 %v1990_v28  ;;  %v1881_v13 = vsub.f32 %v4160_v35, %v1795_v36 }
 0x3f1   :  { %v3265_v55 = vpop.eup %3264  ;;  %3274 = vpow2.f32 %v1984_v38 }
 0x3f2   :  { %v2227_v8 = vmul.f32 %v3265_v55, %v4138_v59  ;;  %v1986_v54 = vmul.f32 1.442695, %v1881_v13  ;;  %v3267_v49 = vpop.eup %3266  ;;  %3276 = vrcp.f32 %v2045_v58 }
 0x3f3   :  { %v2047_v30 = vpop.xlane.xlu1 %2046  ;;  %v2224_v28 = vmul.f32 %v3267_v49, %v4135_v33 }
 0x3f4   :  { %v2805_v52 = vpack.c.bf16 %v2227_v8, %v2226_v11  ;;  %3278 = vpow2.f32 %v1986_v54  ;;  %v2041_v17 = vpop.xlane.xlu0 %2040 }
 0x3f5   :  { %v3269_v25 = vpop.eup %3268  ;;  %3280 = vrcp.f32 %v2047_v30 }
 0x3f6   :  { %2957 = vst [vmem:[#allocation10 + $0x8] sm:$0xff] %v2805_v52   ;;  %v2225_v35 = vmul.f32 %v3269_v25, %v4147_v19  ;;  %3282 = vrcp.f32 %v2041_v17 }
 0x3f7   :  { %v2043_v36 = vpop.xlane.xlu1 %2042 }
 0x3f8   :  { %v2800_v38 = vpack.c.bf16 %v2225_v35, %v2224_v28  ;;  %3284 = vrcp.f32 %v2043_v36  ;;  %v1805_v23 = vpop.xlane.xlu0 %1804 }
 0x3f9   :  { %v4391_v59 = vpop.eup %3270  ;;  %v1886_v13 = vsub.f32 %v4179_v15, %v1805_v23 }
 0x3fa   :  { %2801 = vst [vmem:[#allocation10] sm:$0xff] %v2800_v38   ;;  %2116 = vadd.xlane.f32.xlu0 %v4391_v59 }
 0x3fb   :  { %v1996_v55 = vmul.f32 1.442695, %v1886_v13  ;;  %v1807_v37 = vpop.xlane.xlu1 %1806 }
 0x3fc   :  { %v1887_v58 = vsub.f32 %v4184_v53, %v1807_v37  ;;  %v1801_v11 = vpop.xlane.xlu0 %1800 }
 0x3fd   :  { %v4396_v33 = vpop.eup %3272  ;;  %3286 = vpow2.f32 %v1996_v55  ;;  %v1884_v19 = vsub.f32 %v4187_v3, %v1801_v11 }
 0x3fe   :  { %v4399_v25 = vpop.eup %3274  ;;  %v1998_v8 = vmul.f32 1.442695, %v1887_v58  ;;  %2118 = vadd.xlane.f32.xlu1 %v4396_v33 }
 0x3ff   :  { %v1992_v54 = vmul.f32 1.442695, %v1884_v19  ;;  %2112 = vadd.xlane.f32.xlu0 %v4399_v25  ;;  %v1803_v15 = vpop.xlane.xlu1 %1802  ;;  %v3277_v49 = vpop.eup %3276 }
 0x400   :  { %3288 = vpow2.f32 %v1998_v8  ;;  %v1885_v30 = vsub.f32 %v4192_v1, %v1803_v15  ;;  %v2053_v53 = vpop.xlane.xlu0 %2052  ;;  %v2230_v35 = vmul.f32 %v3277_v49, %v4163_v22 }
 0x401   :  { %v4404_v52 = vpop.eup %3278  ;;  %3290 = vpow2.f32 %v1992_v54 }
 0x402   :  { %v3281_v17 = vpop.eup %3280  ;;  %v1994_v28 = vmul.f32 1.442695, %v1885_v30  ;;  %2114 = vadd.xlane.f32.xlu1 %v4404_v52  ;;  %3292 = vrcp.f32 %v2053_v53 }
 0x403   :  { %v3283_v3 = vpop.eup %3282  ;;  %v2231_v36 = vmul.f32 %v3281_v17, %v4168_v5  ;;  %v2055_v38 = vpop.xlane.xlu1 %2054 }
 0x404   :  { %3294 = vpow2.f32 %v1994_v28  ;;  %v2049_v23 = vpop.xlane.xlu0 %2048  ;;  %v2228_v1 = vmul.f32 %v3283_v3, %v4171_v42 }
 0x405   :  { %v3285_v13 = vpop.eup %3284  ;;  %v2815_v55 = vpack.c.bf16 %v2231_v36, %v2230_v35  ;;  %3296 = vrcp.f32 %v2055_v38 }
 0x406   :  { %v2229_v37 = vmul.f32 %v3285_v13, %v4176_v46  ;;  %3298 = vrcp.f32 %v2049_v23 }
 0x407   :  { %2959 = vst [vmem:[#allocation10 + $0x18] sm:$0xff] %v2815_v55   ;;  %v2051_v58 = vpop.xlane.xlu1 %2050 }
 0x408   :  { %v2810_v11 = vpack.c.bf16 %v2229_v37, %v2228_v1  ;;  %3300 = vrcp.f32 %v2051_v58  ;;  %v1813_v19 = vpop.xlane.xlu0 %1812 }
 0x409   :  { %v1890_v22 = vsub.f32 %v4211_v40, %v1813_v19 }
 0x40a   :  { %v4412_v5 = vpop.eup %3286  ;;  %2958 = vst [vmem:[#allocation10 + $0x10] sm:$0xff] %v2810_v11  }
 0x40b   :  { %v2004_v8 = vmul.f32 1.442695, %v1890_v22  ;;  %2124 = vadd.xlane.f32.xlu0 %v4412_v5  ;;  %v1815_v54 = vpop.xlane.xlu1 %1814 }
 0x40c   :  { %v1891_v15 = vsub.f32 %v4216_v60, %v1815_v54  ;;  %v1809_v42 = vpop.xlane.xlu0 %1808 }
 0x40d   :  { %v4416_v49 = vpop.eup %3288  ;;  %3302 = vpow2.f32 %v2004_v8  ;;  %v1888_v46 = vsub.f32 %v4219_v2, %v1809_v42 }
 0x40e   :  { %v4419_v30 = vpop.eup %3290  ;;  %v2006_v53 = vmul.f32 1.442695, %v1891_v15  ;;  %2126 = vadd.xlane.f32.xlu1 %v4416_v49 }
 0x40f   :  { %v2000_v40 = vmul.f32 1.442695, %v1888_v46  ;;  %2120 = vadd.xlane.f32.xlu0 %v4419_v30  ;;  %v1811_v17 = vpop.xlane.xlu1 %1810  ;;  %v3293_v28 = vpop.eup %3292 }
 0x410   :  { %3304 = vpow2.f32 %v2006_v53  ;;  %v1889_v3 = vsub.f32 %v4224_v7, %v1811_v17  ;;  %v2061_v60 = vpop.xlane.xlu0 %2060  ;;  %v2234_v23 = vmul.f32 %v3293_v28, %v4195_v32 }
 0x411   :  { %v4424_v35 = vpop.eup %3294  ;;  %3306 = vpow2.f32 %v2000_v40 }
 0x412   :  { %v3297_v36 = vpop.eup %3296  ;;  %v2002_v38 = vmul.f32 1.442695, %v1889_v3  ;;  %2122 = vadd.xlane.f32.xlu1 %v4424_v35  ;;  %3308 = vrcp.f32 %v2061_v60 }
 0x413   :  { %v3299_v2 = vpop.eup %3298  ;;  %v2235_v13 = vmul.f32 %v3297_v36, %v4200_v57  ;;  %v2063_v55 = vpop.xlane.xlu1 %2062 }
 0x414   :  { %3310 = vpow2.f32 %v2002_v38  ;;  %v2057_v1 = vpop.xlane.xlu0 %2056  ;;  %v2232_v7 = vmul.f32 %v3299_v2, %v4203_v18  ;;  %v4581_v2 = vld [vmem:[#allocation15_spill] sm:$0xff] }
 0x415   :  { %v3301_v37 = vpop.eup %3300  ;;  %v2825_v58 = vpack.c.bf16 %v2235_v13, %v2234_v23  ;;  %3312 = vrcp.f32 %v2063_v55  ;;  %v4582_v13 = vld [vmem:[#allocation16_spill] sm:$0xff] }
 0x416   :  { %v2233_v11 = vmul.f32 %v3301_v37, %v4208_v14  ;;  %3314 = vrcp.f32 %v2057_v1 }
 0x417   :  { %2961 = vst [vmem:[#allocation10 + $0x28] sm:$0xff] %v2825_v58   ;;  %v2059_v19 = vpop.xlane.xlu1 %2058 }
 0x418   :  { %v2820_v22 = vpack.c.bf16 %v2233_v11, %v2232_v7  ;;  %3316 = vrcp.f32 %v2059_v19  ;;  %v1821_v8 = vpop.xlane.xlu0 %1820  ;;  %v4584_v19 = vld [vmem:[#allocation18_spill] sm:$0xff] }
 0x419   :  { %v1894_v32 = vsub.f32 %v4243_v16, %v1821_v8 }
 0x41a   :  { %v4432_v57 = vpop.eup %3302  ;;  %2960 = vst [vmem:[#allocation10 + $0x20] sm:$0xff] %v2820_v22  }
 0x41b   :  { %v2012_v54 = vmul.f32 1.442695, %v1894_v32  ;;  %2132 = vadd.xlane.f32.xlu0 %v4432_v57  ;;  %v1823_v15 = vpop.xlane.xlu1 %1822 }
 0x41c   :  { %v1895_v42 = vsub.f32 %v4248_v20, %v1823_v15  ;;  %v1817_v18 = vpop.xlane.xlu0 %1816 }
 0x41d   :  { %v4436_v46 = vpop.eup %3304  ;;  %3318 = vpow2.f32 %v2012_v54  ;;  %v1892_v14 = vsub.f32 %v4251_v24, %v1817_v18 }
 0x41e   :  { %v4439_v53 = vpop.eup %3306  ;;  %v2014_v40 = vmul.f32 1.442695, %v1895_v42  ;;  %2134 = vadd.xlane.f32.xlu1 %v4436_v46 }
 0x41f   :  { %v2008_v16 = vmul.f32 1.442695, %v1892_v14  ;;  %2128 = vadd.xlane.f32.xlu0 %v4439_v53  ;;  %v1819_v17 = vpop.xlane.xlu1 %1818  ;;  %v3309_v28 = vpop.eup %3308 }
 0x420   :  { %3320 = vpow2.f32 %v2014_v40  ;;  %v1893_v3 = vsub.f32 %v4256_v31, %v1819_v17  ;;  %v2069_v20 = vpop.xlane.xlu0 %2068  ;;  %v2238_v23 = vmul.f32 %v3309_v28, %v4581_v2  ;;  %v4583_v31 = vld [vmem:[#allocation17_spill] sm:$0xff] }
 0x421   :  { %v4444_v60 = vpop.eup %3310  ;;  %3322 = vpow2.f32 %v2008_v16 }
 0x422   :  { %v3313_v36 = vpop.eup %3312  ;;  %v2010_v38 = vmul.f32 1.442695, %v1893_v3  ;;  %2130 = vadd.xlane.f32.xlu1 %v4444_v60  ;;  %3324 = vrcp.f32 %v2069_v20 }
 0x423   :  { %v3315_v24 = vpop.eup %3314  ;;  %v2239_v55 = vmul.f32 %v3313_v36, %v4582_v13  ;;  %v2071_v1 = vpop.xlane.xlu1 %2070  ;;  %v4585_v13 = vld [vmem:[#allocation19_spill] sm:$0xff] }
 0x424   :  { %3326 = vpow2.f32 %v2010_v38  ;;  %v2065_v37 = vpop.xlane.xlu0 %2064  ;;  %v2236_v11 = vmul.f32 %v3315_v24, %v4583_v31 }
 0x425   :  { %v3317_v58 = vpop.eup %3316  ;;  %v2835_v7 = vpack.c.bf16 %v2239_v55, %v2238_v23  ;;  %3328 = vrcp.f32 %v2071_v1  ;;  %v4586_v1 = vld [vmem:[#allocation20_spill] sm:$0xff] }
 0x426   :  { %v2237_v22 = vmul.f32 %v3317_v58, %v4584_v19  ;;  %3330 = vrcp.f32 %v2065_v37 }
 0x427   :  { %2963 = vst [vmem:[#allocation10 + $0x38] sm:$0xff] %v2835_v7   ;;  %v2067_v8 = vpop.xlane.xlu1 %2066 }
 0x428   :  { %v2830_v32 = vpack.c.bf16 %v2237_v22, %v2236_v11  ;;  %3332 = vrcp.f32 %v2067_v8  ;;  %v1829_v54 = vpop.xlane.xlu0 %1828  ;;  %v4587_v11 = vld [vmem:[#allocation21_spill] sm:$0xff] }
 0x429   :  { %v1898_v15 = vsub.f32 %v4272_v26, %v1829_v54 }
 0x42a   :  { %v4452_v42 = vpop.eup %3318  ;;  %2962 = vst [vmem:[#allocation10 + $0x30] sm:$0xff] %v2830_v32  }
 0x42b   :  { %v2020_v18 = vmul.f32 1.442695, %v1898_v15  ;;  %2140 = vadd.xlane.f32.xlu0 %v4452_v42  ;;  %v1831_v14 = vpop.xlane.xlu1 %1830 }
 0x42c   :  { %v1899_v40 = vsub.f32 %v4278_v4, %v1831_v14  ;;  %v1825_v16 = vpop.xlane.xlu0 %1824 }
 0x42d   :  { %v4456_v17 = vpop.eup %3320  ;;  %3334 = vpow2.f32 %v2020_v18  ;;  %v1896_v28 = vsub.f32 %v4282_v51, %v1825_v16 }
 0x42e   :  { %v4459_v3 = vpop.eup %3322  ;;  %v2022_v20 = vmul.f32 1.442695, %v1899_v40  ;;  %2142 = vadd.xlane.f32.xlu1 %v4456_v17 }
 0x42f   :  { %v2016_v26 = vmul.f32 1.442695, %v1896_v28  ;;  %2136 = vadd.xlane.f32.xlu0 %v4459_v3  ;;  %v1827_v36 = vpop.xlane.xlu1 %1826  ;;  %v3325_v38 = vpop.eup %3324 }
 0x430   :  { %3336 = vpow2.f32 %v2022_v20  ;;  %v1897_v24 = vsub.f32 %v4288_v50, %v1827_v36  ;;  %v2242_v55 = vmul.f32 %v3325_v38, %v4585_v13 }
 0x431   :  { %v4464_v4 = vpop.eup %3326  ;;  %3338 = vpow2.f32 %v2016_v26 }
 0x432   :  { %v3329_v2 = vpop.eup %3328  ;;  %v2018_v23 = vmul.f32 1.442695, %v1897_v24  ;;  %2138 = vadd.xlane.f32.xlu1 %v4464_v4 }
 0x433   :  { %v3331_v51 = vpop.eup %3330  ;;  %v2243_v37 = vmul.f32 %v3329_v2, %v4586_v1  ;;  %v1837_v58 = vpop.xlane.xlu0 %1836 }
 0x434   :  { %3340 = vpow2.f32 %v2018_v23  ;;  %v2240_v19 = vmul.f32 %v3331_v51, %v4587_v11  ;;  %v1902_v22 = vsub.f32 %v4293_v41, %v1837_v58 }
 0x435   :  { %v3333_v7 = vpop.eup %3332  ;;  %v2845_v31 = vpack.c.bf16 %v2243_v37, %v2242_v55 }
 0x436   :  { %v2241_v50 = vmul.f32 %v3333_v7, %v4269_v27  ;;  %v2028_v14 = vmul.f32 1.442695, %v1902_v22 }
 0x437   :  { %2965 = vst [vmem:[#allocation10 + $0x48] sm:$0xff] %v2845_v31   ;;  %v1839_v8 = vpop.xlane.xlu1 %1838  ;;  %v1833_v32 = vpop.xlane.xlu0 %1832 }
 0x438   :  { %v2840_v54 = vpack.c.bf16 %v2241_v50, %v2240_v19  ;;  %v1900_v15 = vsub.f32 %v4299_v34, %v1833_v32  ;;  %v1903_v16 = vsub.f32 %v4302_v44, %v1839_v8 }
 0x43a   :  { %v4473_v18 = vpop.eup %3334  ;;  %2964 = vst [vmem:[#allocation10 + $0x40] sm:$0xff] %v2840_v54   ;;  %v2024_v40 = vmul.f32 1.442695, %v1900_v15  ;;  %v2030_v36 = vmul.f32 1.442695, %v1903_v16 }
 0x43b   :  { %2148 = vadd.xlane.f32.xlu0 %v4473_v18  ;;  %v1835_v28 = vpop.xlane.xlu1 %1834  ;;  %v2073_v20 = vpop.xlane.xlu0 %2072 }
 0x43c   :  { %v1901_v27 = vsub.f32 %v4308_v29, %v1835_v28  ;;  %3342 = vpow2.f32 %v2024_v40 }
 0x43d   :  { %v4478_v41 = vpop.eup %3336  ;;  %3344 = vpow2.f32 %v2028_v14 }
 0x43e   :  { %v4480_v26 = vpop.eup %3338  ;;  %v2026_v34 = vmul.f32 1.442695, %v1901_v27  ;;  %2150 = vadd.xlane.f32.xlu1 %v4478_v41  ;;  %3346 = vrcp.f32 %v2073_v20 }
 0x43f   :  { %2144 = vadd.xlane.f32.xlu0 %v4480_v26  ;;  %v2075_v44 = vpop.xlane.xlu1 %2074  ;;  %v2077_v38 = vpop.xlane.xlu0 %2076 }
 0x440   :  { %3348 = vpow2.f32 %v2026_v34 }
 0x441   :  { %v4484_v24 = vpop.eup %3340  ;;  %3350 = vrcp.f32 %v2075_v44  ;;  %v4588_v44 = vld [vmem:[#allocation22_spill] sm:$0xff] }
 0x442   :  { %3352 = vrcp.f32 %v2077_v38  ;;  %2146 = vadd.xlane.f32.xlu1 %v4484_v24 }
 0x443   :  { %3354 = vpow2.f32 %v2030_v36  ;;  %v2079_v29 = vpop.xlane.xlu1 %2078  ;;  %v2085_v2 = vpop.xlane.xlu0 %2084 }
 0x444   :  { %3356 = vrcp.f32 %v2079_v29 }
 0x445   :  { %3358 = vrcp.f32 %v2085_v2 }
 0x447   :  { %v2087_v23 = vpop.xlane.xlu1 %2086  ;;  %v2081_v51 = vpop.xlane.xlu0 %2080 }
 0x448   :  { %3360 = vrcp.f32 %v2087_v23 }
 0x449   :  { %v4487_v13 = vpop.eup %3342  ;;  %3362 = vrcp.f32 %v2081_v51 }
 0x44a   :  { %v4489_v55 = vpop.eup %3344  ;;  %2152 = vadd.xlane.f32.xlu0 %v4487_v13 }
 0x44b   :  { %v2083_v1 = vpop.xlane.xlu1 %2082  ;;  %v3347_v37 = vpop.eup %3346 }
 0x44c   :  { %3364 = vrcp.f32 %v2083_v1  ;;  %v2244_v11 = vmul.f32 %v3347_v37, %v4310_v62 }
 0x44d   :  { %v4492_v58 = vpop.eup %3348 }
 0x44e   :  { %v3351_v7 = vpop.eup %3350  ;;  %2154 = vadd.xlane.f32.xlu1 %v4492_v58  ;;  %2156 = vadd.xlane.f32.xlu0 %v4489_v55 }
 0x44f   :  { %v3353_v31 = vpop.eup %3352  ;;  %v2245_v19 = vmul.f32 %v3351_v7, %v4317_v63  ;;  %v2093_v50 = vpop.xlane.xlu0 %2092 }
 0x450   :  { %v4498_v22 = vpop.eup %3354  ;;  %v2246_v54 = vmul.f32 %v3353_v31, %v4314_v9  ;;  %3366 = vrcp.f32 %v2093_v50 }
 0x451   :  { %v3357_v8 = vpop.eup %3356  ;;  %v2850_v32 = vpack.c.bf16 %v2245_v19, %v2244_v11 }
 0x452   :  { %v2247_v15 = vmul.f32 %v3357_v8, %v4321_v56  ;;  %2158 = vadd.xlane.f32.xlu1 %v4498_v22  ;;  %v3359_v14 = vpop.eup %3358 }
 0x453   :  { %2966 = vst [vmem:[#allocation10 + $0x50] sm:$0xff] %v2850_v32   ;;  %v2095_v40 = vpop.xlane.xlu1 %2094  ;;  %v2250_v28 = vmul.f32 %v3359_v14, %v4323_v39 }
 0x454   :  { %v2855_v62 = vpack.c.bf16 %v2247_v15, %v2246_v54  ;;  %3368 = vrcp.f32 %v2095_v40  ;;  %v2089_v63 = vpop.xlane.xlu0 %2088 }
 0x455   :  { %v3361_v16 = vpop.eup %3360  ;;  %3370 = vrcp.f32 %v2089_v63 }
 0x456   :  { %2967 = vst [vmem:[#allocation10 + $0x58] sm:$0xff] %v2855_v62   ;;  %v2251_v20 = vmul.f32 %v3361_v16, %v4329_v6  ;;  %v3363_v27 = vpop.eup %3362 }
 0x457   :  { %v2091_v9 = vpop.xlane.xlu1 %2090  ;;  %v2248_v36 = vmul.f32 %v3363_v27, %v4332_v10 }
 0x458   :  { %v2865_v34 = vpack.c.bf16 %v2251_v20, %v2250_v28  ;;  %3372 = vrcp.f32 %v2091_v9 }
 0x459   :  { %v3365_v56 = vpop.eup %3364 }
 0x45a   :  { %2969 = vst [vmem:[#allocation10 + $0x68] sm:$0xff] %v2865_v34   ;;  %v2249_v38 = vmul.f32 %v3365_v56, %v4588_v44  ;;  %v4590_v34 = vld [vmem:[#allocation24_spill] sm:$0xff] }
 0x45c   :  { %v2860_v29 = vpack.c.bf16 %v2249_v38, %v2248_v36 }
 0x45d   :  { %v3367_v2 = vpop.eup %3366 }
 0x45e   :  { %2968 = vst [vmem:[#allocation10 + $0x60] sm:$0xff] %v2860_v29   ;;  %v2254_v39 = vmul.f32 %v3367_v2, %v4340_v45  ;;  %v4591_v2 = vld [vmem:[#allocation25_spill] sm:$0xff] }
 0x45f   :  { %v2101_v23 = vpop.xlane.xlu0 %2100 }
 0x460   :  { %3374 = vrcp.f32 %v2101_v23  ;;  %v4592_v23 = vld [vmem:[#allocation26_spill] sm:$0xff] }
 0x461   :  { %v3369_v51 = vpop.eup %3368 }
 0x462   :  { %v2255_v6 = vmul.f32 %v3369_v51, %v4345_v43  ;;  %v3371_v1 = vpop.eup %3370 }
 0x463   :  { %v2103_v37 = vpop.xlane.xlu1 %2102  ;;  %v2252_v10 = vmul.f32 %v3371_v1, %v4347_v21 }
 0x464   :  { %v2875_v7 = vpack.c.bf16 %v2255_v6, %v2254_v39  ;;  %3376 = vrcp.f32 %v2103_v37  ;;  %v2097_v31 = vpop.xlane.xlu0 %2096 }
 0x465   :  { %v3373_v11 = vpop.eup %3372  ;;  %3378 = vrcp.f32 %v2097_v31 }
 0x466   :  { %2971 = vst [vmem:[#allocation10 + $0x78] sm:$0xff] %v2875_v7   ;;  %v2253_v19 = vmul.f32 %v3373_v11, %v4352_v47 }
 0x467   :  { %v2099_v50 = vpop.xlane.xlu1 %2098 }
 0x468   :  { %v2870_v8 = vpack.c.bf16 %v2253_v19, %v2252_v10  ;;  %3380 = vrcp.f32 %v2099_v50 }
 0x46a   :  { %2970 = vst [vmem:[#allocation10 + $0x70] sm:$0xff] %v2870_v8  }
 0x46d   :  { %v3375_v45 = vpop.eup %3374 }
 0x46e   :  { %v2258_v54 = vmul.f32 %v3375_v45, %v4356_v0 }
 0x46f   :  { %v2109_v32 = vpop.xlane.xlu0 %2108 }
 0x470   :  { %3382 = vrcp.f32 %v2109_v32 }
 0x471   :  { %v3377_v43 = vpop.eup %3376 }
 0x472   :  { %v2259_v15 = vmul.f32 %v3377_v43, %v4361_v61  ;;  %v3379_v14 = vpop.eup %3378  ;;  %v4589_v61 = vld [vmem:[#allocation23_spill] sm:$0xff] }
 0x473   :  { %v2111_v40 = vpop.xlane.xlu1 %2110  ;;  %v2256_v47 = vmul.f32 %v3379_v14, %v4363_v48 }
 0x474   :  { %v2885_v62 = vpack.c.bf16 %v2259_v15, %v2258_v54  ;;  %3384 = vrcp.f32 %v2111_v40  ;;  %v2105_v21 = vpop.xlane.xlu0 %2104 }
 0x475   :  { %v3381_v63 = vpop.eup %3380  ;;  %3386 = vrcp.f32 %v2105_v21 }
 0x476   :  { %2973 = vst [vmem:[#allocation10 + $0x88] sm:$0xff] %v2885_v62   ;;  %v2257_v16 = vmul.f32 %v3381_v63, %v4368_v12 }
 0x477   :  { %v2107_v28 = vpop.xlane.xlu1 %2106 }
 0x478   :  { %v2880_v20 = vpack.c.bf16 %v2257_v16, %v2256_v47  ;;  %3388 = vrcp.f32 %v2107_v28 }
 0x47a   :  { %2972 = vst [vmem:[#allocation10 + $0x80] sm:$0xff] %v2880_v20  }
 0x47d   :  { %v3383_v0 = vpop.eup %3382 }
 0x47e   :  { %v2262_v9 = vmul.f32 %v3383_v0, %v4589_v61 }
 0x481   :  { %v3385_v27 = vpop.eup %3384 }
 0x482   :  { %v2263_v56 = vmul.f32 %v3385_v27, %v4590_v34  ;;  %v3387_v36 = vpop.eup %3386 }
 0x483   :  { %v2117_v44 = vpop.xlane.xlu0 %2116  ;;  %v2260_v48 = vmul.f32 %v3387_v36, %v4591_v2 }
 0x484   :  { %v2895_v38 = vpack.c.bf16 %v2263_v56, %v2262_v9  ;;  %3390 = vrcp.f32 %v2117_v44 }
 0x485   :  { %v3389_v29 = vpop.eup %3388 }
 0x486   :  { %2975 = vst [vmem:[#allocation10 + $0x98] sm:$0xff] %v2895_v38   ;;  %v2261_v12 = vmul.f32 %v3389_v29, %v4592_v23 }
 0x487   :  { %v2119_v51 = vpop.xlane.xlu1 %2118 }
 0x488   :  { %v2890_v39 = vpack.c.bf16 %v2261_v12, %v2260_v48  ;;  %3392 = vrcp.f32 %v2119_v51  ;;  %v2113_v6 = vpop.xlane.xlu0 %2112 }
 0x489   :  { %3394 = vrcp.f32 %v2113_v6 }
 0x48a   :  { %2974 = vst [vmem:[#allocation10 + $0x90] sm:$0xff] %v2890_v39  }
 0x48b   :  { %v2115_v1 = vpop.xlane.xlu1 %2114 }
 0x48c   :  { %3396 = vrcp.f32 %v2115_v1 }
 0x491   :  { %v3391_v37 = vpop.eup %3390 }
 0x492   :  { %v2266_v11 = vmul.f32 %v3391_v37, %v4391_v59 }
 0x494   :  { %v2125_v7 = vpop.xlane.xlu0 %2124 }
 0x495   :  { %v3393_v31 = vpop.eup %3392  ;;  %3398 = vrcp.f32 %v2125_v7 }
 0x496   :  { %v2267_v10 = vmul.f32 %v3393_v31, %v4396_v33  ;;  %v3395_v19 = vpop.eup %3394 }
 0x497   :  { %v2127_v50 = vpop.xlane.xlu1 %2126  ;;  %v2264_v43 = vmul.f32 %v3395_v19, %v4399_v25 }
 0x498   :  { %v2905_v8 = vpack.c.bf16 %v2267_v10, %v2266_v11  ;;  %3400 = vrcp.f32 %v2127_v50  ;;  %v2121_v45 = vpop.xlane.xlu0 %2120 }
 0x499   :  { %v3397_v32 = vpop.eup %3396  ;;  %3402 = vrcp.f32 %v2121_v45 }
 0x49a   :  { %2977 = vst [vmem:[#allocation10 + $0xa8] sm:$0xff] %v2905_v8   ;;  %v2265_v54 = vmul.f32 %v3397_v32, %v4404_v52 }
 0x49b   :  { %v2123_v15 = vpop.xlane.xlu1 %2122 }
 0x49c   :  { %v2900_v14 = vpack.c.bf16 %v2265_v54, %v2264_v43  ;;  %3404 = vrcp.f32 %v2123_v15 }
 0x49e   :  { %2976 = vst [vmem:[#allocation10 + $0xa0] sm:$0xff] %v2900_v14  }
 0x4a2   :  { %v3399_v59 = vpop.eup %3398 }
 0x4a3   :  { %v2270_v62 = vmul.f32 %v3399_v59, %v4412_v5 }
 0x4a4   :  { %v2133_v40 = vpop.xlane.xlu0 %2132 }
 0x4a5   :  { %v3401_v33 = vpop.eup %3400  ;;  %3406 = vrcp.f32 %v2133_v40 }
 0x4a6   :  { %v2271_v21 = vmul.f32 %v3401_v33, %v4416_v49  ;;  %v3403_v63 = vpop.eup %3402 }
 0x4a7   :  { %v2135_v47 = vpop.xlane.xlu1 %2134  ;;  %v2268_v52 = vmul.f32 %v3403_v63, %v4419_v30 }
 0x4a8   :  { %v2915_v16 = vpack.c.bf16 %v2271_v21, %v2270_v62  ;;  %3408 = vrcp.f32 %v2135_v47  ;;  %v2129_v25 = vpop.xlane.xlu0 %2128 }
 0x4a9   :  { %v3405_v28 = vpop.eup %3404  ;;  %3410 = vrcp.f32 %v2129_v25 }
 0x4aa   :  { %2979 = vst [vmem:[#allocation10 + $0xb8] sm:$0xff] %v2915_v16   ;;  %v2269_v20 = vmul.f32 %v3405_v28, %v4424_v35 }
 0x4ab   :  { %v2131_v0 = vpop.xlane.xlu1 %2130 }
 0x4ac   :  { %v2910_v27 = vpack.c.bf16 %v2269_v20, %v2268_v52  ;;  %3412 = vrcp.f32 %v2131_v0 }
 0x4ae   :  { %2978 = vst [vmem:[#allocation10 + $0xb0] sm:$0xff] %v2910_v27  }
 0x4b2   :  { %v3407_v5 = vpop.eup %3406 }
 0x4b3   :  { %v2274_v9 = vmul.f32 %v3407_v5, %v4432_v57 }
 0x4b4   :  { %v2141_v61 = vpop.xlane.xlu0 %2140 }
 0x4b5   :  { %v3409_v49 = vpop.eup %3408  ;;  %3414 = vrcp.f32 %v2141_v61 }
 0x4b6   :  { %v2275_v34 = vmul.f32 %v3409_v49, %v4436_v46  ;;  %v3411_v56 = vpop.eup %3410 }
 0x4b7   :  { %v2143_v36 = vpop.xlane.xlu1 %2142  ;;  %v2272_v35 = vmul.f32 %v3411_v56, %v4439_v53 }
 0x4b8   :  { %v2925_v44 = vpack.c.bf16 %v2275_v34, %v2274_v9  ;;  %3416 = vrcp.f32 %v2143_v36  ;;  %v2137_v30 = vpop.xlane.xlu0 %2136 }
 0x4b9   :  { %v3413_v38 = vpop.eup %3412  ;;  %3418 = vrcp.f32 %v2137_v30 }
 0x4ba   :  { %2981 = vst [vmem:[#allocation10 + $0xc8] sm:$0xff] %v2925_v44   ;;  %v2273_v29 = vmul.f32 %v3413_v38, %v4444_v60 }
 0x4bb   :  { %v2139_v2 = vpop.xlane.xlu1 %2138 }
 0x4bc   :  { %v2920_v48 = vpack.c.bf16 %v2273_v29, %v2272_v35  ;;  %3420 = vrcp.f32 %v2139_v2 }
 0x4be   :  { %2980 = vst [vmem:[#allocation10 + $0xc0] sm:$0xff] %v2920_v48  }
 0x4c2   :  { %v3415_v57 = vpop.eup %3414 }
 0x4c3   :  { %v2278_v12 = vmul.f32 %v3415_v57, %v4452_v42 }
 0x4c4   :  { %v2149_v23 = vpop.xlane.xlu0 %2148 }
 0x4c5   :  { %v3417_v46 = vpop.eup %3416  ;;  %3422 = vrcp.f32 %v2149_v23 }
 0x4c6   :  { %v2279_v51 = vmul.f32 %v3417_v46, %v4456_v17  ;;  %v3419_v39 = vpop.eup %3418 }
 0x4c7   :  { %v2151_v6 = vpop.xlane.xlu1 %2150  ;;  %v2276_v60 = vmul.f32 %v3419_v39, %v4459_v3 }
 0x4c8   :  { %v2935_v1 = vpack.c.bf16 %v2279_v51, %v2278_v12  ;;  %3424 = vrcp.f32 %v2151_v6  ;;  %v2145_v53 = vpop.xlane.xlu0 %2144 }
 0x4c9   :  { %v3421_v37 = vpop.eup %3420  ;;  %3426 = vrcp.f32 %v2145_v53 }
 0x4ca   :  { %2983 = vst [vmem:[#allocation10 + $0xd8] sm:$0xff] %v2935_v1   ;;  %v2277_v7 = vmul.f32 %v3421_v37, %v4464_v4 }
 0x4cb   :  { %v2147_v31 = vpop.xlane.xlu1 %2146 }
 0x4cc   :  { %v2930_v11 = vpack.c.bf16 %v2277_v7, %v2276_v60  ;;  %3428 = vrcp.f32 %v2147_v31 }
 0x4ce   :  { %2982 = vst [vmem:[#allocation10 + $0xd0] sm:$0xff] %v2930_v11  }
 0x4d2   :  { %v3423_v42 = vpop.eup %3422 }
 0x4d3   :  { %v2153_v10 = vpop.xlane.xlu0 %2152  ;;  %v2282_v19 = vmul.f32 %v3423_v42, %v4473_v18 }
 0x4d4   :  { %3430 = vrcp.f32 %v2153_v10 }
 0x4d5   :  { %v3425_v17 = vpop.eup %3424 }
 0x4d6   :  { %v2283_v50 = vmul.f32 %v3425_v17, %v4478_v41  ;;  %v3427_v8 = vpop.eup %3426 }
 0x4d7   :  { %v2155_v45 = vpop.xlane.xlu1 %2154  ;;  %v2157_v3 = vpop.xlane.xlu0 %2156  ;;  %v2280_v4 = vmul.f32 %v3427_v8, %v4480_v26 }
 0x4d8   :  { %v2945_v32 = vpack.c.bf16 %v2283_v50, %v2282_v19  ;;  %3432 = vrcp.f32 %v2155_v45 }
 0x4d9   :  { %v3429_v43 = vpop.eup %3428  ;;  %3434 = vrcp.f32 %v2157_v3 }
 0x4da   :  { %2985 = vst [vmem:[#allocation10 + $0xe8] sm:$0xff] %v2945_v32   ;;  %v2281_v54 = vmul.f32 %v3429_v43, %v4484_v24 }
 0x4db   :  { %v2159_v15 = vpop.xlane.xlu1 %2158 }
 0x4dc   :  { %v2940_v14 = vpack.c.bf16 %v2281_v54, %v2280_v4  ;;  %3436 = vrcp.f32 %v2159_v15 }
 0x4de   :  { %2984 = vst [vmem:[#allocation10 + $0xe0] sm:$0xff] %v2940_v14  }
 0x4e1   :  { %v3431_v18 = vpop.eup %3430 }
 0x4e2   :  { %v2284_v41 = vmul.f32 %v3431_v18, %v4487_v13 }
 0x4e5   :  { %v3433_v59 = vpop.eup %3432 }
 0x4e6   :  { %v2285_v40 = vmul.f32 %v3433_v59, %v4492_v58  ;;  %v3435_v33 = vpop.eup %3434 }
 0x4e7   :  { %v2286_v26 = vmul.f32 %v3435_v33, %v4489_v55 }
 0x4e8   :  { %v2950_v62 = vpack.c.bf16 %v2285_v40, %v2284_v41 }
 0x4e9   :  { %v3437_v21 = vpop.eup %3436 }
 0x4ea   :  { %2986 = vst [vmem:[#allocation10 + $0xf0] sm:$0xff] %v2950_v62   ;;  %v2287_v24 = vmul.f32 %v3437_v21, %v4498_v22 }
 0x4ec   :  { %v2955_v63 = vpack.c.bf16 %v2287_v24, %v2286_v26 }
 0x4ee   :  { %2987 = vst [vmem:[#allocation10 + $0xf8] sm:$0xff] %v2955_v63  }
 0x4ef   :  { %3529 = shalt.err (!%p3526_p10)
}
 0x4f0   :  { %2619 = dma.vmem_to_hbm [thread:$0]  %s2614_s25, 4096, %s4556_s7, [#allocation4], %s3551_s1, %s3551_s1, %s3552_s16  }
 0x4f1   :  { %3544 = dma.done.wait [#allocation4], 4096  }
 0x4f2   :  { %3545 = vsyncadd [#allocation4], 4294963200 }
 0x4f3   :  { %2623 = vsyncpa [#allocation3], 1 }
 0x4f4   :  { %2624 = vsyncpa [#allocation6], 1 }
 0x4f5   :  { %2625 = vsyncpa [#allocation9], 1 }
 0x4f6   :  { %2626 = vsyncpa [#allocation4], 1 }

// kernel: tpu_custom_call.1
= control target key start
LH: loop header
LB: loop body
LE: loop exit
PB: predicated region body
PF: predicated region fallthrough
CT: control target
= control target key end

     0   :  { %12 = vsyncpa [#allocation3], 0  ;;  %s4549_s0 = inlined_call_operand.hbm [shape: f32[512,128], index: 0, kind: input, shape index: {}]   ;;  %s4550_s1 = inlined_call_operand.hbm [shape: bf16[128,256], index: 1, kind: input, shape index: {}]   ;;  %s4551_s2 = inlined_call_operand.vmem [shape: f32[1,256], index: 2, kind: input, shape index: {}]   ;;  %s4552_s3 = inlined_call_operand.hbm [shape: bf16[256,128], index: 3, kind: input, shape index: {}]   ;;  %s4553_s4 = inlined_call_operand.vmem [shape: f32[1,128], index: 4, kind: input, shape index: {}]   ;;  %s4554_s5 = inlined_call_operand.hbm [shape: bf16[128,128], index: 5, kind: input, shape index: {}]   ;;  %s4555_s6 = inlined_call_operand.vmem [shape: f32[1,128], index: 6, kind: input, shape index: {}]   ;;  %s4556_s7 = inlined_call_operand.hbm [shape: bf16[512,128], index: 7, kind: output, shape index: {}]  }
   0x1   :  { %13 = vsyncpa [#allocation6], 0 }
   0x2   :  { %14 = vsyncpa [#allocation9], 0 }
   0x3   :  { %15 = vsyncpa [#allocation4], 0  ;;  %s3546_s24 = smov [#allocation5]   ;;  %s3547_s26 = smov [#allocation2]  }
   0x4   :  { %s33_s25 = sshll.u32 %s3546_s24, 4  ;;  %s21_s27 = sshll.u32 %s3547_s26, 4  ;;  %s34_s25 = int_to_ptr.vmem [resolvable:$true] %s33_s25  ;;  %s22_s27 = int_to_ptr.vmem [resolvable:$true] %s21_s27 }
   0x5   :  { %s3446_s28 = scalar_lea.vmem %s34_s25, 2048  ;;  %p3451_p1 = scmp.lt.s32.totalorder %s34_s25, %s34_s25 }
   0x6   :  { %p3447_p0 = scmp.ne.s32.totalorder %s34_s25, %s3446_s28  ;;  %p3452_p2 = scmp.lt.s32.totalorder %s3446_s28, %s3446_s28 }
   0x8   :  { %p3453_p3 = por %p3452_p2, %p3451_p1 }
   0xa   :  { %p3454_p4 = pnand %p3453_p3, %p3447_p0 }
   0xc   :  { %3457 = shalt.err (!%p3454_p4)
}
   0xd   :  { %s3548_s29 = smov 128   ;;  %s3549_s30 = smov 8  }
   0xe   :  { %39 = dma.hbm_to_vmem [thread:$0]  %s4550_s1, 2048, %s34_s25, [#allocation6], %s3548_s29, %s3548_s29, %s3549_s30  }
   0xf   :  { %s3466_s10 = scalar_lea.vmem %s22_s27, 8192  ;;  %p3471_p6 = scmp.lt.s32.totalorder %s22_s27, %s22_s27 }
  0x10   :  { %p3467_p5 = scmp.ne.s32.totalorder %s22_s27, %s3466_s10  ;;  %p3472_p7 = scmp.lt.s32.totalorder %s3466_s10, %s3466_s10 }
  0x12   :  { %p3473_p8 = por %p3472_p7, %p3471_p6 }
  0x14   :  { %p3474_p9 = pnand %p3473_p8, %p3467_p5 }
  0x16   :  { %3477 = shalt.err (!%p3474_p9)
}
  0x17   :  { %27 = dma.hbm_to_vmem [thread:$0]  %s4549_s0, 8192, %s22_s27, [#allocation3], %s3548_s29, %s3548_s29, %s3549_s30  }
  0x18   :  { %s3550_s13 = smov [#allocation7]  }
  0x19   :  { %s47_s14 = sshll.u32 %s3550_s13, 4  ;;  %s48_s14 = int_to_ptr.vmem [resolvable:$true] %s47_s14 }
  0x1a   :  { %s3486_s15 = scalar_lea.vmem %s48_s14, 2048  ;;  %p3491_p11 = scmp.lt.s32.totalorder %s48_s14, %s48_s14 }
  0x1b   :  { %p3487_p10 = scmp.ne.s32.totalorder %s48_s14, %s3486_s15  ;;  %p3492_p12 = scmp.lt.s32.totalorder %s3486_s15, %s3486_s15 }
  0x1d   :  { %p3493_p13 = por %p3492_p12, %p3491_p11 }
  0x1f   :  { %p3494_p0 = pnand %p3493_p13, %p3487_p10 }
  0x21   :  { %3497 = shalt.err (!%p3494_p0)
}
  0x22   :  { %s3551_s1 = smov 64   ;;  %s3552_s16 = smov 4  }
  0x23   :  { %53 = dma.hbm_to_vmem [thread:$0]  %s4552_s3, 2048, %s48_s14, [#allocation6], %s3551_s1, %s3551_s1, %s3552_s16  }
  0x24   :  { %s3553_s0 = smov [#allocation8]  }
  0x25   :  { %s61_s19 = sshll.u32 %s3553_s0, 4  ;;  %s62_s19 = int_to_ptr.vmem [resolvable:$true] %s61_s19 }
  0x26   :  { %s3506_s20 = scalar_lea.vmem %s62_s19, 1024  ;;  %p3511_p2 = scmp.lt.s32.totalorder %s62_s19, %s62_s19 }
  0x27   :  { %p3507_p1 = scmp.ne.s32.totalorder %s62_s19, %s3506_s20  ;;  %p3512_p3 = scmp.lt.s32.totalorder %s3506_s20, %s3506_s20 }
  0x29   :  { %p3513_p4 = por %p3512_p3, %p3511_p2 }
  0x2b   :  { %p3514_p5 = pnand %p3513_p4, %p3507_p1 }
  0x2d   :  { %3517 = shalt.err (!%p3514_p5)
}
  0x2e   :  { %67 = dma.hbm_to_vmem [thread:$0]  %s4554_s5, 1024, %s62_s19, [#allocation9], %s3551_s1, %s3551_s1, %s3552_s16  }
  0x2f   :  { %3538 = dma.done.wait [#allocation3], 8192  }
  0x30   :  { %3539 = vsyncadd [#allocation3], 4294959104 }
  0x31   :  { %3540 = dma.done.wait [#allocation6], 4096  }
  0x32   :  { %3541 = vsyncadd [#allocation6], 4294963200 }
  0x33   :  { %3542 = dma.done.wait [#allocation9], 1024  }
  0x34   :  { %3543 = vsyncadd [#allocation9], 4294966272  ;;  %v3554_v0 = vmov 0   ;;  %v3134_v1 = vld [vmem:[#allocation5 + $0x74] ss:$8 sps:$4 sm:$0xff]   ;;  %v83_v17 = vld [vmem:[#allocation2] sm:$0xff] }
  0x35   :  { %319 = vmatprep.mubr.bf16.mxu0 %v3554_v0  ;;  %559 = vmatprep.mubr.bf16.mxu1 %v3554_v0  ;;  %v3136_v2 = vld [vmem:[#allocation5 + $0x70] ss:$8 sps:$4 sm:$0xff]   ;;  %v3137_v3 = vld [vmem:[#allocation5 + $0x64] ss:$8 sps:$4 sm:$0xff]   ;;  %v3139_v4 = vld [vmem:[#allocation5 + $0x60] ss:$8 sps:$4 sm:$0xff]  }
  0x36   :  { %287 = vmatprep.subr.bf16.mxu0 %v3134_v1  ;;  %3108 = vmatprep.subr.bf16.mxu1 %v3134_v1  ;;  %v3140_v5 = vld [vmem:[#allocation5 + $0x54] ss:$8 sps:$4 sm:$0xff]   ;;  %v3142_v6 = vld [vmem:[#allocation5 + $0x50] ss:$8 sps:$4 sm:$0xff]   ;;  %v3143_v7 = vld [vmem:[#allocation5 + $0x44] ss:$8 sps:$4 sm:$0xff]  }
  0x37   :  { %288 = vmatpush1.bf16.msra.mxu0 %v3136_v2  ;;  %3116 = vmatpush1.bf16.msra.mxu1 %v3136_v2  ;;  %v3145_v8 = vld [vmem:[#allocation5 + $0x40] ss:$8 sps:$4 sm:$0xff]   ;;  %v3146_v9 = vld [vmem:[#allocation5 + $0x34] ss:$8 sps:$4 sm:$0xff]   ;;  %v3148_v10 = vld [vmem:[#allocation5 + $0x30] ss:$8 sps:$4 sm:$0xff]  }
  0x38   :  { %289 = vmatprep.subr.bf16.mxu0 %v3137_v3  ;;  %3109 = vmatprep.subr.bf16.mxu1 %v3137_v3  ;;  %v3149_v11 = vld [vmem:[#allocation5 + $0x24] ss:$8 sps:$4 sm:$0xff]   ;;  %v3151_v12 = vld [vmem:[#allocation5 + $0x20] ss:$8 sps:$4 sm:$0xff]   ;;  %v3152_v13 = vld [vmem:[#allocation5 + $0x14] ss:$8 sps:$4 sm:$0xff]  }
  0x39   :  { %v3154_v14 = vld [vmem:[#allocation5 + $0x10] ss:$8 sps:$4 sm:$0xff]   ;;  %v3155_v15 = vld [vmem:[#allocation5 + $0x4] ss:$8 sps:$4 sm:$0xff]   ;;  %v3157_v16 = vld [vmem:[#allocation5] ss:$8 sps:$4 sm:$0xff]  }
  0x3a   :  { %v84_v18 = vld [vmem:[#allocation2 + $0x8] sm:$0xff]  ;;  %v85_v20 = vld [vmem:[#allocation2 + $0x10] sm:$0xff]  ;;  %v86_v21 = vld [vmem:[#allocation2 + $0x18] sm:$0xff] }
  0x3b   :  { %290 = vmatpush1.bf16.msra.mxu0 %v3139_v4  ;;  %3117 = vmatpush1.bf16.msra.mxu1 %v3139_v4  ;;  %v147_v19 = vpack.c.bf16 %v84_v18, %v83_v17  ;;  %v148_v22 = vpack.c.bf16 %v86_v21, %v85_v20  ;;  %v131_v23 = vld [vmem:[#allocation2 + $0x180] sm:$0xff]  ;;  %v132_v24 = vld [vmem:[#allocation2 + $0x188] sm:$0xff]  ;;  %v3158_v26 = vld [vmem:[#allocation7 + $0x38] sm:$0xff]  }
  0x3c   :  { %291 = vmatprep.subr.bf16.mxu0 %v3140_v5  ;;  %3110 = vmatprep.subr.bf16.mxu1 %v3140_v5  ;;  %v171_v25 = vpack.c.bf16 %v132_v24, %v131_v23  ;;  %v87_v27 = vld [vmem:[#allocation2 + $0x20] sm:$0xff]  ;;  %v88_v28 = vld [vmem:[#allocation2 + $0x28] sm:$0xff]  ;;  %v133_v30 = vld [vmem:[#allocation2 + $0x190] sm:$0xff] }
  0x3d   :  { %v149_v29 = vpack.c.bf16 %v88_v28, %v87_v27  ;;  %v134_v31 = vld [vmem:[#allocation2 + $0x198] sm:$0xff]  ;;  %v3159_v33 = vld [vmem:[#allocation7 + $0x30] sm:$0xff]   ;;  %v3160_v36 = vld [vmem:[#allocation7 + $0x28] sm:$0xff]  }
  0x3e   :  { %v172_v32 = vpack.c.bf16 %v134_v31, %v133_v30  ;;  %v89_v34 = vld [vmem:[#allocation2 + $0x30] sm:$0xff]  ;;  %v90_v35 = vld [vmem:[#allocation2 + $0x38] sm:$0xff]  ;;  %v135_v38 = vld [vmem:[#allocation2 + $0x1a0] sm:$0xff] }
  0x3f   :  { %292 = vmatpush1.bf16.msra.mxu0 %v3142_v6  ;;  %3118 = vmatpush1.bf16.msra.mxu1 %v3142_v6  ;;  %v150_v37 = vpack.c.bf16 %v90_v35, %v89_v34  ;;  %v136_v39 = vld [vmem:[#allocation2 + $0x1a8] sm:$0xff]  ;;  %v3161_v41 = vld [vmem:[#allocation7 + $0x20] sm:$0xff]   ;;  %v3162_v44 = vld [vmem:[#allocation7 + $0x18] sm:$0xff]  }
  0x40   :  { %293 = vmatprep.subr.bf16.mxu0 %v3143_v7  ;;  %3111 = vmatprep.subr.bf16.mxu1 %v3143_v7  ;;  %v173_v40 = vpack.c.bf16 %v136_v39, %v135_v38  ;;  %v91_v42 = vld [vmem:[#allocation2 + $0x40] sm:$0xff]  ;;  %v92_v43 = vld [vmem:[#allocation2 + $0x48] sm:$0xff]  ;;  %v137_v46 = vld [vmem:[#allocation2 + $0x1b0] sm:$0xff] }
  0x41   :  { %v151_v45 = vpack.c.bf16 %v92_v43, %v91_v42  ;;  %v138_v47 = vld [vmem:[#allocation2 + $0x1b8] sm:$0xff]  ;;  %v3163_v49 = vld [vmem:[#allocation7 + $0x10] sm:$0xff]   ;;  %v3164_v52 = vld [vmem:[#allocation7 + $0x8] sm:$0xff]  }
  0x42   :  { %v174_v48 = vpack.c.bf16 %v138_v47, %v137_v46  ;;  %v93_v50 = vld [vmem:[#allocation2 + $0x50] sm:$0xff]  ;;  %v94_v51 = vld [vmem:[#allocation2 + $0x58] sm:$0xff]  ;;  %v139_v54 = vld [vmem:[#allocation2 + $0x1c0] sm:$0xff] }
  0x43   :  { %294 = vmatpush1.bf16.msra.mxu0 %v3145_v8  ;;  %3119 = vmatpush1.bf16.msra.mxu1 %v3145_v8  ;;  %v152_v53 = vpack.c.bf16 %v94_v51, %v93_v50  ;;  %v140_v55 = vld [vmem:[#allocation2 + $0x1c8] sm:$0xff]  ;;  %v3165_v57 = vld [vmem:[#allocation7] sm:$0xff]   ;;  %v3166_v60 = vld [vmem:[#allocation7 + $0x78] sm:$0xff]  }
  0x44   :  { %295 = vmatprep.subr.bf16.mxu0 %v3146_v9  ;;  %3112 = vmatprep.subr.bf16.mxu1 %v3146_v9  ;;  %v175_v56 = vpack.c.bf16 %v140_v55, %v139_v54  ;;  %v95_v58 = vld [vmem:[#allocation2 + $0x60] sm:$0xff]  ;;  %v96_v59 = vld [vmem:[#allocation2 + $0x68] sm:$0xff]  ;;  %v141_v62 = vld [vmem:[#allocation2 + $0x1d0] sm:$0xff] }
  0x45   :  { %v153_v61 = vpack.c.bf16 %v96_v59, %v95_v58  ;;  %v142_v63 = vld [vmem:[#allocation2 + $0x1d8] sm:$0xff]  ;;  %v3167_v2 = vld [vmem:[#allocation7 + $0x70] sm:$0xff]   ;;  %v3168_v5 = vld [vmem:[#allocation7 + $0x68] sm:$0xff]  }
  0x46   :  { %v176_v1 = vpack.c.bf16 %v142_v63, %v141_v62  ;;  %v97_v3 = vld [vmem:[#allocation2 + $0x70] sm:$0xff]  ;;  %v98_v4 = vld [vmem:[#allocation2 + $0x78] sm:$0xff]  ;;  %v143_v7 = vld [vmem:[#allocation2 + $0x1e0] sm:$0xff] }
  0x47   :  { %296 = vmatpush1.bf16.msra.mxu0 %v3148_v10  ;;  %3120 = vmatpush1.bf16.msra.mxu1 %v3148_v10  ;;  %v154_v6 = vpack.c.bf16 %v98_v4, %v97_v3  ;;  %v144_v8 = vld [vmem:[#allocation2 + $0x1e8] sm:$0xff]  ;;  %v3169_v10 = vld [vmem:[#allocation7 + $0x60] sm:$0xff]   ;;  %v101_v18 = vld [vmem:[#allocation2 + $0x90] sm:$0xff] }
  0x48   :  { %297 = vmatprep.subr.bf16.mxu0 %v3149_v11  ;;  %3113 = vmatprep.subr.bf16.mxu1 %v3149_v11  ;;  %v177_v9 = vpack.c.bf16 %v144_v8, %v143_v7  ;;  %v99_v11 = vld [vmem:[#allocation2 + $0x80] sm:$0xff]  ;;  %v3171_v20 = vld [vmem:[#allocation7 + $0x50] sm:$0xff]   ;;  %v104_v24 = vld [vmem:[#allocation2 + $0xa8] sm:$0xff]  ;;  %v197_v7 = vlaneseq }
  0x49   :  { %v103_v23 = vld [vmem:[#allocation2 + $0xa0] sm:$0xff]  ;;  %v105_v27 = vld [vmem:[#allocation2 + $0xb0] sm:$0xff]  ;;  %v106_v28 = vld [vmem:[#allocation2 + $0xb8] sm:$0xff] }
  0x4a   :  { %v107_v30 = vld [vmem:[#allocation2 + $0xc0] sm:$0xff]  ;;  %v108_v31 = vld [vmem:[#allocation2 + $0xc8] sm:$0xff]  ;;  %v110_v34 = vld [vmem:[#allocation2 + $0xd8] sm:$0xff]  ;;  %v198_v8 = vshrl.u32 %v197_v7, 7 }
  0x4b   :  { %298 = vmatpush1.bf16.msra.mxu0 %v3151_v12  ;;  %3121 = vmatpush1.bf16.msra.mxu1 %v3151_v12  ;;  %v100_v12 = vld [vmem:[#allocation2 + $0x88] sm:$0xff]  ;;  %v3174_v38 = vld [vmem:[#allocation8 + $0x38] sm:$0xff]   ;;  %v115_v43 = vld [vmem:[#allocation2 + $0x100] sm:$0xff] }
  0x4c   :  { %299 = vmatprep.subr.bf16.mxu0 %v3152_v13  ;;  %3114 = vmatprep.subr.bf16.mxu1 %v3152_v13  ;;  %v3170_v13 = vld [vmem:[#allocation7 + $0x58] sm:$0xff]   ;;  %v117_v46 = vld [vmem:[#allocation2 + $0x110] sm:$0xff]  ;;  %v119_v50 = vld [vmem:[#allocation2 + $0x120] sm:$0xff] }
  0x4d   :  { %v118_v47 = vld [vmem:[#allocation2 + $0x118] sm:$0xff]  ;;  %v120_v51 = vld [vmem:[#allocation2 + $0x128] sm:$0xff]  ;;  %v127_v63 = vld [vmem:[#allocation2 + $0x160] sm:$0xff] }
  0x4e   :  { %v122_v54 = vld [vmem:[#allocation2 + $0x138] sm:$0xff]  ;;  %v3176_v58 = vld [vmem:[#allocation8 + $0x28] sm:$0xff]   ;;  %v129_v3 = vld [vmem:[#allocation2 + $0x170] sm:$0xff] }
  0x4f   :  { %300 = vmatpush1.bf16.msra.mxu0 %v3154_v14  ;;  %3122 = vmatpush1.bf16.msra.mxu1 %v3154_v14  ;;  %v155_v14 = vpack.c.bf16 %v100_v12, %v99_v11  ;;  %v130_v4 = vld [vmem:[#allocation2 + $0x178] sm:$0xff]  ;;  %v195_v11 = vld [vmem:[%s4551_s2] sm:$0x3] }
  0x50   :  { %301 = vmatprep.subr.bf16.mxu0 %v3155_v15  ;;  %3115 = vmatprep.subr.bf16.mxu1 %v3155_v15  ;;  %v145_v15 = vld [vmem:[#allocation2 + $0x1f0] sm:$0xff] }
  0x53   :  { %302 = vmatpush1.bf16.msra.mxu0 %v3157_v16  ;;  %3123 = vmatpush1.bf16.msra.mxu1 %v3157_v16  ;;  %v146_v16 = vld [vmem:[#allocation2 + $0x1f8] sm:$0xff] }
  0x54   :  { %967 = vmatprep.subr.bf16.mxu1 %v3554_v0  ;;  %v178_v17 = vpack.c.bf16 %v146_v16, %v145_v15  ;;  %3028 = vmatprep.subr.bf16.mxu0 %v3174_v38 }
  0x56   :  { %320 = vmatmul.mubr.bf16.vlgmr.msra.gmra.mxu0 %v147_v19  ;;  %560 = vmatmul.mubr.bf16.vlgmr.msra.gmra.mxu1 %v171_v25  ;;  %v102_v19 = vld [vmem:[#allocation2 + $0x98] sm:$0xff]  ;;  %v3173_v25 = vld [vmem:[#allocation7 + $0x40] sm:$0xff]  }
  0x57   :  { %329 = vmatprep.mubr.bf16.mxu0 %v3554_v0  ;;  %569 = vmatprep.mubr.bf16.mxu1 %v3554_v0  ;;  %v156_v21 = vpack.c.bf16 %v102_v19, %v101_v18 }
  0x58   :  { %968 = vmatpush1.bf16.msra.mxu1 %v3158_v26  ;;  %v157_v26 = vpack.c.bf16 %v104_v24, %v103_v23  ;;  %3029 = vmatpush3.bf16.msra.mxu0 %v3174_v38 }
  0x59   :  { %969 = vmatprep.subr.bf16.mxu1 %v3554_v0 }
  0x5c   :  { %970 = vmatpush1.bf16.msra.mxu1 %v3159_v33  ;;  %v109_v33 = vld [vmem:[#allocation2 + $0xd0] sm:$0xff] }
  0x5d   :  { %971 = vmatprep.subr.bf16.mxu1 %v3554_v0  ;;  %v160_v35 = vpack.c.bf16 %v110_v34, %v109_v33 }
  0x5e   :  { %330 = vmatmul.mubr.bf16.gmra.mxu0 %v148_v22  ;;  %570 = vmatmul.mubr.bf16.gmra.mxu1 %v172_v32  ;;  %v3172_v22 = vld [vmem:[#allocation7 + $0x48] sm:$0xff]   ;;  %v159_v32 = vpack.c.bf16 %v108_v31, %v107_v30 }
  0x5f   :  { %339 = vmatprep.mubr.bf16.mxu0 %v3554_v0  ;;  %579 = vmatprep.mubr.bf16.mxu1 %v3554_v0 }
  0x60   :  { %972 = vmatpush1.bf16.msra.mxu1 %v3160_v36  ;;  %v111_v36 = vld [vmem:[#allocation2 + $0xe0] sm:$0xff] }
  0x61   :  { %973 = vmatprep.subr.bf16.mxu1 %v3554_v0 }
  0x64   :  { %974 = vmatpush1.bf16.msra.mxu1 %v3161_v41  ;;  %v114_v41 = vld [vmem:[#allocation2 + $0xf8] sm:$0xff] }
  0x65   :  { %975 = vmatprep.subr.bf16.mxu1 %v3554_v0 }
  0x66   :  { %340 = vmatmul.mubr.bf16.gmra.mxu0 %v149_v29  ;;  %580 = vmatmul.mubr.bf16.gmra.mxu1 %v173_v40  ;;  %v158_v29 = vpack.c.bf16 %v106_v28, %v105_v27  ;;  %v113_v40 = vld [vmem:[#allocation2 + $0xf0] sm:$0xff] }
  0x67   :  { %349 = vmatprep.mubr.bf16.mxu0 %v3554_v0  ;;  %589 = vmatprep.mubr.bf16.mxu1 %v3554_v0  ;;  %v162_v42 = vpack.c.bf16 %v114_v41, %v113_v40 }
  0x68   :  { %976 = vmatpush1.bf16.msra.mxu1 %v3162_v44  ;;  %v116_v44 = vld [vmem:[#allocation2 + $0x108] sm:$0xff] }
  0x69   :  { %977 = vmatprep.subr.bf16.mxu1 %v3554_v0 }
  0x6c   :  { %978 = vmatpush1.bf16.msra.mxu1 %v3163_v49  ;;  %v164_v49 = vpack.c.bf16 %v118_v47, %v117_v46 }
  0x6d   :  { %979 = vmatprep.subr.bf16.mxu1 %v3554_v0 }
  0x6e   :  { %350 = vmatmul.mubr.bf16.gmra.mxu0 %v150_v37  ;;  %590 = vmatmul.mubr.bf16.gmra.mxu1 %v174_v48  ;;  %v112_v37 = vld [vmem:[#allocation2 + $0xe8] sm:$0xff]  ;;  %v3175_v48 = vld [vmem:[#allocation8 + $0x30] sm:$0xff]  }
  0x6f   :  { %359 = vmatprep.mubr.bf16.mxu0 %v3554_v0  ;;  %599 = vmatprep.mubr.bf16.mxu1 %v3554_v0  ;;  %v161_v39 = vpack.c.bf16 %v112_v37, %v111_v36 }
  0x70   :  { %980 = vmatpush1.bf16.msra.mxu1 %v3164_v52  ;;  %3030 = vmatprep.subr.bf16.mxu0 %v3175_v48  ;;  %v165_v52 = vpack.c.bf16 %v120_v51, %v119_v50 }
  0x71   :  { %981 = vmatprep.subr.bf16.mxu1 %v3554_v0  ;;  %3031 = vmatpush3.bf16.msra.mxu0 %v3175_v48 }
  0x72   :  { %3032 = vmatprep.subr.bf16.mxu0 %v3176_v58 }
  0x74   :  { %982 = vmatpush1.bf16.msra.mxu1 %v3165_v57  ;;  %v124_v57 = vld [vmem:[#allocation2 + $0x148] sm:$0xff] }
  0x75   :  { %983 = vmatprep.subr.bf16.mxu1 %v3554_v0  ;;  %3033 = vmatpush3.bf16.msra.mxu0 %v3176_v58 }
  0x76   :  { %360 = vmatmul.mubr.bf16.gmra.mxu0 %v151_v45  ;;  %600 = vmatmul.mubr.bf16.gmra.mxu1 %v175_v56  ;;  %v163_v45 = vpack.c.bf16 %v116_v44, %v115_v43  ;;  %v123_v56 = vld [vmem:[#allocation2 + $0x140] sm:$0xff] }
  0x77   :  { %369 = vmatprep.mubr.bf16.mxu0 %v3554_v0  ;;  %609 = vmatprep.mubr.bf16.mxu1 %v3554_v0  ;;  %v167_v59 = vpack.c.bf16 %v124_v57, %v123_v56 }
  0x78   :  { %984 = vmatpush2.bf16.msra.mxu1 %v3166_v60  ;;  %v125_v60 = vld [vmem:[#allocation2 + $0x150] sm:$0xff] }
  0x79   :  { %985 = vmatprep.subr.bf16.mxu1 %v3554_v0 }
  0x7c   :  { %986 = vmatpush2.bf16.msra.mxu1 %v3167_v2 }
  0x7d   :  { %987 = vmatprep.subr.bf16.mxu1 %v3554_v0 }
  0x7e   :  { %370 = vmatmul.mubr.bf16.gmra.mxu0 %v152_v53  ;;  %610 = vmatmul.mubr.bf16.gmra.mxu1 %v176_v1  ;;  %v121_v53 = vld [vmem:[#allocation2 + $0x130] sm:$0xff]  ;;  %v128_v1 = vld [vmem:[#allocation2 + $0x168] sm:$0xff] }
  0x7f   :  { %379 = vmatprep.mubr.bf16.mxu0 %v3554_v0  ;;  %619 = vmatprep.mubr.bf16.mxu1 %v3554_v0  ;;  %v166_v55 = vpack.c.bf16 %v122_v54, %v121_v53  ;;  %v169_v2 = vpack.c.bf16 %v128_v1, %v127_v63 }
  0x80   :  { %988 = vmatpush2.bf16.msra.mxu1 %v3168_v5  ;;  %v3177_v5 = vld [vmem:[#allocation8 + $0x20] sm:$0xff]  }
  0x81   :  { %989 = vmatprep.subr.bf16.mxu1 %v3554_v0  ;;  %3034 = vmatprep.subr.bf16.mxu0 %v3177_v5 }
  0x82   :  { %3035 = vmatpush3.bf16.msra.mxu0 %v3177_v5  ;;  %v3179_v5 = vld [vmem:[#allocation8 + $0x10] sm:$0xff]  }
  0x84   :  { %990 = vmatpush2.bf16.msra.mxu1 %v3169_v10  ;;  %v199_v10 = vsub.s32 0, %v198_v8 }
  0x85   :  { %991 = vmatprep.subr.bf16.mxu1 %v3554_v0 }
  0x86   :  { %380 = vmatmul.mubr.bf16.gmra.mxu0 %v153_v61  ;;  %620 = vmatmul.mubr.bf16.gmra.mxu1 %v177_v9  ;;  %v126_v61 = vld [vmem:[#allocation2 + $0x158] sm:$0xff]  ;;  %v203_v9 = vsub.s32 1, %v198_v8 }
  0x87   :  { %389 = vmatprep.mubr.bf16.mxu0 %v3554_v0  ;;  %629 = vmatprep.mubr.bf16.mxu1 %v3554_v0  ;;  %v168_v62 = vpack.c.bf16 %v126_v61, %v125_v60 }
  0x88   :  { %992 = vmatpush2.bf16.msra.mxu1 %v3170_v13  ;;  %v3665_v13 = vrot.slane %v195_v11, %v203_v9 }
  0x89   :  { %993 = vmatprep.subr.bf16.mxu1 %v3554_v0 }
  0x8c   :  { %994 = vmatpush2.bf16.msra.mxu1 %v3171_v20 }
  0x8d   :  { %995 = vmatprep.subr.bf16.mxu1 %v3554_v0 }
  0x8e   :  { %390 = vmatmul.mubr.bf16.gmra.mxu0 %v154_v6  ;;  %630 = vmatmul.mubr.bf16.gmra.mxu1 %v178_v17  ;;  %v170_v6 = vpack.c.bf16 %v130_v4, %v129_v3 }
  0x8f   :  { %399 = vmatprep.mubr.bf16.mxu0 %v3554_v0 }
  0x90   :  { %996 = vmatpush2.bf16.msra.mxu1 %v3172_v22 }
  0x91   :  { %997 = vmatprep.subr.bf16.mxu1 %v3554_v0 }
  0x94   :  { %998 = vmatpush2.bf16.msra.mxu1 %v3173_v25  ;;  %v3178_v25 = vld [vmem:[#allocation8 + $0x18] sm:$0xff]  }
  0x95   :  { %3036 = vmatprep.subr.bf16.mxu0 %v3178_v25 }
  0x96   :  { %400 = vmatmul.mubr.bf16.gmra.mxu0 %v155_v14  ;;  %v3667_v14 = vrot.slane %v195_v11, %v199_v10 }
  0x97   :  { %409 = vmatprep.mubr.bf16.mxu0 %v3554_v0  ;;  %3037 = vmatpush3.bf16.msra.mxu0 %v3178_v25 }
  0x98   :  { %3038 = vmatprep.subr.bf16.mxu0 %v3179_v5 }
  0x9b   :  { %3039 = vmatpush3.bf16.msra.mxu0 %v3179_v5 }
  0x9e   :  { %410 = vmatmul.mubr.bf16.gmra.mxu0 %v156_v21 }
  0x9f   :  { %419 = vmatprep.mubr.bf16.mxu0 %v3554_v0 }
  0xa6   :  { %420 = vmatmul.mubr.bf16.gmra.mxu0 %v157_v26 }
  0xa7   :  { %429 = vmatprep.mubr.bf16.mxu0 %v3554_v0 }
  0xae   :  { %430 = vmatmul.mubr.bf16.gmra.mxu0 %v158_v29 }
  0xaf   :  { %439 = vmatprep.mubr.bf16.mxu0 %v3554_v0 }
  0xb6   :  { %440 = vmatmul.mubr.bf16.gmra.mxu0 %v159_v32 }
  0xb7   :  { %449 = vmatprep.mubr.bf16.mxu0 %v3554_v0 }
  0xbe   :  { %450 = vmatmul.mubr.bf16.gmra.mxu0 %v160_v35 }
  0xbf   :  { %459 = vmatprep.mubr.bf16.mxu0 %v3554_v0 }
  0xc6   :  { %460 = vmatmul.mubr.bf16.gmra.mxu0 %v161_v39 }
  0xc7   :  { %469 = vmatprep.mubr.bf16.mxu0 %v3554_v0 }
  0xce   :  { %470 = vmatmul.mubr.bf16.gmra.mxu0 %v162_v42 }
  0xcf   :  { %479 = vmatprep.mubr.bf16.mxu0 %v3554_v0 }
  0xd6   :  { %480 = vmatmul.mubr.bf16.gmra.mxu0 %v163_v45 }
  0xd7   :  { %489 = vmatprep.mubr.bf16.mxu0 %v3554_v0 }
  0xde   :  { %490 = vmatmul.mubr.bf16.gmra.mxu0 %v164_v49 }
  0xdf   :  { %499 = vmatprep.mubr.bf16.mxu0 %v3554_v0 }
  0xe6   :  { %500 = vmatmul.mubr.bf16.gmra.mxu0 %v165_v52 }
  0xe7   :  { %509 = vmatprep.mubr.bf16.mxu0 %v3554_v0 }
  0xee   :  { %510 = vmatmul.mubr.bf16.gmra.mxu0 %v166_v55 }
  0xef   :  { %519 = vmatprep.mubr.bf16.mxu0 %v3554_v0 }
  0xf6   :  { %520 = vmatmul.mubr.bf16.gmra.mxu0 %v167_v59 }
  0xf7   :  { %529 = vmatprep.mubr.bf16.mxu0 %v3554_v0 }
  0xfe   :  { %530 = vmatmul.mubr.bf16.gmra.mxu0 %v168_v62 }
  0xff   :  { %539 = vmatprep.mubr.bf16.mxu0 %v3554_v0 }
 0x106   :  { %540 = vmatmul.mubr.bf16.gmra.mxu0 %v169_v2 }
 0x107   :  { %549 = vmatprep.mubr.bf16.mxu0 %v3554_v0 }
 0x10e   :  { %550 = vmatmul.mubr.bf16.gmra.mxu0 %v170_v6 }
 0x116   :  { %v321_v12 = vpop.f32.mrf.mxu0 }
 0x117   :  { %v322_v18 = vadd.f32 %v321_v12, %v3667_v14 }
 0x118   :  { %v323_v0 = vpop.f32.mrf.mxu0 }
 0x119   :  { %v324_v16 = vadd.f32 %v323_v0, %v3665_v13  ;;  %v640_v26 = vmax.f32 %v322_v18, 0.0 }
 0x11a   :  { %v325_v15 = vpop.f32.mrf.mxu0 }
 0x11b   :  { %v326_v17 = vadd.f32 %v325_v15, %v3667_v14  ;;  %v641_v23 = vmax.f32 %v324_v16, 0.0 }
 0x11c   :  { %v327_v19 = vpop.f32.mrf.mxu0 }
 0x11d   :  { %v328_v20 = vadd.f32 %v327_v19, %v3665_v13  ;;  %v642_v21 = vmax.f32 %v326_v17, 0.0 }
 0x11e   :  { %v331_v22 = vpop.f32.mrf.mxu0 }
 0x11f   :  { %v643_v24 = vmax.f32 %v328_v20, 0.0  ;;  %v768_v29 = vpack.c.bf16 %v642_v21, %v640_v26  ;;  %v332_v33 = vadd.f32 %v331_v22, %v3667_v14 }
 0x120   :  { %v333_v27 = vpop.f32.mrf.mxu0 }
 0x121   :  { %v769_v28 = vpack.c.bf16 %v643_v24, %v641_v23  ;;  %v334_v31 = vadd.f32 %v333_v27, %v3665_v13  ;;  %v644_v40 = vmax.f32 %v332_v33, 0.0 }
 0x122   :  { %v335_v30 = vpop.f32.mrf.mxu0 }
 0x123   :  { %v336_v32 = vadd.f32 %v335_v30, %v3667_v14  ;;  %999 = vmatprep.mubr.bf16.mxu1 %v769_v28  ;;  %v645_v38 = vmax.f32 %v334_v31, 0.0 }
 0x124   :  { %v337_v34 = vpop.f32.mrf.mxu0  ;;  %1000 = vmatmul.mubr.bf16.vlgmr.msra.gmra.mxu1 %v768_v29 }
 0x125   :  { %v338_v35 = vadd.f32 %v337_v34, %v3665_v13  ;;  %v646_v36 = vmax.f32 %v336_v32, 0.0 }
 0x126   :  { %v341_v37 = vpop.f32.mrf.mxu0 }
 0x127   :  { %v647_v39 = vmax.f32 %v338_v35, 0.0  ;;  %v770_v43 = vpack.c.bf16 %v646_v36, %v644_v40  ;;  %v342_v47 = vadd.f32 %v341_v37, %v3667_v14 }
 0x128   :  { %v343_v41 = vpop.f32.mrf.mxu0 }
 0x129   :  { %v771_v42 = vpack.c.bf16 %v647_v39, %v645_v38  ;;  %v344_v45 = vadd.f32 %v343_v41, %v3665_v13  ;;  %v648_v54 = vmax.f32 %v342_v47, 0.0 }
 0x12a   :  { %v345_v44 = vpop.f32.mrf.mxu0 }
 0x12b   :  { %v346_v46 = vadd.f32 %v345_v44, %v3667_v14  ;;  %1007 = vmatprep.mubr.bf16.mxu1 %v771_v42  ;;  %v649_v52 = vmax.f32 %v344_v45, 0.0 }
 0x12c   :  { %v347_v48 = vpop.f32.mrf.mxu0  ;;  %1008 = vmatmul.mubr.bf16.gmra.mxu1 %v770_v43 }
 0x12d   :  { %v348_v49 = vadd.f32 %v347_v48, %v3665_v13  ;;  %v650_v50 = vmax.f32 %v346_v46, 0.0 }
 0x12e   :  { %v351_v51 = vpop.f32.mrf.mxu0 }
 0x12f   :  { %v651_v53 = vmax.f32 %v348_v49, 0.0  ;;  %v772_v57 = vpack.c.bf16 %v650_v50, %v648_v54  ;;  %v352_v61 = vadd.f32 %v351_v51, %v3667_v14  ;;  %v3180_v49 = vld [vmem:[#allocation8 + $0x8] sm:$0xff]  }
 0x130   :  { %v353_v55 = vpop.f32.mrf.mxu0  ;;  %3040 = vmatprep.subr.bf16.mxu0 %v3180_v49 }
 0x131   :  { %v773_v56 = vpack.c.bf16 %v651_v53, %v649_v52  ;;  %v354_v59 = vadd.f32 %v353_v55, %v3665_v13  ;;  %v652_v6 = vmax.f32 %v352_v61, 0.0  ;;  %3041 = vmatpush3.bf16.msra.mxu0 %v3180_v49 }
 0x132   :  { %v355_v58 = vpop.f32.mrf.mxu0 }
 0x133   :  { %v356_v60 = vadd.f32 %v355_v58, %v3667_v14  ;;  %1015 = vmatprep.mubr.bf16.mxu1 %v773_v56  ;;  %v653_v3 = vmax.f32 %v354_v59, 0.0 }
 0x134   :  { %v357_v62 = vpop.f32.mrf.mxu0  ;;  %1016 = vmatmul.mubr.bf16.gmra.mxu1 %v772_v57 }
 0x135   :  { %v358_v63 = vadd.f32 %v357_v62, %v3665_v13  ;;  %v654_v1 = vmax.f32 %v356_v60, 0.0 }
 0x136   :  { %v361_v2 = vpop.f32.mrf.mxu0 }
 0x137   :  { %v655_v4 = vmax.f32 %v358_v63, 0.0  ;;  %v774_v9 = vpack.c.bf16 %v654_v1, %v652_v6  ;;  %v362_v0 = vadd.f32 %v361_v2, %v3667_v14 }
 0x138   :  { %v363_v7 = vpop.f32.mrf.mxu0 }
 0x139   :  { %v775_v8 = vpack.c.bf16 %v655_v4, %v653_v3  ;;  %v364_v11 = vadd.f32 %v363_v7, %v3665_v13  ;;  %v656_v21 = vmax.f32 %v362_v0, 0.0 }
 0x13a   :  { %v365_v10 = vpop.f32.mrf.mxu0 }
 0x13b   :  { %v366_v12 = vadd.f32 %v365_v10, %v3667_v14  ;;  %1023 = vmatprep.mubr.bf16.mxu1 %v775_v8  ;;  %v657_v19 = vmax.f32 %v364_v11, 0.0  ;;  %v3181_v11 = vld [vmem:[#allocation8] sm:$0xff]  }
 0x13c   :  { %v367_v15 = vpop.f32.mrf.mxu0  ;;  %1024 = vmatmul.mubr.bf16.gmra.mxu1 %v774_v9  ;;  %3042 = vmatprep.subr.bf16.mxu0 %v3181_v11 }
 0x13d   :  { %v368_v16 = vadd.f32 %v367_v15, %v3665_v13  ;;  %v658_v17 = vmax.f32 %v366_v12, 0.0  ;;  %3043 = vmatpush3.bf16.msra.mxu0 %v3181_v11 }
 0x13e   :  { %v371_v18 = vpop.f32.mrf.mxu0 }
 0x13f   :  { %v659_v20 = vmax.f32 %v368_v16, 0.0  ;;  %v776_v24 = vpack.c.bf16 %v658_v17, %v656_v21  ;;  %v372_v28 = vadd.f32 %v371_v18, %v3667_v14 }
 0x140   :  { %v373_v22 = vpop.f32.mrf.mxu0 }
 0x141   :  { %v777_v23 = vpack.c.bf16 %v659_v20, %v657_v19  ;;  %v374_v26 = vadd.f32 %v373_v22, %v3665_v13  ;;  %v660_v35 = vmax.f32 %v372_v28, 0.0 }
 0x142   :  { %v375_v25 = vpop.f32.mrf.mxu0 }
 0x143   :  { %v376_v27 = vadd.f32 %v375_v25, %v3667_v14  ;;  %1031 = vmatprep.mubr.bf16.mxu1 %v777_v23  ;;  %v661_v33 = vmax.f32 %v374_v26, 0.0 }
 0x144   :  { %v377_v29 = vpop.f32.mrf.mxu0  ;;  %1032 = vmatmul.mubr.bf16.gmra.mxu1 %v776_v24 }
 0x145   :  { %v378_v30 = vadd.f32 %v377_v29, %v3665_v13  ;;  %v662_v31 = vmax.f32 %v376_v27, 0.0  ;;  %v3709_v29 = vpop.f32.mrf.mxu1 }
 0x146   :  { %v381_v32 = vpop.f32.mrf.mxu0 }
 0x147   :  { %v663_v34 = vmax.f32 %v378_v30, 0.0  ;;  %v778_v38 = vpack.c.bf16 %v662_v31, %v660_v35  ;;  %v382_v42 = vadd.f32 %v381_v32, %v3667_v14 }
 0x148   :  { %v383_v36 = vpop.f32.mrf.mxu0 }
 0x149   :  { %v779_v37 = vpack.c.bf16 %v663_v34, %v661_v33  ;;  %v384_v40 = vadd.f32 %v383_v36, %v3665_v13  ;;  %v664_v50 = vmax.f32 %v382_v42, 0.0 }
 0x14a   :  { %v385_v39 = vpop.f32.mrf.mxu0 }
 0x14b   :  { %v386_v41 = vadd.f32 %v385_v39, %v3667_v14  ;;  %1039 = vmatprep.mubr.bf16.mxu1 %v779_v37  ;;  %v665_v47 = vmax.f32 %v384_v40, 0.0  ;;  %v3711_v37 = vpop.f32.mrf.mxu1 }
 0x14c   :  { %v387_v43 = vpop.f32.mrf.mxu0  ;;  %1040 = vmatmul.mubr.bf16.gmra.mxu1 %v778_v38 }
 0x14d   :  { %v388_v44 = vadd.f32 %v387_v43, %v3665_v13  ;;  %v666_v45 = vmax.f32 %v386_v41, 0.0 }
 0x14e   :  { %v391_v46 = vpop.f32.mrf.mxu0 }
 0x14f   :  { %v667_v48 = vmax.f32 %v388_v44, 0.0  ;;  %v780_v53 = vpack.c.bf16 %v666_v45, %v664_v50  ;;  %v392_v57 = vadd.f32 %v391_v46, %v3667_v14  ;;  %v3717_v45 = vpop.f32.mrf.mxu1 }
 0x150   :  { %v393_v51 = vpop.f32.mrf.mxu0 }
 0x151   :  { %v781_v52 = vpack.c.bf16 %v667_v48, %v665_v47  ;;  %v394_v55 = vadd.f32 %v393_v51, %v3665_v13  ;;  %v668_v1 = vmax.f32 %v392_v57, 0.0 }
 0x152   :  { %v395_v54 = vpop.f32.mrf.mxu0 }
 0x153   :  { %v396_v56 = vadd.f32 %v395_v54, %v3667_v14  ;;  %1047 = vmatprep.mubr.bf16.mxu1 %v781_v52  ;;  %v669_v62 = vmax.f32 %v394_v55, 0.0 }
 0x154   :  { %v397_v58 = vpop.f32.mrf.mxu0  ;;  %1048 = vmatmul.mubr.bf16.gmra.mxu1 %v780_v53  ;;  %v3719_v53 = vpop.f32.mrf.mxu1 }
 0x155   :  { %v398_v59 = vadd.f32 %v397_v58, %v3665_v13  ;;  %v670_v60 = vmax.f32 %v396_v56, 0.0 }
 0x156   :  { %v401_v61 = vpop.f32.mrf.mxu0 }
 0x157   :  { %v671_v63 = vmax.f32 %v398_v59, 0.0  ;;  %v782_v4 = vpack.c.bf16 %v670_v60, %v668_v1  ;;  %v402_v8 = vadd.f32 %v401_v61, %v3667_v14  ;;  %v3725_v61 = vpop.f32.mrf.mxu1 }
 0x158   :  { %v403_v2 = vpop.f32.mrf.mxu0 }
 0x159   :  { %v783_v3 = vpack.c.bf16 %v671_v63, %v669_v62  ;;  %v404_v6 = vadd.f32 %v403_v2, %v3665_v13  ;;  %v672_v17 = vmax.f32 %v402_v8, 0.0 }
 0x15a   :  { %v405_v5 = vpop.f32.mrf.mxu0 }
 0x15b   :  { %v406_v7 = vadd.f32 %v405_v5, %v3667_v14  ;;  %1055 = vmatprep.mubr.bf16.mxu1 %v783_v3  ;;  %v673_v15 = vmax.f32 %v404_v6, 0.0  ;;  %v3727_v6 = vpop.f32.mrf.mxu1 }
 0x15c   :  { %v407_v9 = vpop.f32.mrf.mxu0  ;;  %1056 = vmatmul.mubr.bf16.gmra.mxu1 %v782_v4 }
 0x15d   :  { %v408_v10 = vadd.f32 %v407_v9, %v3665_v13  ;;  %v674_v12 = vmax.f32 %v406_v7, 0.0 }
 0x15e   :  { %v411_v0 = vpop.f32.mrf.mxu0 }
 0x15f   :  { %v675_v16 = vmax.f32 %v408_v10, 0.0  ;;  %v784_v20 = vpack.c.bf16 %v674_v12, %v672_v17  ;;  %v412_v24 = vadd.f32 %v411_v0, %v3667_v14 }
 0x160   :  { %v413_v18 = vpop.f32.mrf.mxu0 }
 0x161   :  { %v785_v19 = vpack.c.bf16 %v675_v16, %v673_v15  ;;  %v414_v22 = vadd.f32 %v413_v18, %v3665_v13  ;;  %v676_v32 = vmax.f32 %v412_v24, 0.0  ;;  %v3733_v15 = vpop.f32.mrf.mxu1 }
 0x162   :  { %v415_v21 = vpop.f32.mrf.mxu0 }
 0x163   :  { %v416_v23 = vadd.f32 %v415_v21, %v3667_v14  ;;  %1063 = vmatprep.mubr.bf16.mxu1 %v785_v19  ;;  %v677_v30 = vmax.f32 %v414_v22, 0.0 }
 0x164   :  { %v417_v25 = vpop.f32.mrf.mxu0  ;;  %1064 = vmatmul.mubr.bf16.gmra.mxu1 %v784_v20 }
 0x165   :  { %v418_v26 = vadd.f32 %v417_v25, %v3665_v13  ;;  %v678_v27 = vmax.f32 %v416_v23, 0.0  ;;  %v3735_v23 = vpop.f32.mrf.mxu1 }
 0x166   :  { %v421_v28 = vpop.f32.mrf.mxu0 }
 0x167   :  { %v679_v31 = vmax.f32 %v418_v26, 0.0  ;;  %v786_v35 = vpack.c.bf16 %v678_v27, %v676_v32  ;;  %v422_v40 = vadd.f32 %v421_v28, %v3667_v14  ;;  %v3741_v32 = vpop.f32.mrf.mxu1 }
 0x168   :  { %v423_v33 = vpop.f32.mrf.mxu0 }
 0x169   :  { %v787_v34 = vpack.c.bf16 %v679_v31, %v677_v30  ;;  %v424_v38 = vadd.f32 %v423_v33, %v3665_v13  ;;  %v680_v48 = vmax.f32 %v422_v40, 0.0 }
 0x16a   :  { %v425_v36 = vpop.f32.mrf.mxu0 }
 0x16b   :  { %v426_v39 = vadd.f32 %v425_v36, %v3667_v14  ;;  %1071 = vmatprep.mubr.bf16.mxu1 %v787_v34  ;;  %v681_v46 = vmax.f32 %v424_v38, 0.0 }
 0x16c   :  { %v427_v41 = vpop.f32.mrf.mxu0  ;;  %1072 = vmatmul.mubr.bf16.gmra.mxu1 %v786_v35 }
 0x16d   :  { %v428_v42 = vadd.f32 %v427_v41, %v3665_v13  ;;  %v682_v43 = vmax.f32 %v426_v39, 0.0  ;;  %v3743_v41 = vpop.f32.mrf.mxu1 }
 0x16e   :  { %v431_v44 = vpop.f32.mrf.mxu0 }
 0x16f   :  { %v683_v47 = vmax.f32 %v428_v42, 0.0  ;;  %v788_v51 = vpack.c.bf16 %v682_v43, %v680_v48  ;;  %v432_v56 = vadd.f32 %v431_v44, %v3667_v14 }
 0x170   :  { %v433_v49 = vpop.f32.mrf.mxu0 }
 0x171   :  { %v789_v50 = vpack.c.bf16 %v683_v47, %v681_v46  ;;  %v434_v54 = vadd.f32 %v433_v49, %v3665_v13  ;;  %v684_v1 = vmax.f32 %v432_v56, 0.0 }
 0x172   :  { %v435_v52 = vpop.f32.mrf.mxu0 }
 0x173   :  { %v436_v55 = vadd.f32 %v435_v52, %v3667_v14  ;;  %1079 = vmatprep.mubr.bf16.mxu1 %v789_v50  ;;  %v685_v62 = vmax.f32 %v434_v54, 0.0  ;;  %v3749_v50 = vpop.f32.mrf.mxu1 }
 0x174   :  { %v437_v57 = vpop.f32.mrf.mxu0  ;;  %1080 = vmatmul.mubr.bf16.gmra.mxu1 %v788_v51 }
 0x175   :  { %v438_v58 = vadd.f32 %v437_v57, %v3665_v13  ;;  %v686_v59 = vmax.f32 %v436_v55, 0.0 }
 0x176   :  { %v441_v60 = vpop.f32.mrf.mxu0 }
 0x177   :  { %v687_v63 = vmax.f32 %v438_v58, 0.0  ;;  %v790_v4 = vpack.c.bf16 %v686_v59, %v684_v1  ;;  %v442_v9 = vadd.f32 %v441_v60, %v3667_v14  ;;  %v3751_v59 = vpop.f32.mrf.mxu1 }
 0x178   :  { %v443_v2 = vpop.f32.mrf.mxu0 }
 0x179   :  { %v791_v3 = vpack.c.bf16 %v687_v63, %v685_v62  ;;  %v444_v7 = vadd.f32 %v443_v2, %v3665_v13  ;;  %v688_v18 = vmax.f32 %v442_v9, 0.0 }
 0x17a   :  { %v445_v5 = vpop.f32.mrf.mxu0 }
 0x17b   :  { %v446_v8 = vadd.f32 %v445_v5, %v3667_v14  ;;  %1087 = vmatprep.mubr.bf16.mxu1 %v791_v3  ;;  %v689_v16 = vmax.f32 %v444_v7, 0.0  ;;  %v3757_v5 = vpop.f32.mrf.mxu1 }
 0x17c   :  { %v447_v10 = vpop.f32.mrf.mxu0  ;;  %1088 = vmatmul.mubr.bf16.gmra.mxu1 %v790_v4 }
 0x17d   :  { %v448_v11 = vadd.f32 %v447_v10, %v3665_v13  ;;  %v690_v12 = vmax.f32 %v446_v8, 0.0 }
 0x17e   :  { %v451_v0 = vpop.f32.mrf.mxu0 }
 0x17f   :  { %v691_v17 = vmax.f32 %v448_v11, 0.0  ;;  %v792_v21 = vpack.c.bf16 %v690_v12, %v688_v18  ;;  %v452_v26 = vadd.f32 %v451_v0, %v3667_v14 }
 0x180   :  { %v453_v19 = vpop.f32.mrf.mxu0 }
 0x181   :  { %v793_v20 = vpack.c.bf16 %v691_v17, %v689_v16  ;;  %v454_v24 = vadd.f32 %v453_v19, %v3665_v13  ;;  %v692_v35 = vmax.f32 %v452_v26, 0.0  ;;  %v3759_v16 = vpop.f32.mrf.mxu1 }
 0x182   :  { %v455_v22 = vpop.f32.mrf.mxu0 }
 0x183   :  { %v456_v25 = vadd.f32 %v455_v22, %v3667_v14  ;;  %1095 = vmatprep.mubr.bf16.mxu1 %v793_v20  ;;  %v693_v33 = vmax.f32 %v454_v24, 0.0 }
 0x184   :  { %v457_v27 = vpop.f32.mrf.mxu0  ;;  %1096 = vmatmul.mubr.bf16.gmra.mxu1 %v792_v21 }
 0x185   :  { %v458_v28 = vadd.f32 %v457_v27, %v3665_v13  ;;  %v694_v30 = vmax.f32 %v456_v25, 0.0  ;;  %v3765_v25 = vpop.f32.mrf.mxu1 }
 0x186   :  { %v461_v31 = vpop.f32.mrf.mxu0 }
 0x187   :  { %v695_v34 = vmax.f32 %v458_v28, 0.0  ;;  %v794_v39 = vpack.c.bf16 %v694_v30, %v692_v35  ;;  %v462_v44 = vadd.f32 %v461_v31, %v3667_v14  ;;  %v3767_v35 = vpop.f32.mrf.mxu1 }
 0x188   :  { %v463_v36 = vpop.f32.mrf.mxu0 }
 0x189   :  { %v795_v38 = vpack.c.bf16 %v695_v34, %v693_v33  ;;  %v464_v42 = vadd.f32 %v463_v36, %v3665_v13  ;;  %v696_v54 = vmax.f32 %v462_v44, 0.0 }
 0x18a   :  { %v465_v40 = vpop.f32.mrf.mxu0 }
 0x18b   :  { %v466_v43 = vadd.f32 %v465_v40, %v3667_v14  ;;  %1103 = vmatprep.mubr.bf16.mxu1 %v795_v38  ;;  %v697_v51 = vmax.f32 %v464_v42, 0.0 }
 0x18c   :  { %v467_v46 = vpop.f32.mrf.mxu0  ;;  %1104 = vmatmul.mubr.bf16.gmra.mxu1 %v794_v39 }
 0x18d   :  { %v468_v47 = vadd.f32 %v467_v46, %v3665_v13  ;;  %v698_v48 = vmax.f32 %v466_v43, 0.0  ;;  %v3773_v46 = vpop.f32.mrf.mxu1 }
 0x18e   :  { %v471_v49 = vpop.f32.mrf.mxu0 }
 0x18f   :  { %v699_v52 = vmax.f32 %v468_v47, 0.0  ;;  %v796_v57 = vpack.c.bf16 %v698_v48, %v696_v54  ;;  %v472_v63 = vadd.f32 %v471_v49, %v3667_v14 }
 0x190   :  { %v473_v55 = vpop.f32.mrf.mxu0 }
 0x191   :  { %v797_v56 = vpack.c.bf16 %v699_v52, %v697_v51  ;;  %v474_v60 = vadd.f32 %v473_v55, %v3665_v13  ;;  %v700_v9 = vmax.f32 %v472_v63, 0.0 }
 0x192   :  { %v475_v58 = vpop.f32.mrf.mxu0 }
 0x193   :  { %v476_v62 = vadd.f32 %v475_v58, %v3667_v14  ;;  %1111 = vmatprep.mubr.bf16.mxu1 %v797_v56  ;;  %v701_v7 = vmax.f32 %v474_v60, 0.0  ;;  %v3775_v56 = vpop.f32.mrf.mxu1 }
 0x194   :  { %v477_v1 = vpop.f32.mrf.mxu0  ;;  %1112 = vmatmul.mubr.bf16.gmra.mxu1 %v796_v57 }
 0x195   :  { %v478_v2 = vadd.f32 %v477_v1, %v3665_v13  ;;  %v702_v3 = vmax.f32 %v476_v62, 0.0 }
 0x196   :  { %v481_v4 = vpop.f32.mrf.mxu0 }
 0x197   :  { %v703_v8 = vmax.f32 %v478_v2, 0.0  ;;  %v798_v12 = vpack.c.bf16 %v702_v3, %v700_v9  ;;  %v482_v19 = vadd.f32 %v481_v4, %v3667_v14  ;;  %v3781_v3 = vpop.f32.mrf.mxu1 }
 0x198   :  { %v483_v10 = vpop.f32.mrf.mxu0 }
 0x199   :  { %v799_v11 = vpack.c.bf16 %v703_v8, %v701_v7  ;;  %v484_v17 = vadd.f32 %v483_v10, %v3665_v13  ;;  %v704_v28 = vmax.f32 %v482_v19, 0.0 }
 0x19a   :  { %v485_v0 = vpop.f32.mrf.mxu0 }
 0x19b   :  { %v486_v18 = vadd.f32 %v485_v0, %v3667_v14  ;;  %1119 = vmatprep.mubr.bf16.mxu1 %v799_v11  ;;  %v705_v26 = vmax.f32 %v484_v17, 0.0  ;;  %v3783_v0 = vpop.f32.mrf.mxu1 }
 0x19c   :  { %v487_v20 = vpop.f32.mrf.mxu0  ;;  %1120 = vmatmul.mubr.bf16.gmra.mxu1 %v798_v12 }
 0x19d   :  { %v488_v21 = vadd.f32 %v487_v20, %v3665_v13  ;;  %v706_v22 = vmax.f32 %v486_v18, 0.0 }
 0x19e   :  { %v491_v24 = vpop.f32.mrf.mxu0 }
 0x19f   :  { %v707_v27 = vmax.f32 %v488_v21, 0.0  ;;  %v800_v33 = vpack.c.bf16 %v706_v22, %v704_v28  ;;  %v492_v39 = vadd.f32 %v491_v24, %v3667_v14 }
 0x1a0   :  { %v493_v30 = vpop.f32.mrf.mxu0 }
 0x1a1   :  { %v801_v31 = vpack.c.bf16 %v707_v27, %v705_v26  ;;  %v494_v36 = vadd.f32 %v493_v30, %v3665_v13  ;;  %v708_v49 = vmax.f32 %v492_v39, 0.0  ;;  %v3789_v26 = vpop.f32.mrf.mxu1 }
 0x1a2   :  { %v495_v34 = vpop.f32.mrf.mxu0 }
 0x1a3   :  { %v496_v38 = vadd.f32 %v495_v34, %v3667_v14  ;;  %1127 = vmatprep.mubr.bf16.mxu1 %v801_v31  ;;  %v709_v47 = vmax.f32 %v494_v36, 0.0 }
 0x1a4   :  { %v497_v40 = vpop.f32.mrf.mxu0  ;;  %1128 = vmatmul.mubr.bf16.gmra.mxu1 %v800_v33 }
 0x1a5   :  { %v498_v42 = vadd.f32 %v497_v40, %v3665_v13  ;;  %v710_v43 = vmax.f32 %v496_v38, 0.0  ;;  %v3791_v38 = vpop.f32.mrf.mxu1 }
 0x1a6   :  { %v501_v44 = vpop.f32.mrf.mxu0 }
 0x1a7   :  { %v711_v48 = vmax.f32 %v498_v42, 0.0  ;;  %v802_v54 = vpack.c.bf16 %v710_v43, %v708_v49  ;;  %v502_v60 = vadd.f32 %v501_v44, %v3667_v14  ;;  %v3797_v49 = vpop.f32.mrf.mxu1 }
 0x1a8   :  { %v503_v51 = vpop.f32.mrf.mxu0 }
 0x1a9   :  { %v803_v52 = vpack.c.bf16 %v711_v48, %v709_v47  ;;  %v504_v57 = vadd.f32 %v503_v51, %v3665_v13  ;;  %v712_v8 = vmax.f32 %v502_v60, 0.0 }
 0x1aa   :  { %v505_v55 = vpop.f32.mrf.mxu0 }
 0x1ab   :  { %v506_v58 = vadd.f32 %v505_v55, %v3667_v14  ;;  %1135 = vmatprep.mubr.bf16.mxu1 %v803_v52  ;;  %v713_v4 = vmax.f32 %v504_v57, 0.0 }
 0x1ac   :  { %v507_v62 = vpop.f32.mrf.mxu0  ;;  %1136 = vmatmul.mubr.bf16.gmra.mxu1 %v802_v54 }
 0x1ad   :  { %v508_v63 = vadd.f32 %v507_v62, %v3665_v13  ;;  %v714_v1 = vmax.f32 %v506_v58, 0.0  ;;  %v3799_v62 = vpop.f32.mrf.mxu1 }
 0x1ae   :  { %v511_v2 = vpop.f32.mrf.mxu0 }
 0x1af   :  { %v715_v7 = vmax.f32 %v508_v63, 0.0  ;;  %v804_v11 = vpack.c.bf16 %v714_v1, %v712_v8  ;;  %v512_v19 = vadd.f32 %v511_v2, %v3667_v14 }
 0x1b0   :  { %v513_v9 = vpop.f32.mrf.mxu0 }
 0x1b1   :  { %v805_v10 = vpack.c.bf16 %v715_v7, %v713_v4  ;;  %v514_v17 = vadd.f32 %v513_v9, %v3665_v13  ;;  %v716_v30 = vmax.f32 %v512_v19, 0.0 }
 0x1b2   :  { %v515_v12 = vpop.f32.mrf.mxu0 }
 0x1b3   :  { %v516_v18 = vadd.f32 %v515_v12, %v3667_v14  ;;  %1143 = vmatprep.mubr.bf16.mxu1 %v805_v10  ;;  %v717_v27 = vmax.f32 %v514_v17, 0.0  ;;  %v3805_v10 = vpop.f32.mrf.mxu1 }
 0x1b4   :  { %v517_v20 = vpop.f32.mrf.mxu0  ;;  %1144 = vmatmul.mubr.bf16.gmra.mxu1 %v804_v11 }
 0x1b5   :  { %v518_v21 = vadd.f32 %v517_v20, %v3665_v13  ;;  %v718_v22 = vmax.f32 %v516_v18, 0.0 }
 0x1b6   :  { %v521_v24 = vpop.f32.mrf.mxu0 }
 0x1b7   :  { %v719_v28 = vmax.f32 %v518_v21, 0.0  ;;  %v806_v34 = vpack.c.bf16 %v718_v22, %v716_v30  ;;  %v522_v42 = vadd.f32 %v521_v24, %v3667_v14  ;;  %v3807_v22 = vpop.f32.mrf.mxu1 }
 0x1b8   :  { %v523_v31 = vpop.f32.mrf.mxu0 }
 0x1b9   :  { %v807_v33 = vpack.c.bf16 %v719_v28, %v717_v27  ;;  %v524_v39 = vadd.f32 %v523_v31, %v3665_v13  ;;  %v720_v54 = vmax.f32 %v522_v42, 0.0 }
 0x1ba   :  { %v525_v36 = vpop.f32.mrf.mxu0 }
 0x1bb   :  { %v526_v40 = vadd.f32 %v525_v36, %v3667_v14  ;;  %1151 = vmatprep.mubr.bf16.mxu1 %v807_v33  ;;  %v721_v51 = vmax.f32 %v524_v39, 0.0  ;;  %v3813_v36 = vpop.f32.mrf.mxu1 }
 0x1bc   :  { %v527_v43 = vpop.f32.mrf.mxu0  ;;  %1152 = vmatmul.mubr.bf16.gmra.mxu1 %v806_v34 }
 0x1bd   :  { %v528_v44 = vadd.f32 %v527_v43, %v3665_v13  ;;  %v722_v47 = vmax.f32 %v526_v40, 0.0 }
 0x1be   :  { %v531_v48 = vpop.f32.mrf.mxu0 }
 0x1bf   :  { %v723_v52 = vmax.f32 %v528_v44, 0.0  ;;  %v808_v58 = vpack.c.bf16 %v722_v47, %v720_v54  ;;  %v532_v2 = vadd.f32 %v531_v48, %v3667_v14  ;;  %v568_v54 = vadd.f32 %v3719_v53, %v3665_v13 }
 0x1c0   :  { %v533_v55 = vpop.f32.mrf.mxu0 }
 0x1c1   :  { %v809_v57 = vpack.c.bf16 %v723_v52, %v721_v51  ;;  %v534_v63 = vadd.f32 %v533_v55, %v3665_v13  ;;  %v724_v17 = vmax.f32 %v532_v2, 0.0  ;;  %v3815_v51 = vpop.f32.mrf.mxu1  ;;  %v564_v52 = vadd.f32 %v3711_v37, %v3665_v13 }
 0x1c2   :  { %v535_v60 = vpop.f32.mrf.mxu0 }
 0x1c3   :  { %v536_v1 = vadd.f32 %v535_v60, %v3667_v14  ;;  %1159 = vmatprep.mubr.bf16.mxu1 %v809_v57  ;;  %v725_v11 = vmax.f32 %v534_v63, 0.0  ;;  %v3825_v2 = vpop.f32.mrf.mxu1 }
 0x1c4   :  { %v537_v4 = vpop.f32.mrf.mxu0  ;;  %1160 = vmatmul.mubr.bf16.gmra.mxu1 %v808_v58 }
 0x1c5   :  { %v538_v7 = vadd.f32 %v537_v4, %v3665_v13  ;;  %v726_v8 = vmax.f32 %v536_v1, 0.0  ;;  %v737_v4 = vmax.f32 %v564_v52, 0.0 }
 0x1c6   :  { %v541_v9 = vpop.f32.mrf.mxu0 }
 0x1c7   :  { %v727_v12 = vmax.f32 %v538_v7, 0.0  ;;  %v810_v20 = vpack.c.bf16 %v726_v8, %v724_v17  ;;  %v542_v28 = vadd.f32 %v541_v9, %v3667_v14  ;;  %v739_v7 = vmax.f32 %v568_v54, 0.0 }
 0x1c8   :  { %v543_v18 = vpop.f32.mrf.mxu0  ;;  %v582_v54 = vadd.f32 %v3741_v32, %v3667_v14 }
 0x1c9   :  { %v811_v19 = vpack.c.bf16 %v727_v12, %v725_v11  ;;  %v544_v24 = vadd.f32 %v543_v18, %v3665_v13  ;;  %v728_v42 = vmax.f32 %v542_v28, 0.0  ;;  %v562_v11 = vadd.f32 %v3709_v29, %v3667_v14  ;;  %v3831_v18 = vpop.f32.mrf.mxu1 }
 0x1ca   :  { %v545_v21 = vpop.f32.mrf.mxu0  ;;  %v566_v12 = vadd.f32 %v3717_v45, %v3667_v14  ;;  %v572_v45 = vadd.f32 %v3725_v61, %v3667_v14 }
 0x1cb   :  { %v546_v27 = vadd.f32 %v545_v21, %v3667_v14  ;;  %1167 = vmatprep.mubr.bf16.mxu1 %v811_v19  ;;  %v729_v39 = vmax.f32 %v544_v24, 0.0  ;;  %v574_v19 = vadd.f32 %v3727_v6, %v3665_v13  ;;  %v817_v21 = vpack.c.bf16 %v739_v7, %v737_v4  ;;  %v3837_v28 = vpop.f32.mrf.mxu1 }
 0x1cc   :  { %v547_v30 = vpop.f32.mrf.mxu0  ;;  %1168 = vmatmul.mubr.bf16.gmra.mxu1 %v810_v20  ;;  %v578_v20 = vadd.f32 %v3735_v23, %v3665_v13  ;;  %v736_v24 = vmax.f32 %v562_v11, 0.0  ;;  %v584_v23 = vadd.f32 %v3743_v41, %v3665_v13  ;;  %v740_v61 = vmax.f32 %v572_v45, 0.0 }
 0x1cd   :  { %v548_v31 = vadd.f32 %v547_v30, %v3665_v13  ;;  %v730_v33 = vmax.f32 %v546_v27, 0.0  ;;  %v738_v27 = vmax.f32 %v566_v12, 0.0  ;;  %v741_v29 = vmax.f32 %v574_v19, 0.0 }
 0x1ce   :  { %v551_v34 = vpop.f32.mrf.mxu0  ;;  %v743_v30 = vmax.f32 %v578_v20, 0.0  ;;  %v596_v12 = vadd.f32 %v3765_v25, %v3667_v14 }
 0x1cf   :  { %v731_v40 = vmax.f32 %v548_v31, 0.0  ;;  %v812_v47 = vpack.c.bf16 %v730_v33, %v728_v42  ;;  %v552_v58 = vadd.f32 %v551_v34, %v3667_v14  ;;  %v576_v31 = vadd.f32 %v3733_v15, %v3667_v14  ;;  %v3843_v33 = vpop.f32.mrf.mxu1 }
 0x1d0   :  { %v553_v43 = vpop.f32.mrf.mxu0  ;;  %v816_v6 = vpack.c.bf16 %v738_v27, %v736_v24  ;;  %v588_v34 = vadd.f32 %v3751_v59, %v3665_v13  ;;  %v604_v24 = vadd.f32 %v3775_v56, %v3665_v13  ;;  %v608_v27 = vadd.f32 %v3783_v0, %v3665_v13 }
 0x1d1   :  { %v813_v44 = vpack.c.bf16 %v731_v40, %v729_v39  ;;  %v554_v55 = vadd.f32 %v553_v43, %v3665_v13  ;;  %v732_v9 = vmax.f32 %v552_v58, 0.0  ;;  %v819_v39 = vpack.c.bf16 %v743_v30, %v741_v29  ;;  %v3852_v40 = vld [vmem:[%s4553_s4] ss:$0 sm:$0xff] }
 0x1d2   :  { %v555_v48 = vpop.f32.mrf.mxu0  ;;  %v742_v43 = vmax.f32 %v576_v31, 0.0  ;;  %v598_v58 = vadd.f32 %v3767_v35, %v3665_v13  ;;  %v592_v35 = vadd.f32 %v3757_v5, %v3667_v14  ;;  %v750_v5 = vmax.f32 %v596_v12, 0.0 }
 0x1d3   :  { %v556_v57 = vadd.f32 %v555_v48, %v3667_v14  ;;  %1175 = vmatprep.mubr.bf16.mxu1 %v813_v44  ;;  %v733_v37 = vmax.f32 %v554_v55, 0.0  ;;  %v745_v44 = vmax.f32 %v584_v23, 0.0  ;;  %v586_v55 = vadd.f32 %v3749_v50, %v3667_v14 }
 0x1d4   :  { %v557_v60 = vpop.f32.mrf.mxu0  ;;  %1176 = vmatmul.mubr.bf16.gmra.mxu1 %v812_v47  ;;  %v747_v47 = vmax.f32 %v588_v34, 0.0  ;;  %v818_v52 = vpack.c.bf16 %v742_v43, %v740_v61  ;;  %v748_v31 = vmax.f32 %v592_v35, 0.0  ;;  %v753_v23 = vmax.f32 %v604_v24, 0.0 }
 0x1d5   :  { %v558_v63 = vadd.f32 %v557_v60, %v3665_v13  ;;  %v734_v1 = vmax.f32 %v556_v57, 0.0  ;;  %v594_v57 = vadd.f32 %v3759_v16, %v3665_v13  ;;  %v755_v34 = vmax.f32 %v608_v27, 0.0 }
 0x1d6   :  { %v821_v4 = vpack.c.bf16 %v747_v47, %v745_v44  ;;  %v822_v61 = vpack.c.bf16 %v750_v5, %v748_v31  ;;  %v602_v0 = vadd.f32 %v3773_v46, %v3667_v14  ;;  %v606_v43 = vadd.f32 %v3781_v3, %v3667_v14 }
 0x1d7   :  { %v735_v8 = vmax.f32 %v558_v63, 0.0  ;;  %v814_v17 = vpack.c.bf16 %v734_v1, %v732_v9  ;;  %v746_v9 = vmax.f32 %v586_v55, 0.0  ;;  %v749_v32 = vmax.f32 %v594_v57, 0.0 }
 0x1d8   :  { %v618_v44 = vadd.f32 %v3799_v62, %v3665_v13  ;;  %v752_v55 = vmax.f32 %v602_v0, 0.0  ;;  %v754_v57 = vmax.f32 %v606_v43, 0.0  ;;  %v634_v24 = vadd.f32 %v3831_v18, %v3665_v13 }
 0x1d9   :  { %v815_v53 = vpack.c.bf16 %v735_v8, %v733_v37  ;;  %v744_v8 = vmax.f32 %v582_v54, 0.0 }
 0x1da   :  { %v824_v62 = vpack.c.bf16 %v754_v57, %v752_v55 }
 0x1db   :  { %1183 = vmatprep.mubr.bf16.mxu1 %v815_v53  ;;  %v751_v53 = vmax.f32 %v598_v58, 0.0  ;;  %v820_v19 = vpack.c.bf16 %v746_v9, %v744_v8  ;;  %v759_v58 = vmax.f32 %v618_v44, 0.0  ;;  %v624_v8 = vadd.f32 %v3807_v22, %v3665_v13 }
 0x1dc   :  { %1184 = vmatmul.mubr.bf16.gmra.mxu1 %v814_v17  ;;  %v628_v9 = vadd.f32 %v3815_v51, %v3665_v13  ;;  %v622_v51 = vadd.f32 %v3805_v10, %v3667_v14 }
 0x1dd   :  { %1191 = vmatprep.mubr.bf16.mxu1 %v817_v21  ;;  %v823_v21 = vpack.c.bf16 %v751_v53, %v749_v32  ;;  %v761_v12 = vmax.f32 %v624_v8, 0.0 }
 0x1e4   :  { %v1001_v42 = vpop.f32.mrf.mxu1  ;;  %1192 = vmatmul.mubr.bf16.gmra.mxu1 %v816_v6 }
 0x1e5   :  { %1199 = vmatprep.mubr.bf16.mxu1 %v819_v39  ;;  %v1002_v48 = vadd.f32 %v3852_v40, %v1001_v42 }
 0x1e6   :  { %v1003_v15 = vpop.f32.mrf.mxu1 }
 0x1e7   :  { %v1256_v63 = vmax.f32 %v1002_v48, 0.0  ;;  %v614_v15 = vadd.f32 %v3791_v38, %v3665_v13 }
 0x1e8   :  { %v1004_v41 = vpop.f32.mrf.mxu1 }
 0x1e9   :  { %v1005_v59 = vadd.f32 %v3852_v40, %v1004_v41  ;;  %v757_v46 = vmax.f32 %v614_v15, 0.0 }
 0x1ea   :  { %v1006_v60 = vpop.f32.mrf.mxu1 }
 0x1eb   :  { %v1257_v1 = vmax.f32 %v1005_v59, 0.0 }
 0x1ec   :  { %v1009_v7 = vpop.f32.mrf.mxu1  ;;  %1200 = vmatmul.mubr.bf16.gmra.mxu1 %v818_v52  ;;  %v825_v52 = vpack.c.bf16 %v755_v34, %v753_v23  ;;  %v765_v34 = vmax.f32 %v634_v24, 0.0 }
 0x1ed   :  { %v1320_v37 = vpack.c.bf16 %v1257_v1, %v1256_v63  ;;  %1207 = vmatprep.mubr.bf16.mxu1 %v821_v4  ;;  %v1010_v50 = vadd.f32 %v3852_v40, %v1009_v7  ;;  %v612_v1 = vadd.f32 %v3789_v26, %v3667_v14  ;;  %v616_v4 = vadd.f32 %v3797_v49, %v3667_v14 }
 0x1ee   :  { %v1011_v11 = vpop.f32.mrf.mxu1 }
 0x1ef   :  { %3044 = vmatprep.mubr.bf16.mxu0 %v1320_v37  ;;  %v1258_v29 = vmax.f32 %v1010_v50, 0.0  ;;  %v827_v37 = vpack.c.bf16 %v759_v58, %v757_v46  ;;  %v758_v35 = vmax.f32 %v616_v4, 0.0 }
 0x1f0   :  { %v1012_v16 = vpop.f32.mrf.mxu1 }
 0x1f1   :  { %v1013_v17 = vadd.f32 %v3852_v40, %v1012_v16  ;;  %v756_v16 = vmax.f32 %v612_v1, 0.0 }
 0x1f2   :  { %v1014_v20 = vpop.f32.mrf.mxu1 }
 0x1f3   :  { %v1259_v30 = vmax.f32 %v1013_v17, 0.0  ;;  %v763_v17 = vmax.f32 %v628_v9, 0.0  ;;  %v826_v20 = vpack.c.bf16 %v758_v35, %v756_v16 }
 0x1f4   :  { %v1017_v45 = vpop.f32.mrf.mxu1  ;;  %1208 = vmatmul.mubr.bf16.gmra.mxu1 %v820_v19 }
 0x1f5   :  { %v1321_v6 = vpack.c.bf16 %v1259_v30, %v1258_v29  ;;  %1215 = vmatprep.mubr.bf16.mxu1 %v823_v21  ;;  %v1018_v39 = vadd.f32 %v3852_v40, %v1017_v45  ;;  %v626_v21 = vadd.f32 %v3813_v36, %v3667_v14  ;;  %v638_v29 = vadd.f32 %v3843_v33, %v3665_v13 }
 0x1f6   :  { %v1019_v25 = vpop.f32.mrf.mxu1  ;;  %v829_v31 = vpack.c.bf16 %v763_v17, %v761_v12  ;;  %v632_v13 = vadd.f32 %v3825_v2, %v3667_v14  ;;  %v636_v33 = vadd.f32 %v3837_v28, %v3667_v14 }
 0x1f7   :  { %3045 = vmatmul.mubr.bf16.vlgmr.msra.gmra.mxu0 %v1321_v6  ;;  %v1260_v48 = vmax.f32 %v1018_v39, 0.0  ;;  %v760_v25 = vmax.f32 %v622_v51, 0.0  ;;  %v762_v23 = vmax.f32 %v626_v21, 0.0  ;;  %v767_v39 = vmax.f32 %v638_v29, 0.0 }
 0x1f8   :  { %v1020_v42 = vpop.f32.mrf.mxu1 }
 0x1f9   :  { %v1021_v56 = vadd.f32 %v3852_v40, %v1020_v42  ;;  %v831_v15 = vpack.c.bf16 %v767_v39, %v765_v34 }
 0x1fa   :  { %v1022_v47 = vpop.f32.mrf.mxu1 }
 0x1fb   :  { %v1261_v41 = vmax.f32 %v1021_v56, 0.0 }
 0x1fc   :  { %v1025_v59 = vpop.f32.mrf.mxu1  ;;  %1216 = vmatmul.mubr.bf16.gmra.mxu1 %v822_v61  ;;  %v828_v61 = vpack.c.bf16 %v762_v23, %v760_v25 }
 0x1fd   :  { %v1322_v54 = vpack.c.bf16 %v1261_v41, %v1260_v48  ;;  %1223 = vmatprep.mubr.bf16.mxu1 %v825_v52  ;;  %v1026_v3 = vadd.f32 %v3852_v40, %v1025_v59  ;;  %v764_v48 = vmax.f32 %v632_v13, 0.0  ;;  %v766_v41 = vmax.f32 %v636_v33, 0.0 }
 0x1fe   :  { %v1027_v60 = vpop.f32.mrf.mxu1 }
 0x1ff   :  { %3048 = vmatprep.mubr.bf16.mxu0 %v1322_v54  ;;  %v1262_v32 = vmax.f32 %v1026_v3, 0.0  ;;  %v830_v55 = vpack.c.bf16 %v766_v41, %v764_v48 }
 0x200   :  { %v1028_v38 = vpop.f32.mrf.mxu1 }
 0x201   :  { %v1029_v63 = vadd.f32 %v3852_v40, %v1028_v38 }
 0x202   :  { %v1030_v7 = vpop.f32.mrf.mxu1 }
 0x203   :  { %v1263_v53 = vmax.f32 %v1029_v63, 0.0 }
 0x204   :  { %v1033_v11 = vpop.f32.mrf.mxu1  ;;  %1224 = vmatmul.mubr.bf16.gmra.mxu1 %v824_v62 }
 0x205   :  { %v1323_v50 = vpack.c.bf16 %v1263_v53, %v1262_v32  ;;  %1231 = vmatprep.mubr.bf16.mxu1 %v827_v37  ;;  %v1034_v49 = vadd.f32 %v3852_v40, %v1033_v11 }
 0x206   :  { %v1035_v26 = vpop.f32.mrf.mxu1 }
 0x207   :  { %3049 = vmatmul.mubr.bf16.gmra.mxu0 %v1323_v50  ;;  %v1264_v30 = vmax.f32 %v1034_v49, 0.0 }
 0x208   :  { %v1036_v19 = vpop.f32.mrf.mxu1 }
 0x209   :  { %v1037_v22 = vadd.f32 %v3852_v40, %v1036_v19 }
 0x20a   :  { %v1038_v27 = vpop.f32.mrf.mxu1 }
 0x20b   :  { %v1265_v45 = vmax.f32 %v1037_v22, 0.0 }
 0x20c   :  { %v1041_v5 = vpop.f32.mrf.mxu1  ;;  %1232 = vmatmul.mubr.bf16.gmra.mxu1 %v826_v20 }
 0x20d   :  { %v1324_v6 = vpack.c.bf16 %v1265_v45, %v1264_v30  ;;  %1239 = vmatprep.mubr.bf16.mxu1 %v829_v31  ;;  %v1042_v36 = vadd.f32 %v3852_v40, %v1041_v5 }
 0x20e   :  { %v1043_v10 = vpop.f32.mrf.mxu1 }
 0x20f   :  { %3052 = vmatprep.mubr.bf16.mxu0 %v1324_v6  ;;  %v1266_v0 = vmax.f32 %v1042_v36, 0.0 }
 0x210   :  { %v1044_v18 = vpop.f32.mrf.mxu1 }
 0x211   :  { %v1045_v42 = vadd.f32 %v3852_v40, %v1044_v18 }
 0x212   :  { %v1046_v56 = vpop.f32.mrf.mxu1 }
 0x213   :  { %v1267_v43 = vmax.f32 %v1045_v42, 0.0 }
 0x214   :  { %v1049_v44 = vpop.f32.mrf.mxu1  ;;  %1240 = vmatmul.mubr.bf16.gmra.mxu1 %v828_v61 }
 0x215   :  { %v1325_v47 = vpack.c.bf16 %v1267_v43, %v1266_v0  ;;  %1247 = vmatprep.mubr.bf16.mxu1 %v831_v15  ;;  %v1050_v59 = vadd.f32 %v3852_v40, %v1049_v44 }
 0x216   :  { %v1051_v52 = vpop.f32.mrf.mxu1 }
 0x217   :  { %3053 = vmatmul.mubr.bf16.gmra.mxu0 %v1325_v47  ;;  %v1268_v14 = vmax.f32 %v1050_v59, 0.0 }
 0x218   :  { %v1052_v54 = vpop.f32.mrf.mxu1 }
 0x219   :  { %v1053_v2 = vadd.f32 %v3852_v40, %v1052_v54 }
 0x21a   :  { %v1054_v57 = vpop.f32.mrf.mxu1 }
 0x21b   :  { %v1269_v28 = vmax.f32 %v1053_v2, 0.0 }
 0x21c   :  { %v1057_v46 = vpop.f32.mrf.mxu1  ;;  %1248 = vmatmul.mubr.bf16.gmra.mxu1 %v830_v55 }
 0x21d   :  { %v1326_v58 = vpack.c.bf16 %v1269_v28, %v1268_v14  ;;  %v1058_v3 = vadd.f32 %v3852_v40, %v1057_v46 }
 0x21e   :  { %v1059_v60 = vpop.f32.mrf.mxu1 }
 0x21f   :  { %3056 = vmatprep.mubr.bf16.mxu0 %v1326_v58  ;;  %v1270_v1 = vmax.f32 %v1058_v3, 0.0 }
 0x220   :  { %v1060_v38 = vpop.f32.mrf.mxu1 }
 0x221   :  { %v1061_v63 = vadd.f32 %v3852_v40, %v1060_v38 }
 0x222   :  { %v1062_v62 = vpop.f32.mrf.mxu1 }
 0x223   :  { %v1271_v4 = vmax.f32 %v1061_v63, 0.0 }
 0x224   :  { %v1065_v7 = vpop.f32.mrf.mxu1 }
 0x225   :  { %v1327_v37 = vpack.c.bf16 %v1271_v4, %v1270_v1  ;;  %v1066_v9 = vadd.f32 %v3852_v40, %v1065_v7 }
 0x226   :  { %v1067_v8 = vpop.f32.mrf.mxu1 }
 0x227   :  { %3057 = vmatmul.mubr.bf16.gmra.mxu0 %v1327_v37  ;;  %v1272_v50 = vmax.f32 %v1066_v9, 0.0 }
 0x228   :  { %v1068_v32 = vpop.f32.mrf.mxu1 }
 0x229   :  { %v1069_v53 = vadd.f32 %v3852_v40, %v1068_v32 }
 0x22a   :  { %v1070_v11 = vpop.f32.mrf.mxu1 }
 0x22b   :  { %v1273_v16 = vmax.f32 %v1069_v53, 0.0 }
 0x22c   :  { %v1073_v35 = vpop.f32.mrf.mxu1 }
 0x22d   :  { %v1328_v26 = vpack.c.bf16 %v1273_v16, %v1272_v50  ;;  %v1074_v17 = vadd.f32 %v3852_v40, %v1073_v35 }
 0x22e   :  { %v1075_v12 = vpop.f32.mrf.mxu1 }
 0x22f   :  { %3060 = vmatprep.mubr.bf16.mxu0 %v1328_v26  ;;  %v1274_v20 = vmax.f32 %v1074_v17, 0.0 }
 0x230   :  { %v1076_v49 = vpop.f32.mrf.mxu1 }
 0x231   :  { %v1077_v19 = vadd.f32 %v3852_v40, %v1076_v49 }
 0x232   :  { %v1078_v22 = vpop.f32.mrf.mxu1 }
 0x233   :  { %v1275_v51 = vmax.f32 %v1077_v19, 0.0 }
 0x234   :  { %v1081_v21 = vpop.f32.mrf.mxu1 }
 0x235   :  { %v1329_v24 = vpack.c.bf16 %v1275_v51, %v1274_v20  ;;  %v1082_v29 = vadd.f32 %v3852_v40, %v1081_v21 }
 0x236   :  { %v1083_v27 = vpop.f32.mrf.mxu1 }
 0x237   :  { %3061 = vmatmul.mubr.bf16.gmra.mxu0 %v1329_v24  ;;  %v1276_v5 = vmax.f32 %v1082_v29, 0.0 }
 0x238   :  { %v1084_v30 = vpop.f32.mrf.mxu1 }
 0x239   :  { %v1085_v45 = vadd.f32 %v3852_v40, %v1084_v30 }
 0x23a   :  { %v1086_v31 = vpop.f32.mrf.mxu1 }
 0x23b   :  { %v1277_v6 = vmax.f32 %v1085_v45, 0.0 }
 0x23c   :  { %v1089_v25 = vpop.f32.mrf.mxu1 }
 0x23d   :  { %v1330_v23 = vpack.c.bf16 %v1277_v6, %v1276_v5  ;;  %v1090_v34 = vadd.f32 %v3852_v40, %v1089_v25 }
 0x23e   :  { %v1091_v10 = vpop.f32.mrf.mxu1 }
 0x23f   :  { %3064 = vmatprep.mubr.bf16.mxu0 %v1330_v23  ;;  %v1278_v42 = vmax.f32 %v1090_v34, 0.0 }
 0x240   :  { %v1092_v39 = vpop.f32.mrf.mxu1 }
 0x241   :  { %v1093_v36 = vadd.f32 %v3852_v40, %v1092_v39 }
 0x242   :  { %v1094_v18 = vpop.f32.mrf.mxu1 }
 0x243   :  { %v1279_v61 = vmax.f32 %v1093_v36, 0.0 }
 0x244   :  { %v1097_v13 = vpop.f32.mrf.mxu1 }
 0x245   :  { %v1331_v33 = vpack.c.bf16 %v1279_v61, %v1278_v42  ;;  %v1098_v0 = vadd.f32 %v3852_v40, %v1097_v13 }
 0x246   :  { %v1099_v56 = vpop.f32.mrf.mxu1 }
 0x247   :  { %3065 = vmatmul.mubr.bf16.gmra.mxu0 %v1331_v33  ;;  %v1280_v47 = vmax.f32 %v1098_v0, 0.0 }
 0x248   :  { %v1100_v43 = vpop.f32.mrf.mxu1 }
 0x249   :  { %v1101_v15 = vadd.f32 %v3852_v40, %v1100_v43 }
 0x24a   :  { %v1102_v44 = vpop.f32.mrf.mxu1 }
 0x24b   :  { %v1281_v48 = vmax.f32 %v1101_v15, 0.0 }
 0x24c   :  { %v1105_v41 = vpop.f32.mrf.mxu1 }
 0x24d   :  { %v1332_v52 = vpack.c.bf16 %v1281_v48, %v1280_v47  ;;  %v1106_v54 = vadd.f32 %v3852_v40, %v1105_v41 }
 0x24e   :  { %v1107_v59 = vpop.f32.mrf.mxu1 }
 0x24f   :  { %3068 = vmatprep.mubr.bf16.mxu0 %v1332_v52  ;;  %v1282_v14 = vmax.f32 %v1106_v54, 0.0 }
 0x250   :  { %v1108_v2 = vpop.f32.mrf.mxu1 }
 0x251   :  { %v1109_v55 = vadd.f32 %v3852_v40, %v1108_v2 }
 0x252   :  { %v1110_v57 = vpop.f32.mrf.mxu1 }
 0x253   :  { %v1283_v28 = vmax.f32 %v1109_v55, 0.0 }
 0x254   :  { %v1113_v46 = vpop.f32.mrf.mxu1 }
 0x255   :  { %v1333_v58 = vpack.c.bf16 %v1283_v28, %v1282_v14  ;;  %v1114_v3 = vadd.f32 %v3852_v40, %v1113_v46 }
 0x256   :  { %v1115_v60 = vpop.f32.mrf.mxu1 }
 0x257   :  { %3069 = vmatmul.mubr.bf16.gmra.mxu0 %v1333_v58  ;;  %v1284_v1 = vmax.f32 %v1114_v3, 0.0 }
 0x258   :  { %v1116_v38 = vpop.f32.mrf.mxu1 }
 0x259   :  { %v1117_v63 = vadd.f32 %v3852_v40, %v1116_v38 }
 0x25a   :  { %v1118_v62 = vpop.f32.mrf.mxu1 }
 0x25b   :  { %v1285_v4 = vmax.f32 %v1117_v63, 0.0 }
 0x25c   :  { %v1121_v7 = vpop.f32.mrf.mxu1 }
 0x25d   :  { %v1334_v37 = vpack.c.bf16 %v1285_v4, %v1284_v1  ;;  %v1122_v9 = vadd.f32 %v3852_v40, %v1121_v7 }
 0x25e   :  { %v1123_v8 = vpop.f32.mrf.mxu1 }
 0x25f   :  { %3072 = vmatprep.mubr.bf16.mxu0 %v1334_v37  ;;  %v1286_v50 = vmax.f32 %v1122_v9, 0.0 }
 0x260   :  { %v1124_v32 = vpop.f32.mrf.mxu1 }
 0x261   :  { %v1125_v53 = vadd.f32 %v3852_v40, %v1124_v32 }
 0x262   :  { %v1126_v11 = vpop.f32.mrf.mxu1 }
 0x263   :  { %v1287_v16 = vmax.f32 %v1125_v53, 0.0 }
 0x264   :  { %v1129_v35 = vpop.f32.mrf.mxu1 }
 0x265   :  { %v1335_v26 = vpack.c.bf16 %v1287_v16, %v1286_v50  ;;  %v1130_v17 = vadd.f32 %v3852_v40, %v1129_v35 }
 0x266   :  { %v1131_v12 = vpop.f32.mrf.mxu1 }
 0x267   :  { %3073 = vmatmul.mubr.bf16.gmra.mxu0 %v1335_v26  ;;  %v1288_v20 = vmax.f32 %v1130_v17, 0.0 }
 0x268   :  { %v1132_v49 = vpop.f32.mrf.mxu1 }
 0x269   :  { %v1133_v19 = vadd.f32 %v3852_v40, %v1132_v49 }
 0x26a   :  { %v1134_v22 = vpop.f32.mrf.mxu1 }
 0x26b   :  { %v1289_v51 = vmax.f32 %v1133_v19, 0.0 }
 0x26c   :  { %v1137_v21 = vpop.f32.mrf.mxu1 }
 0x26d   :  { %v1336_v24 = vpack.c.bf16 %v1289_v51, %v1288_v20  ;;  %v1138_v29 = vadd.f32 %v3852_v40, %v1137_v21 }
 0x26e   :  { %v1139_v27 = vpop.f32.mrf.mxu1 }
 0x26f   :  { %3076 = vmatprep.mubr.bf16.mxu0 %v1336_v24  ;;  %v1290_v5 = vmax.f32 %v1138_v29, 0.0 }
 0x270   :  { %v1140_v30 = vpop.f32.mrf.mxu1 }
 0x271   :  { %v1141_v45 = vadd.f32 %v3852_v40, %v1140_v30 }
 0x272   :  { %v1142_v31 = vpop.f32.mrf.mxu1 }
 0x273   :  { %v1291_v6 = vmax.f32 %v1141_v45, 0.0 }
 0x274   :  { %v1145_v25 = vpop.f32.mrf.mxu1 }
 0x275   :  { %v1337_v23 = vpack.c.bf16 %v1291_v6, %v1290_v5  ;;  %v1146_v34 = vadd.f32 %v3852_v40, %v1145_v25 }
 0x276   :  { %v1147_v10 = vpop.f32.mrf.mxu1 }
 0x277   :  { %3077 = vmatmul.mubr.bf16.gmra.mxu0 %v1337_v23  ;;  %v1292_v42 = vmax.f32 %v1146_v34, 0.0 }
 0x278   :  { %v1148_v39 = vpop.f32.mrf.mxu1 }
 0x279   :  { %v1149_v36 = vadd.f32 %v3852_v40, %v1148_v39 }
 0x27a   :  { %v1150_v18 = vpop.f32.mrf.mxu1 }
 0x27b   :  { %v1293_v61 = vmax.f32 %v1149_v36, 0.0 }
 0x27c   :  { %v1153_v13 = vpop.f32.mrf.mxu1 }
 0x27d   :  { %v1338_v33 = vpack.c.bf16 %v1293_v61, %v1292_v42  ;;  %v1154_v0 = vadd.f32 %v3852_v40, %v1153_v13 }
 0x27e   :  { %v1155_v56 = vpop.f32.mrf.mxu1 }
 0x27f   :  { %3080 = vmatprep.mubr.bf16.mxu0 %v1338_v33  ;;  %v1294_v47 = vmax.f32 %v1154_v0, 0.0  ;;  %v3953_v56 = vld [vmem:[%s4555_s6] ss:$0 sm:$0xff]  ;;  %s3555_s6 = smov [#allocation10]  }
 0x280   :  { %v1156_v43 = vpop.f32.mrf.mxu1  ;;  %s2613_s25 = sshll.u32 %s3555_s6, 4  ;;  %s2614_s25 = int_to_ptr.vmem [resolvable:$true] %s2613_s25 }
 0x281   :  { %v1157_v15 = vadd.f32 %v3852_v40, %v1156_v43  ;;  %s3518_s26 = scalar_lea.vmem %s2614_s25, 4096  ;;  %p3523_p7 = scmp.lt.s32.totalorder %s2614_s25, %s2614_s25 }
 0x282   :  { %v1158_v44 = vpop.f32.mrf.mxu1  ;;  %p3519_p6 = scmp.ne.s32.totalorder %s2614_s25, %s3518_s26  ;;  %p3524_p8 = scmp.lt.s32.totalorder %s3518_s26, %s3518_s26 }
 0x283   :  { %v1295_v48 = vmax.f32 %v1157_v15, 0.0 }
 0x284   :  { %v1161_v41 = vpop.f32.mrf.mxu1  ;;  %p3525_p9 = por %p3524_p8, %p3523_p7 }
 0x285   :  { %v1339_v52 = vpack.c.bf16 %v1295_v48, %v1294_v47  ;;  %v1162_v54 = vadd.f32 %v3852_v40, %v1161_v41 }
 0x286   :  { %v1163_v59 = vpop.f32.mrf.mxu1  ;;  %p3526_p10 = pnand %p3525_p9, %p3519_p6 }
 0x287   :  { %3081 = vmatmul.mubr.bf16.gmra.mxu0 %v1339_v52  ;;  %v1296_v14 = vmax.f32 %v1162_v54, 0.0 }
 0x288   :  { %v1164_v2 = vpop.f32.mrf.mxu1 }
 0x289   :  { %v1165_v55 = vadd.f32 %v3852_v40, %v1164_v2 }
 0x28a   :  { %v1166_v57 = vpop.f32.mrf.mxu1 }
 0x28b   :  { %v1297_v28 = vmax.f32 %v1165_v55, 0.0 }
 0x28c   :  { %v1169_v46 = vpop.f32.mrf.mxu1 }
 0x28d   :  { %v1340_v58 = vpack.c.bf16 %v1297_v28, %v1296_v14  ;;  %v1170_v3 = vadd.f32 %v3852_v40, %v1169_v46 }
 0x28e   :  { %v1171_v60 = vpop.f32.mrf.mxu1 }
 0x28f   :  { %3084 = vmatprep.mubr.bf16.mxu0 %v1340_v58  ;;  %v1298_v1 = vmax.f32 %v1170_v3, 0.0 }
 0x290   :  { %v1172_v38 = vpop.f32.mrf.mxu1 }
 0x291   :  { %v1173_v63 = vadd.f32 %v3852_v40, %v1172_v38 }
 0x292   :  { %v1174_v62 = vpop.f32.mrf.mxu1 }
 0x293   :  { %v1299_v4 = vmax.f32 %v1173_v63, 0.0 }
 0x294   :  { %v1177_v7 = vpop.f32.mrf.mxu1 }
 0x295   :  { %v1341_v37 = vpack.c.bf16 %v1299_v4, %v1298_v1  ;;  %v1178_v9 = vadd.f32 %v3852_v40, %v1177_v7 }
 0x296   :  { %v1179_v8 = vpop.f32.mrf.mxu1 }
 0x297   :  { %3085 = vmatmul.mubr.bf16.gmra.mxu0 %v1341_v37  ;;  %v1300_v50 = vmax.f32 %v1178_v9, 0.0 }
 0x298   :  { %v1180_v32 = vpop.f32.mrf.mxu1 }
 0x299   :  { %v1181_v53 = vadd.f32 %v3852_v40, %v1180_v32 }
 0x29a   :  { %v1182_v11 = vpop.f32.mrf.mxu1 }
 0x29b   :  { %v1301_v16 = vmax.f32 %v1181_v53, 0.0 }
 0x29c   :  { %v1185_v35 = vpop.f32.mrf.mxu1 }
 0x29d   :  { %v1342_v26 = vpack.c.bf16 %v1301_v16, %v1300_v50  ;;  %v1186_v17 = vadd.f32 %v3852_v40, %v1185_v35 }
 0x29e   :  { %v1187_v12 = vpop.f32.mrf.mxu1 }
 0x29f   :  { %3088 = vmatprep.mubr.bf16.mxu0 %v1342_v26  ;;  %v1302_v20 = vmax.f32 %v1186_v17, 0.0 }
 0x2a0   :  { %v1188_v49 = vpop.f32.mrf.mxu1 }
 0x2a1   :  { %v1189_v19 = vadd.f32 %v3852_v40, %v1188_v49 }
 0x2a2   :  { %v1190_v22 = vpop.f32.mrf.mxu1 }
 0x2a3   :  { %v1303_v51 = vmax.f32 %v1189_v19, 0.0 }
 0x2a4   :  { %v1193_v21 = vpop.f32.mrf.mxu1 }
 0x2a5   :  { %v1343_v24 = vpack.c.bf16 %v1303_v51, %v1302_v20  ;;  %v1194_v29 = vadd.f32 %v3852_v40, %v1193_v21 }
 0x2a6   :  { %v1195_v27 = vpop.f32.mrf.mxu1 }
 0x2a7   :  { %3089 = vmatmul.mubr.bf16.gmra.mxu0 %v1343_v24  ;;  %v1304_v5 = vmax.f32 %v1194_v29, 0.0 }
 0x2a8   :  { %v1196_v30 = vpop.f32.mrf.mxu1 }
 0x2a9   :  { %v1197_v45 = vadd.f32 %v3852_v40, %v1196_v30 }
 0x2aa   :  { %v1198_v31 = vpop.f32.mrf.mxu1 }
 0x2ab   :  { %v1305_v6 = vmax.f32 %v1197_v45, 0.0 }
 0x2ac   :  { %v1201_v25 = vpop.f32.mrf.mxu1 }
 0x2ad   :  { %v1344_v23 = vpack.c.bf16 %v1305_v6, %v1304_v5  ;;  %v1202_v34 = vadd.f32 %v3852_v40, %v1201_v25 }
 0x2ae   :  { %v1203_v10 = vpop.f32.mrf.mxu1 }
 0x2af   :  { %3092 = vmatprep.mubr.bf16.mxu0 %v1344_v23  ;;  %v1306_v42 = vmax.f32 %v1202_v34, 0.0 }
 0x2b0   :  { %v1204_v39 = vpop.f32.mrf.mxu1 }
 0x2b1   :  { %v1205_v36 = vadd.f32 %v3852_v40, %v1204_v39 }
 0x2b2   :  { %v1206_v18 = vpop.f32.mrf.mxu1 }
 0x2b3   :  { %v1307_v61 = vmax.f32 %v1205_v36, 0.0 }
 0x2b4   :  { %v1209_v13 = vpop.f32.mrf.mxu1 }
 0x2b5   :  { %v1345_v33 = vpack.c.bf16 %v1307_v61, %v1306_v42  ;;  %v1210_v43 = vadd.f32 %v3852_v40, %v1209_v13 }
 0x2b6   :  { %v1211_v0 = vpop.f32.mrf.mxu1 }
 0x2b7   :  { %v3046_v15 = vpop.f32.mrf.mxu0  ;;  %3093 = vmatmul.mubr.bf16.gmra.mxu0 %v1345_v33  ;;  %v1308_v54 = vmax.f32 %v1210_v43, 0.0 }
 0x2b8   :  { %v3957_v44 = vadd.f32 %v3046_v15, %v3953_v56  ;;  %v1212_v47 = vpop.f32.mrf.mxu1 }
 0x2b9   :  { %v1213_v48 = vadd.f32 %v3852_v40, %v1212_v47  ;;  %v1457_v41 = vpop.f32.mrf.mxu0 }
 0x2ba   :  { %v3961_v52 = vadd.f32 %v3953_v56, %v1457_v41  ;;  %v1214_v59 = vpop.f32.mrf.mxu1  ;;  %1716 = vmax.xlane.f32.xlu1 %v3957_v44 }
 0x2bb   :  { %v1309_v2 = vmax.f32 %v1213_v48, 0.0  ;;  %v3047_v55 = vpop.f32.mrf.mxu0 }
 0x2bc   :  { %v3965_v57 = vadd.f32 %v3047_v55, %v3953_v56  ;;  %v1217_v14 = vpop.f32.mrf.mxu1  ;;  %1712 = vmax.xlane.f32.xlu0 %v3961_v52 }
 0x2bd   :  { %v1346_v28 = vpack.c.bf16 %v1309_v2, %v1308_v54  ;;  %v1460_v46 = vpop.f32.mrf.mxu0  ;;  %v1218_v3 = vadd.f32 %v3852_v40, %v1217_v14 }
 0x2be   :  { %v3969_v58 = vadd.f32 %v3953_v56, %v1460_v46  ;;  %v1219_v60 = vpop.f32.mrf.mxu1  ;;  %1718 = vmax.xlane.f32.xlu1 %v3965_v57 }
 0x2bf   :  { %3096 = vmatprep.mubr.bf16.mxu0 %v1346_v28  ;;  %v1310_v1 = vmax.f32 %v1218_v3, 0.0 }
 0x2c0   :  { %v1220_v38 = vpop.f32.mrf.mxu1  ;;  %1714 = vmax.xlane.f32.xlu0 %v3969_v58 }
 0x2c1   :  { %v1221_v63 = vadd.f32 %v3852_v40, %v1220_v38 }
 0x2c2   :  { %v1222_v62 = vpop.f32.mrf.mxu1 }
 0x2c3   :  { %v1311_v4 = vmax.f32 %v1221_v63, 0.0 }
 0x2c4   :  { %v1225_v7 = vpop.f32.mrf.mxu1 }
 0x2c5   :  { %v1347_v37 = vpack.c.bf16 %v1311_v4, %v1310_v1  ;;  %v1226_v9 = vadd.f32 %v3852_v40, %v1225_v7 }
 0x2c6   :  { %v1227_v8 = vpop.f32.mrf.mxu1 }
 0x2c7   :  { %v3050_v32 = vpop.f32.mrf.mxu0  ;;  %3097 = vmatmul.mubr.bf16.gmra.mxu0 %v1347_v37  ;;  %v1312_v26 = vmax.f32 %v1226_v9, 0.0 }
 0x2c8   :  { %v3977_v53 = vadd.f32 %v3050_v32, %v3953_v56  ;;  %v1228_v11 = vpop.f32.mrf.mxu1 }
 0x2c9   :  { %v1229_v50 = vadd.f32 %v3852_v40, %v1228_v11  ;;  %v1473_v16 = vpop.f32.mrf.mxu0 }
 0x2ca   :  { %v1230_v35 = vpop.f32.mrf.mxu1  ;;  %1724 = vmax.xlane.f32.xlu0 %v3977_v53  ;;  %v3982_v49 = vadd.f32 %v3953_v56, %v1473_v16 }
 0x2cb   :  { %v1313_v12 = vmax.f32 %v1229_v50, 0.0  ;;  %v3051_v17 = vpop.f32.mrf.mxu0 }
 0x2cc   :  { %v3985_v19 = vadd.f32 %v3051_v17, %v3953_v56  ;;  %v1233_v22 = vpop.f32.mrf.mxu1 }
 0x2cd   :  { %v1348_v20 = vpack.c.bf16 %v1313_v12, %v1312_v26  ;;  %v1476_v51 = vpop.f32.mrf.mxu0  ;;  %v1234_v24 = vadd.f32 %v3852_v40, %v1233_v22 }
 0x2ce   :  { %v1235_v21 = vpop.f32.mrf.mxu1  ;;  %1726 = vmax.xlane.f32.xlu1 %v3985_v19  ;;  %1720 = vmax.xlane.f32.xlu0 %v3982_v49  ;;  %v3991_v27 = vadd.f32 %v3953_v56, %v1476_v51 }
 0x2cf   :  { %3100 = vmatprep.mubr.bf16.mxu0 %v1348_v20  ;;  %v1314_v31 = vmax.f32 %v1234_v24, 0.0 }
 0x2d0   :  { %v1236_v29 = vpop.f32.mrf.mxu1 }
 0x2d1   :  { %v1237_v30 = vadd.f32 %v3852_v40, %v1236_v29 }
 0x2d2   :  { %v1238_v45 = vpop.f32.mrf.mxu1  ;;  %1722 = vmax.xlane.f32.xlu1 %v3991_v27 }
 0x2d3   :  { %v1315_v5 = vmax.f32 %v1237_v30, 0.0 }
 0x2d4   :  { %v1241_v6 = vpop.f32.mrf.mxu1 }
 0x2d5   :  { %v1349_v25 = vpack.c.bf16 %v1315_v5, %v1314_v31  ;;  %v1242_v10 = vadd.f32 %v3852_v40, %v1241_v6 }
 0x2d6   :  { %v1243_v23 = vpop.f32.mrf.mxu1 }
 0x2d7   :  { %v3054_v34 = vpop.f32.mrf.mxu0  ;;  %3101 = vmatmul.mubr.bf16.gmra.mxu0 %v1349_v25  ;;  %v1316_v13 = vmax.f32 %v1242_v10, 0.0 }
 0x2d8   :  { %v3997_v39 = vadd.f32 %v3054_v34, %v3953_v56  ;;  %v1244_v36 = vpop.f32.mrf.mxu1 }
 0x2d9   :  { %v1245_v18 = vadd.f32 %v3852_v40, %v1244_v36  ;;  %v1489_v42 = vpop.f32.mrf.mxu0 }
 0x2da   :  { %v1246_v61 = vpop.f32.mrf.mxu1  ;;  %1732 = vmax.xlane.f32.xlu0 %v3997_v39  ;;  %v4002_v43 = vadd.f32 %v3953_v56, %v1489_v42 }
 0x2db   :  { %v1317_v33 = vmax.f32 %v1245_v18, 0.0  ;;  %v3055_v0 = vpop.f32.mrf.mxu0 }
 0x2dc   :  { %v4005_v15 = vadd.f32 %v3055_v0, %v3953_v56  ;;  %v1249_v47 = vpop.f32.mrf.mxu1 }
 0x2dd   :  { %v1350_v48 = vpack.c.bf16 %v1317_v33, %v1316_v13  ;;  %v1492_v41 = vpop.f32.mrf.mxu0  ;;  %v1250_v54 = vadd.f32 %v3852_v40, %v1249_v47 }
 0x2de   :  { %v1251_v59 = vpop.f32.mrf.mxu1  ;;  %1734 = vmax.xlane.f32.xlu1 %v4005_v15  ;;  %1728 = vmax.xlane.f32.xlu0 %v4002_v43  ;;  %v4011_v2 = vadd.f32 %v3953_v56, %v1492_v41 }
 0x2df   :  { %3104 = vmatprep.mubr.bf16.mxu0 %v1350_v48  ;;  %v1318_v46 = vmax.f32 %v1250_v54, 0.0 }
 0x2e0   :  { %v1252_v55 = vpop.f32.mrf.mxu1 }
 0x2e1   :  { %v1253_v14 = vadd.f32 %v3852_v40, %v1252_v55 }
 0x2e2   :  { %v1254_v28 = vpop.f32.mrf.mxu1  ;;  %1730 = vmax.xlane.f32.xlu1 %v4011_v2 }
 0x2e3   :  { %v1319_v60 = vmax.f32 %v1253_v14, 0.0 }
 0x2e5   :  { %v1351_v3 = vpack.c.bf16 %v1319_v60, %v1318_v46 }
 0x2e7   :  { %v3058_v38 = vpop.f32.mrf.mxu0  ;;  %3105 = vmatmul.mubr.bf16.gmra.mxu0 %v1351_v3 }
 0x2e8   :  { %v4016_v63 = vadd.f32 %v3058_v38, %v3953_v56 }
 0x2e9   :  { %v1505_v62 = vpop.f32.mrf.mxu0 }
 0x2ea   :  { %1740 = vmax.xlane.f32.xlu0 %v4016_v63  ;;  %v4020_v4 = vadd.f32 %v3953_v56, %v1505_v62 }
 0x2eb   :  { %v3059_v1 = vpop.f32.mrf.mxu0 }
 0x2ec   :  { %v4023_v40 = vadd.f32 %v3059_v1, %v3953_v56 }
 0x2ed   :  { %v1508_v7 = vpop.f32.mrf.mxu0 }
 0x2ee   :  { %1742 = vmax.xlane.f32.xlu1 %v4023_v40  ;;  %1736 = vmax.xlane.f32.xlu0 %v4020_v4  ;;  %v4028_v37 = vadd.f32 %v3953_v56, %v1508_v7 }
 0x2f2   :  { %1738 = vmax.xlane.f32.xlu1 %v4028_v37 }
 0x2f7   :  { %v3062_v8 = vpop.f32.mrf.mxu0 }
 0x2f8   :  { %v4032_v9 = vadd.f32 %v3062_v8, %v3953_v56 }
 0x2f9   :  { %v1521_v32 = vpop.f32.mrf.mxu0 }
 0x2fa   :  { %1748 = vmax.xlane.f32.xlu0 %v4032_v9  ;;  %v4036_v50 = vadd.f32 %v3953_v56, %v1521_v32 }
 0x2fb   :  { %v3063_v11 = vpop.f32.mrf.mxu0 }
 0x2fc   :  { %v4039_v16 = vadd.f32 %v3063_v11, %v3953_v56 }
 0x2fd   :  { %v1524_v35 = vpop.f32.mrf.mxu0 }
 0x2fe   :  { %1750 = vmax.xlane.f32.xlu1 %v4039_v16  ;;  %1744 = vmax.xlane.f32.xlu0 %v4036_v50  ;;  %v4044_v26 = vadd.f32 %v3953_v56, %v1524_v35 }
 0x302   :  { %1746 = vmax.xlane.f32.xlu1 %v4044_v26 }
 0x307   :  { %v3066_v12 = vpop.f32.mrf.mxu0 }
 0x308   :  { %v4048_v17 = vadd.f32 %v3066_v12, %v3953_v56 }
 0x309   :  { %v1537_v22 = vpop.f32.mrf.mxu0 }
 0x30a   :  { %1756 = vmax.xlane.f32.xlu0 %v4048_v17  ;;  %v4052_v51 = vadd.f32 %v3953_v56, %v1537_v22 }
 0x30b   :  { %v3067_v20 = vpop.f32.mrf.mxu0 }
 0x30c   :  { %v4055_v21 = vadd.f32 %v3067_v20, %v3953_v56 }
 0x30d   :  { %v1540_v24 = vpop.f32.mrf.mxu0 }
 0x30e   :  { %1758 = vmax.xlane.f32.xlu1 %v4055_v21  ;;  %1752 = vmax.xlane.f32.xlu0 %v4052_v51  ;;  %v4060_v29 = vadd.f32 %v3953_v56, %v1540_v24 }
 0x312   :  { %1754 = vmax.xlane.f32.xlu1 %v4060_v29 }
 0x317   :  { %v3070_v30 = vpop.f32.mrf.mxu0 }
 0x318   :  { %v4064_v45 = vadd.f32 %v3070_v30, %v3953_v56 }
 0x319   :  { %v1553_v31 = vpop.f32.mrf.mxu0 }
 0x31a   :  { %1764 = vmax.xlane.f32.xlu0 %v4064_v45  ;;  %v4068_v6 = vadd.f32 %v3953_v56, %v1553_v31 }
 0x31b   :  { %v3071_v5 = vpop.f32.mrf.mxu0 }
 0x31c   :  { %v4071_v25 = vadd.f32 %v3071_v5, %v3953_v56 }
 0x31d   :  { %v1556_v23 = vpop.f32.mrf.mxu0 }
 0x31e   :  { %1766 = vmax.xlane.f32.xlu1 %v4071_v25  ;;  %1760 = vmax.xlane.f32.xlu0 %v4068_v6  ;;  %v4076_v10 = vadd.f32 %v3953_v56, %v1556_v23 }
 0x322   :  { %1762 = vmax.xlane.f32.xlu1 %v4076_v10 }
 0x327   :  { %v3074_v34 = vpop.f32.mrf.mxu0 }
 0x328   :  { %v4080_v36 = vadd.f32 %v3074_v34, %v3953_v56 }
 0x329   :  { %v1569_v18 = vpop.f32.mrf.mxu0 }
 0x32a   :  { %1772 = vmax.xlane.f32.xlu0 %v4080_v36  ;;  %v4084_v61 = vadd.f32 %v3953_v56, %v1569_v18 }
 0x32b   :  { %v3075_v42 = vpop.f32.mrf.mxu0 }
 0x32c   :  { %v4087_v13 = vadd.f32 %v3075_v42, %v3953_v56 }
 0x32d   :  { %v1572_v33 = vpop.f32.mrf.mxu0 }
 0x32e   :  { %1774 = vmax.xlane.f32.xlu1 %v4087_v13  ;;  %1768 = vmax.xlane.f32.xlu0 %v4084_v61  ;;  %v4092_v0 = vadd.f32 %v3953_v56, %v1572_v33 }
 0x332   :  { %1770 = vmax.xlane.f32.xlu1 %v4092_v0 }
 0x337   :  { %v3078_v47 = vpop.f32.mrf.mxu0 }
 0x338   :  { %v4096_v48 = vadd.f32 %v3078_v47, %v3953_v56 }
 0x339   :  { %v1585_v41 = vpop.f32.mrf.mxu0 }
 0x33a   :  { %1780 = vmax.xlane.f32.xlu0 %v4096_v48  ;;  %v4100_v54 = vadd.f32 %v3953_v56, %v1585_v41 }
 0x33b   :  { %v3079_v59 = vpop.f32.mrf.mxu0 }
 0x33c   :  { %v4103_v55 = vadd.f32 %v3079_v59, %v3953_v56 }
 0x33d   :  { %v1588_v14 = vpop.f32.mrf.mxu0 }
 0x33e   :  { %1782 = vmax.xlane.f32.xlu1 %v4103_v55  ;;  %1776 = vmax.xlane.f32.xlu0 %v4100_v54  ;;  %v4108_v28 = vadd.f32 %v3953_v56, %v1588_v14 }
 0x342   :  { %1778 = vmax.xlane.f32.xlu1 %v4108_v28 }
 0x343   :  { %v1717_v46 = vpop.xlane.xlu1 %1716 }
 0x344   :  { %v1842_v60 = vsub.f32 %v3957_v44, %v1717_v46 }
 0x345   :  { %v1713_v3 = vpop.xlane.xlu0 %1712 }
 0x346   :  { %v1908_v38 = vmul.f32 1.442695, %v1842_v60  ;;  %v1840_v62 = vsub.f32 %v3961_v52, %v1713_v3 }
 0x347   :  { %v1719_v1 = vpop.xlane.xlu1 %1718  ;;  %v3082_v7 = vpop.f32.mrf.mxu0 }
 0x348   :  { %3182 = vpow2.f32 %v1908_v38  ;;  %v1904_v8 = vmul.f32 1.442695, %v1840_v62  ;;  %v1843_v32 = vsub.f32 %v3965_v57, %v1719_v1  ;;  %v4115_v11 = vadd.f32 %v3082_v7, %v3953_v56 }
 0x349   :  { %v1601_v35 = vpop.f32.mrf.mxu0  ;;  %v1715_v12 = vpop.xlane.xlu0 %1714 }
 0x34a   :  { %v1910_v22 = vmul.f32 1.442695, %v1843_v32  ;;  %v1841_v20 = vsub.f32 %v3969_v58, %v1715_v12  ;;  %1788 = vmax.xlane.f32.xlu0 %v4115_v11  ;;  %3184 = vpow2.f32 %v1904_v8  ;;  %v4120_v52 = vadd.f32 %v3953_v56, %v1601_v35 }
 0x34b   :  { %v3083_v44 = vpop.f32.mrf.mxu0 }
 0x34c   :  { %3186 = vpow2.f32 %v1910_v22  ;;  %v1906_v24 = vmul.f32 1.442695, %v1841_v20  ;;  %v4123_v30 = vadd.f32 %v3083_v44, %v3953_v56 }
 0x34d   :  { %v1604_v57 = vpop.f32.mrf.mxu0 }
 0x34e   :  { %1790 = vmax.xlane.f32.xlu1 %v4123_v30  ;;  %1784 = vmax.xlane.f32.xlu0 %v4120_v52  ;;  %3188 = vpow2.f32 %v1906_v24  ;;  %v4128_v58 = vadd.f32 %v3953_v56, %v1604_v57 }
 0x352   :  { %1786 = vmax.xlane.f32.xlu1 %v4128_v58 }
 0x353   :  { %v1725_v31 = vpop.xlane.xlu0 %1724 }
 0x354   :  { %v1846_v5 = vsub.f32 %v3977_v53, %v1725_v31 }
 0x355   :  { %v4132_v23 = vpop.eup %3182 }
 0x356   :  { %v1916_v34 = vmul.f32 1.442695, %v1846_v5  ;;  %2036 = vadd.xlane.f32.xlu0 %v4132_v23 }
 0x357   :  { %v1727_v18 = vpop.xlane.xlu1 %1726  ;;  %v3086_v42 = vpop.f32.mrf.mxu0 }
 0x358   :  { %v4135_v33 = vpop.eup %3184  ;;  %3190 = vpow2.f32 %v1916_v34  ;;  %v1847_v47 = vsub.f32 %v3985_v19, %v1727_v18  ;;  %v1721_v41 = vpop.xlane.xlu0 %1720  ;;  %v4144_v38 = vadd.f32 %v3086_v42, %v3953_v56 }
 0x359   :  { %v4138_v59 = vpop.eup %3186  ;;  %v1844_v14 = vsub.f32 %v3982_v49, %v1721_v41  ;;  %v1617_v46 = vpop.f32.mrf.mxu0 }
 0x35a   :  { %v1918_v60 = vmul.f32 1.442695, %v1847_v47  ;;  %2038 = vadd.xlane.f32.xlu1 %v4138_v59  ;;  %2032 = vadd.xlane.f32.xlu0 %v4135_v33  ;;  %v4152_v49 = vadd.f32 %v3953_v56, %v1617_v46 }
 0x35b   :  { %v1912_v53 = vmul.f32 1.442695, %v1844_v14  ;;  %v1723_v3 = vpop.xlane.xlu1 %1722  ;;  %v4147_v19 = vpop.eup %3188 }
 0x35c   :  { %3192 = vpow2.f32 %v1918_v60  ;;  %v1845_v62 = vsub.f32 %v3991_v27, %v1723_v3  ;;  %v3087_v1 = vpop.f32.mrf.mxu0 }
 0x35d   :  { %3194 = vpow2.f32 %v1912_v53  ;;  %v4155_v8 = vadd.f32 %v3087_v1, %v3953_v56 }
 0x35e   :  { %v1914_v7 = vmul.f32 1.442695, %v1845_v62  ;;  %1796 = vmax.xlane.f32.xlu0 %v4144_v38  ;;  %2034 = vadd.xlane.f32.xlu1 %v4147_v19  ;;  %v1620_v32 = vpop.f32.mrf.mxu0 }
 0x35f   :  { %v4160_v35 = vadd.f32 %v3953_v56, %v1620_v32 }
 0x360   :  { %3196 = vpow2.f32 %v1914_v7 }
 0x362   :  { %1792 = vmax.xlane.f32.xlu0 %v4152_v49  ;;  %1798 = vmax.xlane.f32.xlu1 %v4155_v8 }
 0x363   :  { %v1733_v27 = vpop.xlane.xlu0 %1732 }
 0x364   :  { %v1850_v12 = vsub.f32 %v3997_v39, %v1733_v27 }
 0x365   :  { %v4163_v22 = vpop.eup %3190 }
 0x366   :  { %v1924_v20 = vmul.f32 1.442695, %v1850_v12  ;;  %1794 = vmax.xlane.f32.xlu1 %v4160_v35  ;;  %2044 = vadd.xlane.f32.xlu0 %v4163_v22 }
 0x367   :  { %v3090_v44 = vpop.f32.mrf.mxu0  ;;  %v1735_v24 = vpop.xlane.xlu1 %1734 }
 0x368   :  { %3198 = vpow2.f32 %v1924_v20  ;;  %v1851_v57 = vsub.f32 %v4005_v15, %v1735_v24  ;;  %v1729_v31 = vpop.xlane.xlu0 %1728  ;;  %v4179_v15 = vadd.f32 %v3090_v44, %v3953_v56 }
 0x369   :  { %v4168_v5 = vpop.eup %3192  ;;  %v1848_v34 = vsub.f32 %v4002_v43, %v1729_v31  ;;  %v1633_v18 = vpop.f32.mrf.mxu0 }
 0x36a   :  { %v4171_v42 = vpop.eup %3194  ;;  %v1926_v39 = vmul.f32 1.442695, %v1851_v57  ;;  %2046 = vadd.xlane.f32.xlu1 %v4168_v5  ;;  %v4187_v3 = vadd.f32 %v3953_v56, %v1633_v18 }
 0x36b   :  { %v1920_v47 = vmul.f32 1.442695, %v1848_v34  ;;  %2040 = vadd.xlane.f32.xlu0 %v4171_v42  ;;  %v1731_v41 = vpop.xlane.xlu1 %1730  ;;  %v3091_v43 = vpop.f32.mrf.mxu0 }
 0x36c   :  { %3200 = vpow2.f32 %v1926_v39  ;;  %v1849_v14 = vsub.f32 %v4011_v2, %v1731_v41  ;;  %v4184_v53 = vadd.f32 %v3091_v43, %v3953_v56 }
 0x36d   :  { %v4176_v46 = vpop.eup %3196  ;;  %3202 = vpow2.f32 %v1920_v47  ;;  %v1636_v2 = vpop.f32.mrf.mxu0 }
 0x36e   :  { %v1922_v60 = vmul.f32 1.442695, %v1849_v14  ;;  %2042 = vadd.xlane.f32.xlu1 %v4176_v46  ;;  %v4192_v1 = vadd.f32 %v3953_v56, %v1636_v2 }
 0x36f   :  { %1804 = vmax.xlane.f32.xlu0 %v4179_v15 }
 0x370   :  { %3204 = vpow2.f32 %v1922_v60 }
 0x372   :  { %1806 = vmax.xlane.f32.xlu1 %v4184_v53 }
 0x373   :  { %1800 = vmax.xlane.f32.xlu0 %v4187_v3  ;;  %v1741_v62 = vpop.xlane.xlu0 %1740 }
 0x374   :  { %v1854_v7 = vsub.f32 %v4016_v63, %v1741_v62 }
 0x375   :  { %v4195_v32 = vpop.eup %3198 }
 0x376   :  { %v1932_v27 = vmul.f32 1.442695, %v1854_v7  ;;  %1802 = vmax.xlane.f32.xlu1 %v4192_v1 }
 0x377   :  { %2052 = vadd.xlane.f32.xlu0 %v4195_v32  ;;  %v3094_v12 = vpop.f32.mrf.mxu0  ;;  %v1743_v20 = vpop.xlane.xlu1 %1742 }
 0x378   :  { %3206 = vpow2.f32 %v1932_v27  ;;  %v1855_v44 = vsub.f32 %v4023_v40, %v1743_v20  ;;  %v1737_v24 = vpop.xlane.xlu0 %1736  ;;  %v4211_v40 = vadd.f32 %v3094_v12, %v3953_v56 }
 0x379   :  { %v4200_v57 = vpop.eup %3200  ;;  %v1852_v31 = vsub.f32 %v4020_v4, %v1737_v24  ;;  %v1649_v34 = vpop.f32.mrf.mxu0 }
 0x37a   :  { %v4203_v18 = vpop.eup %3202  ;;  %v1934_v63 = vmul.f32 1.442695, %v1855_v44  ;;  %2054 = vadd.xlane.f32.xlu1 %v4200_v57  ;;  %v4219_v2 = vadd.f32 %v3953_v56, %v1649_v34 }
 0x37b   :  { %v1928_v39 = vmul.f32 1.442695, %v1852_v31  ;;  %2048 = vadd.xlane.f32.xlu0 %v4203_v18  ;;  %v1739_v47 = vpop.xlane.xlu1 %1738  ;;  %v3095_v4 = vpop.f32.mrf.mxu0 }
 0x37c   :  { %3208 = vpow2.f32 %v1934_v63  ;;  %v1853_v41 = vsub.f32 %v4028_v37, %v1739_v47  ;;  %v4216_v60 = vadd.f32 %v3095_v4, %v3953_v56 }
 0x37d   :  { %v4208_v14 = vpop.eup %3204  ;;  %3210 = vpow2.f32 %v1928_v39  ;;  %v1652_v37 = vpop.f32.mrf.mxu0 }
 0x37e   :  { %v1930_v43 = vmul.f32 1.442695, %v1853_v41  ;;  %2050 = vadd.xlane.f32.xlu1 %v4208_v14  ;;  %v4224_v7 = vadd.f32 %v3953_v56, %v1652_v37 }
 0x37f   :  { %1812 = vmax.xlane.f32.xlu0 %v4211_v40 }
 0x380   :  { %3212 = vpow2.f32 %v1930_v43 }
 0x382   :  { %1814 = vmax.xlane.f32.xlu1 %v4216_v60 }
 0x383   :  { %1808 = vmax.xlane.f32.xlu0 %v4219_v2  ;;  %v1749_v62 = vpop.xlane.xlu0 %1748 }
 0x384   :  { %v1858_v27 = vsub.f32 %v4032_v9, %v1749_v62 }
 0x385   :  { %v4227_v12 = vpop.eup %3206 }
 0x386   :  { %4569 = vst [vmem:[#allocation15_spill] sm:$0xff] %v4227_v12  ;;  %v1940_v20 = vmul.f32 1.442695, %v1858_v27  ;;  %1810 = vmax.xlane.f32.xlu1 %v4224_v7 }
 0x387   :  { %2060 = vadd.xlane.f32.xlu0 %v4227_v12  ;;  %v3098_v44 = vpop.f32.mrf.mxu0  ;;  %v1751_v24 = vpop.xlane.xlu1 %1750 }
 0x388   :  { %3214 = vpow2.f32 %v1940_v20  ;;  %v1859_v31 = vsub.f32 %v4039_v16, %v1751_v24  ;;  %v1745_v34 = vpop.xlane.xlu0 %1744  ;;  %v4243_v16 = vadd.f32 %v3098_v44, %v3953_v56 }
 0x389   :  { %v4232_v63 = vpop.eup %3208  ;;  %v1856_v39 = vsub.f32 %v4036_v50, %v1745_v34  ;;  %v1665_v47 = vpop.f32.mrf.mxu0 }
 0x38a   :  { %4570 = vst [vmem:[#allocation16_spill] sm:$0xff] %v4232_v63  ;;  %v4235_v41 = vpop.eup %3210  ;;  %v1942_v9 = vmul.f32 1.442695, %v1859_v31  ;;  %2062 = vadd.xlane.f32.xlu1 %v4232_v63  ;;  %v4251_v24 = vadd.f32 %v3953_v56, %v1665_v47 }
 0x38b   :  { %4571 = vst [vmem:[#allocation17_spill] sm:$0xff] %v4235_v41  ;;  %v1936_v4 = vmul.f32 1.442695, %v1856_v39  ;;  %2056 = vadd.xlane.f32.xlu0 %v4235_v41  ;;  %v1747_v43 = vpop.xlane.xlu1 %1746  ;;  %v3099_v50 = vpop.f32.mrf.mxu0 }
 0x38c   :  { %3216 = vpow2.f32 %v1942_v9  ;;  %v1857_v37 = vsub.f32 %v4044_v26, %v1747_v43  ;;  %v4248_v20 = vadd.f32 %v3099_v50, %v3953_v56 }
 0x38d   :  { %v4240_v62 = vpop.eup %3212  ;;  %3218 = vpow2.f32 %v1936_v4  ;;  %v1668_v26 = vpop.f32.mrf.mxu0 }
 0x38e   :  { %4572 = vst [vmem:[#allocation18_spill] sm:$0xff] %v4240_v62  ;;  %v1938_v27 = vmul.f32 1.442695, %v1857_v37  ;;  %2058 = vadd.xlane.f32.xlu1 %v4240_v62  ;;  %v4256_v31 = vadd.f32 %v3953_v56, %v1668_v26 }
 0x38f   :  { %1820 = vmax.xlane.f32.xlu0 %v4243_v16 }
 0x390   :  { %3220 = vpow2.f32 %v1938_v27 }
 0x392   :  { %1822 = vmax.xlane.f32.xlu1 %v4248_v20 }
 0x393   :  { %1816 = vmax.xlane.f32.xlu0 %v4251_v24  ;;  %v1757_v44 = vpop.xlane.xlu0 %1756 }
 0x394   :  { %v1862_v41 = vsub.f32 %v4048_v17, %v1757_v44 }
 0x395   :  { %v4258_v34 = vpop.eup %3214 }
 0x396   :  { %4573 = vst [vmem:[#allocation19_spill] sm:$0xff] %v4258_v34  ;;  %1818 = vmax.xlane.f32.xlu1 %v4256_v31  ;;  %v1948_v12 = vmul.f32 1.442695, %v1862_v41 }
 0x397   :  { %2068 = vadd.xlane.f32.xlu0 %v4258_v34  ;;  %v3102_v39 = vpop.f32.mrf.mxu0  ;;  %v1759_v9 = vpop.xlane.xlu1 %1758 }
 0x398   :  { %v1753_v47 = vpop.xlane.xlu0 %1752  ;;  %v4272_v26 = vadd.f32 %v3102_v39, %v3953_v56  ;;  %v1863_v39 = vsub.f32 %v4055_v21, %v1759_v9 }
 0x399   :  { %v4262_v4 = vpop.eup %3216  ;;  %v1681_v43 = vpop.f32.mrf.mxu0  ;;  %v1860_v50 = vsub.f32 %v4052_v51, %v1753_v47 }
 0x39a   :  { %4574 = vst [vmem:[#allocation20_spill] sm:$0xff] %v4262_v4  ;;  %v4264_v37 = vpop.eup %3218  ;;  %2070 = vadd.xlane.f32.xlu1 %v4262_v4  ;;  %v4282_v51 = vadd.f32 %v3953_v56, %v1681_v43 }
 0x39b   :  { %4575 = vst [vmem:[#allocation21_spill] sm:$0xff] %v4264_v37  ;;  %2064 = vadd.xlane.f32.xlu0 %v4264_v37  ;;  %v3103_v34 = vpop.f32.mrf.mxu0  ;;  %v1755_v62 = vpop.xlane.xlu1 %1754  ;;  %v1944_v63 = vmul.f32 1.442695, %v1860_v50 }
 0x39c   :  { %v4278_v4 = vadd.f32 %v3103_v34, %v3953_v56  ;;  %v1861_v37 = vsub.f32 %v4060_v29, %v1755_v62  ;;  %v1950_v29 = vmul.f32 1.442695, %v1863_v39 }
 0x39d   :  { %v4269_v27 = vpop.eup %3220  ;;  %v1684_v47 = vpop.f32.mrf.mxu0  ;;  %3222 = vpow2.f32 %v1944_v63 }
 0x39e   :  { %2066 = vadd.xlane.f32.xlu1 %v4269_v27  ;;  %v1946_v44 = vmul.f32 1.442695, %v1861_v37  ;;  %v4288_v50 = vadd.f32 %v3953_v56, %v1684_v47  ;;  %3224 = vpow2.f32 %v1948_v12 }
 0x39f   :  { %1828 = vmax.xlane.f32.xlu0 %v4272_v26 }
 0x3a0   :  { %3226 = vpow2.f32 %v1946_v44 }
 0x3a1   :  { %3228 = vpow2.f32 %v1950_v29 }
 0x3a2   :  { %1830 = vmax.xlane.f32.xlu1 %v4278_v4 }
 0x3a3   :  { %1824 = vmax.xlane.f32.xlu0 %v4282_v51  ;;  %v1765_v17 = vpop.xlane.xlu0 %1764 }
 0x3a4   :  { %v1866_v34 = vsub.f32 %v4064_v45, %v1765_v17 }
 0x3a6   :  { %1826 = vmax.xlane.f32.xlu1 %v4288_v50  ;;  %v1956_v62 = vmul.f32 1.442695, %v1866_v34 }
 0x3a7   :  { %v3106_v43 = vpop.f32.mrf.mxu0  ;;  %v1767_v21 = vpop.xlane.xlu1 %1766 }
 0x3a8   :  { %v4293_v41 = vadd.f32 %v3106_v43, %v3953_v56  ;;  %v1867_v9 = vsub.f32 %v4071_v25, %v1767_v21  ;;  %v1761_v63 = vpop.xlane.xlu0 %1760  ;;  %3230 = vpow2.f32 %v1956_v62 }
 0x3a9   :  { %v1864_v37 = vsub.f32 %v4068_v6, %v1761_v63  ;;  %v1697_v47 = vpop.f32.mrf.mxu0 }
 0x3aa   :  { %1836 = vmax.xlane.f32.xlu0 %v4293_v41  ;;  %v1958_v45 = vmul.f32 1.442695, %v1867_v9  ;;  %v4299_v34 = vadd.f32 %v3953_v56, %v1697_v47  ;;  %v4310_v62 = vpop.eup %3222 }
 0x3ab   :  { %v3107_v39 = vpop.f32.mrf.mxu0  ;;  %v1763_v12 = vpop.xlane.xlu1 %1762  ;;  %v1952_v17 = vmul.f32 1.442695, %v1864_v37 }
 0x3ac   :  { %v4302_v44 = vadd.f32 %v3107_v39, %v3953_v56  ;;  %v1865_v25 = vsub.f32 %v4076_v10, %v1763_v12  ;;  %3232 = vpow2.f32 %v1958_v45  ;;  %v4314_v9 = vpop.eup %3224 }
 0x3ad   :  { %v1700_v43 = vpop.f32.mrf.mxu0  ;;  %3234 = vpow2.f32 %v1952_v17  ;;  %v4317_v63 = vpop.eup %3226 }
 0x3ae   :  { %1838 = vmax.xlane.f32.xlu1 %v4302_v44  ;;  %1832 = vmax.xlane.f32.xlu0 %v4299_v34  ;;  %v1954_v6 = vmul.f32 1.442695, %v1865_v25  ;;  %v4308_v29 = vadd.f32 %v3953_v56, %v1700_v43  ;;  %v4321_v56 = vpop.eup %3228 }
 0x3b0   :  { %3236 = vpow2.f32 %v1954_v6 }
 0x3b2   :  { %1834 = vmax.xlane.f32.xlu1 %v4308_v29  ;;  %2072 = vadd.xlane.f32.xlu0 %v4310_v62 }
 0x3b3   :  { %v1773_v21 = vpop.xlane.xlu0 %1772 }
 0x3b4   :  { %v1870_v10 = vsub.f32 %v4080_v36, %v1773_v21 }
 0x3b5   :  { %v4323_v39 = vpop.eup %3230 }
 0x3b6   :  { %v1964_v37 = vmul.f32 1.442695, %v1870_v10  ;;  %2074 = vadd.xlane.f32.xlu1 %v4317_v63  ;;  %2076 = vadd.xlane.f32.xlu0 %v4314_v9 }
 0x3b7   :  { %v1775_v47 = vpop.xlane.xlu1 %1774  ;;  %v1769_v45 = vpop.xlane.xlu0 %1768 }
 0x3b8   :  { %3238 = vpow2.f32 %v1964_v37  ;;  %v1871_v12 = vsub.f32 %v4087_v13, %v1775_v47  ;;  %v1868_v17 = vsub.f32 %v4084_v61, %v1769_v45 }
 0x3b9   :  { %v4329_v6 = vpop.eup %3232 }
 0x3ba   :  { %v1966_v25 = vmul.f32 1.442695, %v1871_v12  ;;  %v1960_v36 = vmul.f32 1.442695, %v1868_v17  ;;  %2078 = vadd.xlane.f32.xlu1 %v4321_v56  ;;  %2084 = vadd.xlane.f32.xlu0 %v4323_v39  ;;  %v4332_v10 = vpop.eup %3234 }
 0x3bb   :  { %v1771_v43 = vpop.xlane.xlu1 %1770 }
 0x3bc   :  { %3240 = vpow2.f32 %v1966_v25  ;;  %v1869_v21 = vsub.f32 %v4092_v0, %v1771_v43 }
 0x3bd   :  { %3242 = vpow2.f32 %v1960_v36  ;;  %v4336_v61 = vpop.eup %3236 }
 0x3be   :  { %v1962_v37 = vmul.f32 1.442695, %v1869_v21  ;;  %2086 = vadd.xlane.f32.xlu1 %v4329_v6  ;;  %2080 = vadd.xlane.f32.xlu0 %v4332_v10  ;;  %4576 = vst [vmem:[#allocation22_spill] sm:$0xff] %v4336_v61 }
 0x3c0   :  { %3244 = vpow2.f32 %v1962_v37 }
 0x3c2   :  { %2082 = vadd.xlane.f32.xlu1 %v4336_v61 }
 0x3c3   :  { %v1781_v13 = vpop.xlane.xlu0 %1780 }
 0x3c4   :  { %v1874_v47 = vsub.f32 %v4096_v48, %v1781_v13 }
 0x3c5   :  { %v4340_v45 = vpop.eup %3238 }
 0x3c6   :  { %v1972_v12 = vmul.f32 1.442695, %v1874_v47  ;;  %2092 = vadd.xlane.f32.xlu0 %v4340_v45 }
 0x3c7   :  { %v1783_v0 = vpop.xlane.xlu1 %1782  ;;  %v1777_v17 = vpop.xlane.xlu0 %1776 }
 0x3c8   :  { %3246 = vpow2.f32 %v1972_v12  ;;  %v1875_v25 = vsub.f32 %v4103_v55, %v1783_v0  ;;  %v1872_v36 = vsub.f32 %v4100_v54, %v1777_v17 }
 0x3c9   :  { %v4345_v43 = vpop.eup %3240 }
 0x3ca   :  { %v4347_v21 = vpop.eup %3242  ;;  %v1974_v37 = vmul.f32 1.442695, %v1875_v25  ;;  %v1968_v61 = vmul.f32 1.442695, %v1872_v36  ;;  %2094 = vadd.xlane.f32.xlu1 %v4345_v43 }
 0x3cb   :  { %2088 = vadd.xlane.f32.xlu0 %v4347_v21  ;;  %v1779_v48 = vpop.xlane.xlu1 %1778 }
 0x3cc   :  { %3248 = vpow2.f32 %v1974_v37  ;;  %v1873_v13 = vsub.f32 %v4108_v28, %v1779_v48 }
 0x3cd   :  { %v4352_v47 = vpop.eup %3244  ;;  %3250 = vpow2.f32 %v1968_v61 }
 0x3ce   :  { %v1970_v55 = vmul.f32 1.442695, %v1873_v13  ;;  %2090 = vadd.xlane.f32.xlu1 %v4352_v47 }
 0x3d0   :  { %3252 = vpow2.f32 %v1970_v55 }
 0x3d3   :  { %v1789_v54 = vpop.xlane.xlu0 %1788 }
 0x3d4   :  { %v1878_v12 = vsub.f32 %v4115_v11, %v1789_v54 }
 0x3d5   :  { %v4356_v0 = vpop.eup %3246 }
 0x3d6   :  { %v1980_v17 = vmul.f32 1.442695, %v1878_v12  ;;  %2100 = vadd.xlane.f32.xlu0 %v4356_v0 }
 0x3d7   :  { %v1791_v25 = vpop.xlane.xlu1 %1790  ;;  %v1785_v36 = vpop.xlane.xlu0 %1784 }
 0x3d8   :  { %3254 = vpow2.f32 %v1980_v17  ;;  %v1879_v28 = vsub.f32 %v4123_v30, %v1791_v25  ;;  %v1876_v37 = vsub.f32 %v4120_v52, %v1785_v36 }
 0x3d9   :  { %v4361_v61 = vpop.eup %3248 }
 0x3da   :  { %v4363_v48 = vpop.eup %3250  ;;  %v1982_v13 = vmul.f32 1.442695, %v1879_v28  ;;  %v1976_v55 = vmul.f32 1.442695, %v1876_v37  ;;  %2102 = vadd.xlane.f32.xlu1 %v4361_v61 }
 0x3db   :  { %2096 = vadd.xlane.f32.xlu0 %v4363_v48  ;;  %v1787_v11 = vpop.xlane.xlu1 %1786 }
 0x3dc   :  { %3256 = vpow2.f32 %v1982_v13  ;;  %v1877_v54 = vsub.f32 %v4128_v58, %v1787_v11 }
 0x3dd   :  { %v4368_v12 = vpop.eup %3252  ;;  %3258 = vpow2.f32 %v1976_v55 }
 0x3de   :  { %v1978_v30 = vmul.f32 1.442695, %v1877_v54  ;;  %2098 = vadd.xlane.f32.xlu1 %v4368_v12 }
 0x3df   :  { %v2037_v52 = vpop.xlane.xlu0 %2036 }
 0x3e0   :  { %3260 = vpow2.f32 %v1978_v30 }
 0x3e1   :  { %3262 = vrcp.f32 %v2037_v52 }
 0x3e3   :  { %v2039_v17 = vpop.xlane.xlu1 %2038  ;;  %v2033_v25 = vpop.xlane.xlu0 %2032 }
 0x3e4   :  { %3264 = vrcp.f32 %v2039_v17 }
 0x3e5   :  { %v4371_v36 = vpop.eup %3254  ;;  %3266 = vrcp.f32 %v2033_v25 }
 0x3e6   :  { %4577 = vst [vmem:[#allocation23_spill] sm:$0xff] %v4371_v36  ;;  %2108 = vadd.xlane.f32.xlu0 %v4371_v36 }
 0x3e7   :  { %v2035_v28 = vpop.xlane.xlu1 %2034  ;;  %v1797_v37 = vpop.xlane.xlu0 %1796 }
 0x3e8   :  { %3268 = vrcp.f32 %v2035_v28  ;;  %v1882_v58 = vsub.f32 %v4144_v38, %v1797_v37 }
 0x3e9   :  { %v4375_v13 = vpop.eup %3256 }
 0x3ea   :  { %4578 = vst [vmem:[#allocation24_spill] sm:$0xff] %v4375_v13  ;;  %v4377_v55 = vpop.eup %3258  ;;  %v1988_v11 = vmul.f32 1.442695, %v1882_v58  ;;  %2110 = vadd.xlane.f32.xlu1 %v4375_v13 }
 0x3eb   :  { %4579 = vst [vmem:[#allocation25_spill] sm:$0xff] %v4377_v55  ;;  %2104 = vadd.xlane.f32.xlu0 %v4377_v55  ;;  %v1799_v54 = vpop.xlane.xlu1 %1798  ;;  %v1793_v30 = vpop.xlane.xlu0 %1792 }
 0x3ec   :  { %3270 = vpow2.f32 %v1988_v11  ;;  %v1883_v52 = vsub.f32 %v4155_v8, %v1799_v54  ;;  %v1880_v17 = vsub.f32 %v4152_v49, %v1793_v30 }
 0x3ed   :  { %v4383_v25 = vpop.eup %3260 }
 0x3ee   :  { %4580 = vst [vmem:[#allocation26_spill] sm:$0xff] %v4383_v25  ;;  %v1990_v28 = vmul.f32 1.442695, %v1883_v52  ;;  %v1984_v38 = vmul.f32 1.442695, %v1880_v17  ;;  %2106 = vadd.xlane.f32.xlu1 %v4383_v25  ;;  %v3263_v37 = vpop.eup %3262 }
 0x3ef   :  { %v1795_v36 = vpop.xlane.xlu1 %1794  ;;  %v2045_v58 = vpop.xlane.xlu0 %2044  ;;  %v2226_v11 = vmul.f32 %v3263_v37, %v4132_v23 }
 0x3f0   :  { %3272 = vpow2.f32 %v1990_v28  ;;  %v1881_v13 = vsub.f32 %v4160_v35, %v1795_v36 }
 0x3f1   :  { %v3265_v55 = vpop.eup %3264  ;;  %3274 = vpow2.f32 %v1984_v38 }
 0x3f2   :  { %v2227_v8 = vmul.f32 %v3265_v55, %v4138_v59  ;;  %v1986_v54 = vmul.f32 1.442695, %v1881_v13  ;;  %v3267_v49 = vpop.eup %3266  ;;  %3276 = vrcp.f32 %v2045_v58 }
 0x3f3   :  { %v2047_v30 = vpop.xlane.xlu1 %2046  ;;  %v2224_v28 = vmul.f32 %v3267_v49, %v4135_v33 }
 0x3f4   :  { %v2805_v52 = vpack.c.bf16 %v2227_v8, %v2226_v11  ;;  %3278 = vpow2.f32 %v1986_v54  ;;  %v2041_v17 = vpop.xlane.xlu0 %2040 }
 0x3f5   :  { %v3269_v25 = vpop.eup %3268  ;;  %3280 = vrcp.f32 %v2047_v30 }
 0x3f6   :  { %2957 = vst [vmem:[#allocation10 + $0x8] sm:$0xff] %v2805_v52   ;;  %v2225_v35 = vmul.f32 %v3269_v25, %v4147_v19  ;;  %3282 = vrcp.f32 %v2041_v17 }
 0x3f7   :  { %v2043_v36 = vpop.xlane.xlu1 %2042 }
 0x3f8   :  { %v2800_v38 = vpack.c.bf16 %v2225_v35, %v2224_v28  ;;  %3284 = vrcp.f32 %v2043_v36  ;;  %v1805_v23 = vpop.xlane.xlu0 %1804 }
 0x3f9   :  { %v4391_v59 = vpop.eup %3270  ;;  %v1886_v13 = vsub.f32 %v4179_v15, %v1805_v23 }
 0x3fa   :  { %2801 = vst [vmem:[#allocation10] sm:$0xff] %v2800_v38   ;;  %2116 = vadd.xlane.f32.xlu0 %v4391_v59 }
 0x3fb   :  { %v1996_v55 = vmul.f32 1.442695, %v1886_v13  ;;  %v1807_v37 = vpop.xlane.xlu1 %1806 }
 0x3fc   :  { %v1887_v58 = vsub.f32 %v4184_v53, %v1807_v37  ;;  %v1801_v11 = vpop.xlane.xlu0 %1800 }
 0x3fd   :  { %v4396_v33 = vpop.eup %3272  ;;  %3286 = vpow2.f32 %v1996_v55  ;;  %v1884_v19 = vsub.f32 %v4187_v3, %v1801_v11 }
 0x3fe   :  { %v4399_v25 = vpop.eup %3274  ;;  %v1998_v8 = vmul.f32 1.442695, %v1887_v58  ;;  %2118 = vadd.xlane.f32.xlu1 %v4396_v33 }
 0x3ff   :  { %v1992_v54 = vmul.f32 1.442695, %v1884_v19  ;;  %2112 = vadd.xlane.f32.xlu0 %v4399_v25  ;;  %v1803_v15 = vpop.xlane.xlu1 %1802  ;;  %v3277_v49 = vpop.eup %3276 }
 0x400   :  { %3288 = vpow2.f32 %v1998_v8  ;;  %v1885_v30 = vsub.f32 %v4192_v1, %v1803_v15  ;;  %v2053_v53 = vpop.xlane.xlu0 %2052  ;;  %v2230_v35 = vmul.f32 %v3277_v49, %v4163_v22 }
 0x401   :  { %v4404_v52 = vpop.eup %3278  ;;  %3290 = vpow2.f32 %v1992_v54 }
 0x402   :  { %v3281_v17 = vpop.eup %3280  ;;  %v1994_v28 = vmul.f32 1.442695, %v1885_v30  ;;  %2114 = vadd.xlane.f32.xlu1 %v4404_v52  ;;  %3292 = vrcp.f32 %v2053_v53 }
 0x403   :  { %v3283_v3 = vpop.eup %3282  ;;  %v2231_v36 = vmul.f32 %v3281_v17, %v4168_v5  ;;  %v2055_v38 = vpop.xlane.xlu1 %2054 }
 0x404   :  { %3294 = vpow2.f32 %v1994_v28  ;;  %v2049_v23 = vpop.xlane.xlu0 %2048  ;;  %v2228_v1 = vmul.f32 %v3283_v3, %v4171_v42 }
 0x405   :  { %v3285_v13 = vpop.eup %3284  ;;  %v2815_v55 = vpack.c.bf16 %v2231_v36, %v2230_v35  ;;  %3296 = vrcp.f32 %v2055_v38 }
 0x406   :  { %v2229_v37 = vmul.f32 %v3285_v13, %v4176_v46  ;;  %3298 = vrcp.f32 %v2049_v23 }
 0x407   :  { %2959 = vst [vmem:[#allocation10 + $0x18] sm:$0xff] %v2815_v55   ;;  %v2051_v58 = vpop.xlane.xlu1 %2050 }
 0x408   :  { %v2810_v11 = vpack.c.bf16 %v2229_v37, %v2228_v1  ;;  %3300 = vrcp.f32 %v2051_v58  ;;  %v1813_v19 = vpop.xlane.xlu0 %1812 }
 0x409   :  { %v1890_v22 = vsub.f32 %v4211_v40, %v1813_v19 }
 0x40a   :  { %v4412_v5 = vpop.eup %3286  ;;  %2958 = vst [vmem:[#allocation10 + $0x10] sm:$0xff] %v2810_v11  }
 0x40b   :  { %v2004_v8 = vmul.f32 1.442695, %v1890_v22  ;;  %2124 = vadd.xlane.f32.xlu0 %v4412_v5  ;;  %v1815_v54 = vpop.xlane.xlu1 %1814 }
 0x40c   :  { %v1891_v15 = vsub.f32 %v4216_v60, %v1815_v54  ;;  %v1809_v42 = vpop.xlane.xlu0 %1808 }
 0x40d   :  { %v4416_v49 = vpop.eup %3288  ;;  %3302 = vpow2.f32 %v2004_v8  ;;  %v1888_v46 = vsub.f32 %v4219_v2, %v1809_v42 }
 0x40e   :  { %v4419_v30 = vpop.eup %3290  ;;  %v2006_v53 = vmul.f32 1.442695, %v1891_v15  ;;  %2126 = vadd.xlane.f32.xlu1 %v4416_v49 }
 0x40f   :  { %v2000_v40 = vmul.f32 1.442695, %v1888_v46  ;;  %2120 = vadd.xlane.f32.xlu0 %v4419_v30  ;;  %v1811_v17 = vpop.xlane.xlu1 %1810  ;;  %v3293_v28 = vpop.eup %3292 }
 0x410   :  { %3304 = vpow2.f32 %v2006_v53  ;;  %v1889_v3 = vsub.f32 %v4224_v7, %v1811_v17  ;;  %v2061_v60 = vpop.xlane.xlu0 %2060  ;;  %v2234_v23 = vmul.f32 %v3293_v28, %v4195_v32 }
 0x411   :  { %v4424_v35 = vpop.eup %3294  ;;  %3306 = vpow2.f32 %v2000_v40 }
 0x412   :  { %v3297_v36 = vpop.eup %3296  ;;  %v2002_v38 = vmul.f32 1.442695, %v1889_v3  ;;  %2122 = vadd.xlane.f32.xlu1 %v4424_v35  ;;  %3308 = vrcp.f32 %v2061_v60 }
 0x413   :  { %v3299_v2 = vpop.eup %3298  ;;  %v2235_v13 = vmul.f32 %v3297_v36, %v4200_v57  ;;  %v2063_v55 = vpop.xlane.xlu1 %2062 }
 0x414   :  { %3310 = vpow2.f32 %v2002_v38  ;;  %v2057_v1 = vpop.xlane.xlu0 %2056  ;;  %v2232_v7 = vmul.f32 %v3299_v2, %v4203_v18  ;;  %v4581_v2 = vld [vmem:[#allocation15_spill] sm:$0xff] }
 0x415   :  { %v3301_v37 = vpop.eup %3300  ;;  %v2825_v58 = vpack.c.bf16 %v2235_v13, %v2234_v23  ;;  %3312 = vrcp.f32 %v2063_v55  ;;  %v4582_v13 = vld [vmem:[#allocation16_spill] sm:$0xff] }
 0x416   :  { %v2233_v11 = vmul.f32 %v3301_v37, %v4208_v14  ;;  %3314 = vrcp.f32 %v2057_v1 }
 0x417   :  { %2961 = vst [vmem:[#allocation10 + $0x28] sm:$0xff] %v2825_v58   ;;  %v2059_v19 = vpop.xlane.xlu1 %2058 }
 0x418   :  { %v2820_v22 = vpack.c.bf16 %v2233_v11, %v2232_v7  ;;  %3316 = vrcp.f32 %v2059_v19  ;;  %v1821_v8 = vpop.xlane.xlu0 %1820  ;;  %v4584_v19 = vld [vmem:[#allocation18_spill] sm:$0xff] }
 0x419   :  { %v1894_v32 = vsub.f32 %v4243_v16, %v1821_v8 }
 0x41a   :  { %v4432_v57 = vpop.eup %3302  ;;  %2960 = vst [vmem:[#allocation10 + $0x20] sm:$0xff] %v2820_v22  }
 0x41b   :  { %v2012_v54 = vmul.f32 1.442695, %v1894_v32  ;;  %2132 = vadd.xlane.f32.xlu0 %v4432_v57  ;;  %v1823_v15 = vpop.xlane.xlu1 %1822 }
 0x41c   :  { %v1895_v42 = vsub.f32 %v4248_v20, %v1823_v15  ;;  %v1817_v18 = vpop.xlane.xlu0 %1816 }
 0x41d   :  { %v4436_v46 = vpop.eup %3304  ;;  %3318 = vpow2.f32 %v2012_v54  ;;  %v1892_v14 = vsub.f32 %v4251_v24, %v1817_v18 }
 0x41e   :  { %v4439_v53 = vpop.eup %3306  ;;  %v2014_v40 = vmul.f32 1.442695, %v1895_v42  ;;  %2134 = vadd.xlane.f32.xlu1 %v4436_v46 }
 0x41f   :  { %v2008_v16 = vmul.f32 1.442695, %v1892_v14  ;;  %2128 = vadd.xlane.f32.xlu0 %v4439_v53  ;;  %v1819_v17 = vpop.xlane.xlu1 %1818  ;;  %v3309_v28 = vpop.eup %3308 }
 0x420   :  { %3320 = vpow2.f32 %v2014_v40  ;;  %v1893_v3 = vsub.f32 %v4256_v31, %v1819_v17  ;;  %v2069_v20 = vpop.xlane.xlu0 %2068  ;;  %v2238_v23 = vmul.f32 %v3309_v28, %v4581_v2  ;;  %v4583_v31 = vld [vmem:[#allocation17_spill] sm:$0xff] }
 0x421   :  { %v4444_v60 = vpop.eup %3310  ;;  %3322 = vpow2.f32 %v2008_v16 }
 0x422   :  { %v3313_v36 = vpop.eup %3312  ;;  %v2010_v38 = vmul.f32 1.442695, %v1893_v3  ;;  %2130 = vadd.xlane.f32.xlu1 %v4444_v60  ;;  %3324 = vrcp.f32 %v2069_v20 }
 0x423   :  { %v3315_v24 = vpop.eup %3314  ;;  %v2239_v55 = vmul.f32 %v3313_v36, %v4582_v13  ;;  %v2071_v1 = vpop.xlane.xlu1 %2070  ;;  %v4585_v13 = vld [vmem:[#allocation19_spill] sm:$0xff] }
 0x424   :  { %3326 = vpow2.f32 %v2010_v38  ;;  %v2065_v37 = vpop.xlane.xlu0 %2064  ;;  %v2236_v11 = vmul.f32 %v3315_v24, %v4583_v31 }
 0x425   :  { %v3317_v58 = vpop.eup %3316  ;;  %v2835_v7 = vpack.c.bf16 %v2239_v55, %v2238_v23  ;;  %3328 = vrcp.f32 %v2071_v1  ;;  %v4586_v1 = vld [vmem:[#allocation20_spill] sm:$0xff] }
 0x426   :  { %v2237_v22 = vmul.f32 %v3317_v58, %v4584_v19  ;;  %3330 = vrcp.f32 %v2065_v37 }
 0x427   :  { %2963 = vst [vmem:[#allocation10 + $0x38] sm:$0xff] %v2835_v7   ;;  %v2067_v8 = vpop.xlane.xlu1 %2066 }
 0x428   :  { %v2830_v32 = vpack.c.bf16 %v2237_v22, %v2236_v11  ;;  %3332 = vrcp.f32 %v2067_v8  ;;  %v1829_v54 = vpop.xlane.xlu0 %1828  ;;  %v4587_v11 = vld [vmem:[#allocation21_spill] sm:$0xff] }
 0x429   :  { %v1898_v15 = vsub.f32 %v4272_v26, %v1829_v54 }
 0x42a   :  { %v4452_v42 = vpop.eup %3318  ;;  %2962 = vst [vmem:[#allocation10 + $0x30] sm:$0xff] %v2830_v32  }
 0x42b   :  { %v2020_v18 = vmul.f32 1.442695, %v1898_v15  ;;  %2140 = vadd.xlane.f32.xlu0 %v4452_v42  ;;  %v1831_v14 = vpop.xlane.xlu1 %1830 }
 0x42c   :  { %v1899_v40 = vsub.f32 %v4278_v4, %v1831_v14  ;;  %v1825_v16 = vpop.xlane.xlu0 %1824 }
 0x42d   :  { %v4456_v17 = vpop.eup %3320  ;;  %3334 = vpow2.f32 %v2020_v18  ;;  %v1896_v28 = vsub.f32 %v4282_v51, %v1825_v16 }
 0x42e   :  { %v4459_v3 = vpop.eup %3322  ;;  %v2022_v20 = vmul.f32 1.442695, %v1899_v40  ;;  %2142 = vadd.xlane.f32.xlu1 %v4456_v17 }
 0x42f   :  { %v2016_v26 = vmul.f32 1.442695, %v1896_v28  ;;  %2136 = vadd.xlane.f32.xlu0 %v4459_v3  ;;  %v1827_v36 = vpop.xlane.xlu1 %1826  ;;  %v3325_v38 = vpop.eup %3324 }
 0x430   :  { %3336 = vpow2.f32 %v2022_v20  ;;  %v1897_v24 = vsub.f32 %v4288_v50, %v1827_v36  ;;  %v2242_v55 = vmul.f32 %v3325_v38, %v4585_v13 }
 0x431   :  { %v4464_v4 = vpop.eup %3326  ;;  %3338 = vpow2.f32 %v2016_v26 }
 0x432   :  { %v3329_v2 = vpop.eup %3328  ;;  %v2018_v23 = vmul.f32 1.442695, %v1897_v24  ;;  %2138 = vadd.xlane.f32.xlu1 %v4464_v4 }
 0x433   :  { %v3331_v51 = vpop.eup %3330  ;;  %v2243_v37 = vmul.f32 %v3329_v2, %v4586_v1  ;;  %v1837_v58 = vpop.xlane.xlu0 %1836 }
 0x434   :  { %3340 = vpow2.f32 %v2018_v23  ;;  %v2240_v19 = vmul.f32 %v3331_v51, %v4587_v11  ;;  %v1902_v22 = vsub.f32 %v4293_v41, %v1837_v58 }
 0x435   :  { %v3333_v7 = vpop.eup %3332  ;;  %v2845_v31 = vpack.c.bf16 %v2243_v37, %v2242_v55 }
 0x436   :  { %v2241_v50 = vmul.f32 %v3333_v7, %v4269_v27  ;;  %v2028_v14 = vmul.f32 1.442695, %v1902_v22 }
 0x437   :  { %2965 = vst [vmem:[#allocation10 + $0x48] sm:$0xff] %v2845_v31   ;;  %v1839_v8 = vpop.xlane.xlu1 %1838  ;;  %v1833_v32 = vpop.xlane.xlu0 %1832 }
 0x438   :  { %v2840_v54 = vpack.c.bf16 %v2241_v50, %v2240_v19  ;;  %v1900_v15 = vsub.f32 %v4299_v34, %v1833_v32  ;;  %v1903_v16 = vsub.f32 %v4302_v44, %v1839_v8 }
 0x43a   :  { %v4473_v18 = vpop.eup %3334  ;;  %2964 = vst [vmem:[#allocation10 + $0x40] sm:$0xff] %v2840_v54   ;;  %v2024_v40 = vmul.f32 1.442695, %v1900_v15  ;;  %v2030_v36 = vmul.f32 1.442695, %v1903_v16 }
 0x43b   :  { %2148 = vadd.xlane.f32.xlu0 %v4473_v18  ;;  %v1835_v28 = vpop.xlane.xlu1 %1834  ;;  %v2073_v20 = vpop.xlane.xlu0 %2072 }
 0x43c   :  { %v1901_v27 = vsub.f32 %v4308_v29, %v1835_v28  ;;  %3342 = vpow2.f32 %v2024_v40 }
 0x43d   :  { %v4478_v41 = vpop.eup %3336  ;;  %3344 = vpow2.f32 %v2028_v14 }
 0x43e   :  { %v4480_v26 = vpop.eup %3338  ;;  %v2026_v34 = vmul.f32 1.442695, %v1901_v27  ;;  %2150 = vadd.xlane.f32.xlu1 %v4478_v41  ;;  %3346 = vrcp.f32 %v2073_v20 }
 0x43f   :  { %2144 = vadd.xlane.f32.xlu0 %v4480_v26  ;;  %v2075_v44 = vpop.xlane.xlu1 %2074  ;;  %v2077_v38 = vpop.xlane.xlu0 %2076 }
 0x440   :  { %3348 = vpow2.f32 %v2026_v34 }
 0x441   :  { %v4484_v24 = vpop.eup %3340  ;;  %3350 = vrcp.f32 %v2075_v44  ;;  %v4588_v44 = vld [vmem:[#allocation22_spill] sm:$0xff] }
 0x442   :  { %3352 = vrcp.f32 %v2077_v38  ;;  %2146 = vadd.xlane.f32.xlu1 %v4484_v24 }
 0x443   :  { %3354 = vpow2.f32 %v2030_v36  ;;  %v2079_v29 = vpop.xlane.xlu1 %2078  ;;  %v2085_v2 = vpop.xlane.xlu0 %2084 }
 0x444   :  { %3356 = vrcp.f32 %v2079_v29 }
 0x445   :  { %3358 = vrcp.f32 %v2085_v2 }
 0x447   :  { %v2087_v23 = vpop.xlane.xlu1 %2086  ;;  %v2081_v51 = vpop.xlane.xlu0 %2080 }
 0x448   :  { %3360 = vrcp.f32 %v2087_v23 }
 0x449   :  { %v4487_v13 = vpop.eup %3342  ;;  %3362 = vrcp.f32 %v2081_v51 }
 0x44a   :  { %v4489_v55 = vpop.eup %3344  ;;  %2152 = vadd.xlane.f32.xlu0 %v4487_v13 }
 0x44b   :  { %v2083_v1 = vpop.xlane.xlu1 %2082  ;;  %v3347_v37 = vpop.eup %3346 }
 0x44c   :  { %3364 = vrcp.f32 %v2083_v1  ;;  %v2244_v11 = vmul.f32 %v3347_v37, %v4310_v62 }
 0x44d   :  { %v4492_v58 = vpop.eup %3348 }
 0x44e   :  { %v3351_v7 = vpop.eup %3350  ;;  %2154 = vadd.xlane.f32.xlu1 %v4492_v58  ;;  %2156 = vadd.xlane.f32.xlu0 %v4489_v55 }
 0x44f   :  { %v3353_v31 = vpop.eup %3352  ;;  %v2245_v19 = vmul.f32 %v3351_v7, %v4317_v63  ;;  %v2093_v50 = vpop.xlane.xlu0 %2092 }
 0x450   :  { %v4498_v22 = vpop.eup %3354  ;;  %v2246_v54 = vmul.f32 %v3353_v31, %v4314_v9  ;;  %3366 = vrcp.f32 %v2093_v50 }
 0x451   :  { %v3357_v8 = vpop.eup %3356  ;;  %v2850_v32 = vpack.c.bf16 %v2245_v19, %v2244_v11 }
 0x452   :  { %v2247_v15 = vmul.f32 %v3357_v8, %v4321_v56  ;;  %2158 = vadd.xlane.f32.xlu1 %v4498_v22  ;;  %v3359_v14 = vpop.eup %3358 }
 0x453   :  { %2966 = vst [vmem:[#allocation10 + $0x50] sm:$0xff] %v2850_v32   ;;  %v2095_v40 = vpop.xlane.xlu1 %2094  ;;  %v2250_v28 = vmul.f32 %v3359_v14, %v4323_v39 }
 0x454   :  { %v2855_v62 = vpack.c.bf16 %v2247_v15, %v2246_v54  ;;  %3368 = vrcp.f32 %v2095_v40  ;;  %v2089_v63 = vpop.xlane.xlu0 %2088 }
 0x455   :  { %v3361_v16 = vpop.eup %3360  ;;  %3370 = vrcp.f32 %v2089_v63 }
 0x456   :  { %2967 = vst [vmem:[#allocation10 + $0x58] sm:$0xff] %v2855_v62   ;;  %v2251_v20 = vmul.f32 %v3361_v16, %v4329_v6  ;;  %v3363_v27 = vpop.eup %3362 }
 0x457   :  { %v2091_v9 = vpop.xlane.xlu1 %2090  ;;  %v2248_v36 = vmul.f32 %v3363_v27, %v4332_v10 }
 0x458   :  { %v2865_v34 = vpack.c.bf16 %v2251_v20, %v2250_v28  ;;  %3372 = vrcp.f32 %v2091_v9 }
 0x459   :  { %v3365_v56 = vpop.eup %3364 }
 0x45a   :  { %2969 = vst [vmem:[#allocation10 + $0x68] sm:$0xff] %v2865_v34   ;;  %v2249_v38 = vmul.f32 %v3365_v56, %v4588_v44  ;;  %v4590_v34 = vld [vmem:[#allocation24_spill] sm:$0xff] }
 0x45c   :  { %v2860_v29 = vpack.c.bf16 %v2249_v38, %v2248_v36 }
 0x45d   :  { %v3367_v2 = vpop.eup %3366 }
 0x45e   :  { %2968 = vst [vmem:[#allocation10 + $0x60] sm:$0xff] %v2860_v29   ;;  %v2254_v39 = vmul.f32 %v3367_v2, %v4340_v45  ;;  %v4591_v2 = vld [vmem:[#allocation25_spill] sm:$0xff] }
 0x45f   :  { %v2101_v23 = vpop.xlane.xlu0 %2100 }
 0x460   :  { %3374 = vrcp.f32 %v2101_v23  ;;  %v4592_v23 = vld [vmem:[#allocation26_spill] sm:$0xff] }
 0x461   :  { %v3369_v51 = vpop.eup %3368 }
 0x462   :  { %v2255_v6 = vmul.f32 %v3369_v51, %v4345_v43  ;;  %v3371_v1 = vpop.eup %3370 }
 0x463   :  { %v2103_v37 = vpop.xlane.xlu1 %2102  ;;  %v2252_v10 = vmul.f32 %v3371_v1, %v4347_v21 }
 0x464   :  { %v2875_v7 = vpack.c.bf16 %v2255_v6, %v2254_v39  ;;  %3376 = vrcp.f32 %v2103_v37  ;;  %v2097_v31 = vpop.xlane.xlu0 %2096 }
 0x465   :  { %v3373_v11 = vpop.eup %3372  ;;  %3378 = vrcp.f32 %v2097_v31 }
 0x466   :  { %2971 = vst [vmem:[#allocation10 + $0x78] sm:$0xff] %v2875_v7   ;;  %v2253_v19 = vmul.f32 %v3373_v11, %v4352_v47 }
 0x467   :  { %v2099_v50 = vpop.xlane.xlu1 %2098 }
 0x468   :  { %v2870_v8 = vpack.c.bf16 %v2253_v19, %v2252_v10  ;;  %3380 = vrcp.f32 %v2099_v50 }
 0x46a   :  { %2970 = vst [vmem:[#allocation10 + $0x70] sm:$0xff] %v2870_v8  }
 0x46d   :  { %v3375_v45 = vpop.eup %3374 }
 0x46e   :  { %v2258_v54 = vmul.f32 %v3375_v45, %v4356_v0 }
 0x46f   :  { %v2109_v32 = vpop.xlane.xlu0 %2108 }
 0x470   :  { %3382 = vrcp.f32 %v2109_v32 }
 0x471   :  { %v3377_v43 = vpop.eup %3376 }
 0x472   :  { %v2259_v15 = vmul.f32 %v3377_v43, %v4361_v61  ;;  %v3379_v14 = vpop.eup %3378  ;;  %v4589_v61 = vld [vmem:[#allocation23_spill] sm:$0xff] }
 0x473   :  { %v2111_v40 = vpop.xlane.xlu1 %2110  ;;  %v2256_v47 = vmul.f32 %v3379_v14, %v4363_v48 }
 0x474   :  { %v2885_v62 = vpack.c.bf16 %v2259_v15, %v2258_v54  ;;  %3384 = vrcp.f32 %v2111_v40  ;;  %v2105_v21 = vpop.xlane.xlu0 %2104 }
 0x475   :  { %v3381_v63 = vpop.eup %3380  ;;  %3386 = vrcp.f32 %v2105_v21 }
 0x476   :  { %2973 = vst [vmem:[#allocation10 + $0x88] sm:$0xff] %v2885_v62   ;;  %v2257_v16 = vmul.f32 %v3381_v63, %v4368_v12 }
 0x477   :  { %v2107_v28 = vpop.xlane.xlu1 %2106 }
 0x478   :  { %v2880_v20 = vpack.c.bf16 %v2257_v16, %v2256_v47  ;;  %3388 = vrcp.f32 %v2107_v28 }
 0x47a   :  { %2972 = vst [vmem:[#allocation10 + $0x80] sm:$0xff] %v2880_v20  }
 0x47d   :  { %v3383_v0 = vpop.eup %3382 }
 0x47e   :  { %v2262_v9 = vmul.f32 %v3383_v0, %v4589_v61 }
 0x481   :  { %v3385_v27 = vpop.eup %3384 }
 0x482   :  { %v2263_v56 = vmul.f32 %v3385_v27, %v4590_v34  ;;  %v3387_v36 = vpop.eup %3386 }
 0x483   :  { %v2117_v44 = vpop.xlane.xlu0 %2116  ;;  %v2260_v48 = vmul.f32 %v3387_v36, %v4591_v2 }
 0x484   :  { %v2895_v38 = vpack.c.bf16 %v2263_v56, %v2262_v9  ;;  %3390 = vrcp.f32 %v2117_v44 }
 0x485   :  { %v3389_v29 = vpop.eup %3388 }
 0x486   :  { %2975 = vst [vmem:[#allocation10 + $0x98] sm:$0xff] %v2895_v38   ;;  %v2261_v12 = vmul.f32 %v3389_v29, %v4592_v23 }
 0x487   :  { %v2119_v51 = vpop.xlane.xlu1 %2118 }
 0x488   :  { %v2890_v39 = vpack.c.bf16 %v2261_v12, %v2260_v48  ;;  %3392 = vrcp.f32 %v2119_v51  ;;  %v2113_v6 = vpop.xlane.xlu0 %2112 }
 0x489   :  { %3394 = vrcp.f32 %v2113_v6 }
 0x48a   :  { %2974 = vst [vmem:[#allocation10 + $0x90] sm:$0xff] %v2890_v39  }
 0x48b   :  { %v2115_v1 = vpop.xlane.xlu1 %2114 }
 0x48c   :  { %3396 = vrcp.f32 %v2115_v1 }
 0x491   :  { %v3391_v37 = vpop.eup %3390 }
 0x492   :  { %v2266_v11 = vmul.f32 %v3391_v37, %v4391_v59 }
 0x494   :  { %v2125_v7 = vpop.xlane.xlu0 %2124 }
 0x495   :  { %v3393_v31 = vpop.eup %3392  ;;  %3398 = vrcp.f32 %v2125_v7 }
 0x496   :  { %v2267_v10 = vmul.f32 %v3393_v31, %v4396_v33  ;;  %v3395_v19 = vpop.eup %3394 }
 0x497   :  { %v2127_v50 = vpop.xlane.xlu1 %2126  ;;  %v2264_v43 = vmul.f32 %v3395_v19, %v4399_v25 }
 0x498   :  { %v2905_v8 = vpack.c.bf16 %v2267_v10, %v2266_v11  ;;  %3400 = vrcp.f32 %v2127_v50  ;;  %v2121_v45 = vpop.xlane.xlu0 %2120 }
 0x499   :  { %v3397_v32 = vpop.eup %3396  ;;  %3402 = vrcp.f32 %v2121_v45 }
 0x49a   :  { %2977 = vst [vmem:[#allocation10 + $0xa8] sm:$0xff] %v2905_v8   ;;  %v2265_v54 = vmul.f32 %v3397_v32, %v4404_v52 }
 0x49b   :  { %v2123_v15 = vpop.xlane.xlu1 %2122 }
 0x49c   :  { %v2900_v14 = vpack.c.bf16 %v2265_v54, %v2264_v43  ;;  %3404 = vrcp.f32 %v2123_v15 }
 0x49e   :  { %2976 = vst [vmem:[#allocation10 + $0xa0] sm:$0xff] %v2900_v14  }
 0x4a2   :  { %v3399_v59 = vpop.eup %3398 }
 0x4a3   :  { %v2270_v62 = vmul.f32 %v3399_v59, %v4412_v5 }
 0x4a4   :  { %v2133_v40 = vpop.xlane.xlu0 %2132 }
 0x4a5   :  { %v3401_v33 = vpop.eup %3400  ;;  %3406 = vrcp.f32 %v2133_v40 }
 0x4a6   :  { %v2271_v21 = vmul.f32 %v3401_v33, %v4416_v49  ;;  %v3403_v63 = vpop.eup %3402 }
 0x4a7   :  { %v2135_v47 = vpop.xlane.xlu1 %2134  ;;  %v2268_v52 = vmul.f32 %v3403_v63, %v4419_v30 }
 0x4a8   :  { %v2915_v16 = vpack.c.bf16 %v2271_v21, %v2270_v62  ;;  %3408 = vrcp.f32 %v2135_v47  ;;  %v2129_v25 = vpop.xlane.xlu0 %2128 }
 0x4a9   :  { %v3405_v28 = vpop.eup %3404  ;;  %3410 = vrcp.f32 %v2129_v25 }
 0x4aa   :  { %2979 = vst [vmem:[#allocation10 + $0xb8] sm:$0xff] %v2915_v16   ;;  %v2269_v20 = vmul.f32 %v3405_v28, %v4424_v35 }
 0x4ab   :  { %v2131_v0 = vpop.xlane.xlu1 %2130 }
 0x4ac   :  { %v2910_v27 = vpack.c.bf16 %v2269_v20, %v2268_v52  ;;  %3412 = vrcp.f32 %v2131_v0 }
 0x4ae   :  { %2978 = vst [vmem:[#allocation10 + $0xb0] sm:$0xff] %v2910_v27  }
 0x4b2   :  { %v3407_v5 = vpop.eup %3406 }
 0x4b3   :  { %v2274_v9 = vmul.f32 %v3407_v5, %v4432_v57 }
 0x4b4   :  { %v2141_v61 = vpop.xlane.xlu0 %2140 }
 0x4b5   :  { %v3409_v49 = vpop.eup %3408  ;;  %3414 = vrcp.f32 %v2141_v61 }
 0x4b6   :  { %v2275_v34 = vmul.f32 %v3409_v49, %v4436_v46  ;;  %v3411_v56 = vpop.eup %3410 }
 0x4b7   :  { %v2143_v36 = vpop.xlane.xlu1 %2142  ;;  %v2272_v35 = vmul.f32 %v3411_v56, %v4439_v53 }
 0x4b8   :  { %v2925_v44 = vpack.c.bf16 %v2275_v34, %v2274_v9  ;;  %3416 = vrcp.f32 %v2143_v36  ;;  %v2137_v30 = vpop.xlane.xlu0 %2136 }
 0x4b9   :  { %v3413_v38 = vpop.eup %3412  ;;  %3418 = vrcp.f32 %v2137_v30 }
 0x4ba   :  { %2981 = vst [vmem:[#allocation10 + $0xc8] sm:$0xff] %v2925_v44   ;;  %v2273_v29 = vmul.f32 %v3413_v38, %v4444_v60 }
 0x4bb   :  { %v2139_v2 = vpop.xlane.xlu1 %2138 }
 0x4bc   :  { %v2920_v48 = vpack.c.bf16 %v2273_v29, %v2272_v35  ;;  %3420 = vrcp.f32 %v2139_v2 }
 0x4be   :  { %2980 = vst [vmem:[#allocation10 + $0xc0] sm:$0xff] %v2920_v48  }
 0x4c2   :  { %v3415_v57 = vpop.eup %3414 }
 0x4c3   :  { %v2278_v12 = vmul.f32 %v3415_v57, %v4452_v42 }
 0x4c4   :  { %v2149_v23 = vpop.xlane.xlu0 %2148 }
 0x4c5   :  { %v3417_v46 = vpop.eup %3416  ;;  %3422 = vrcp.f32 %v2149_v23 }
 0x4c6   :  { %v2279_v51 = vmul.f32 %v3417_v46, %v4456_v17  ;;  %v3419_v39 = vpop.eup %3418 }
 0x4c7   :  { %v2151_v6 = vpop.xlane.xlu1 %2150  ;;  %v2276_v60 = vmul.f32 %v3419_v39, %v4459_v3 }
 0x4c8   :  { %v2935_v1 = vpack.c.bf16 %v2279_v51, %v2278_v12  ;;  %3424 = vrcp.f32 %v2151_v6  ;;  %v2145_v53 = vpop.xlane.xlu0 %2144 }
 0x4c9   :  { %v3421_v37 = vpop.eup %3420  ;;  %3426 = vrcp.f32 %v2145_v53 }
 0x4ca   :  { %2983 = vst [vmem:[#allocation10 + $0xd8] sm:$0xff] %v2935_v1   ;;  %v2277_v7 = vmul.f32 %v3421_v37, %v4464_v4 }
 0x4cb   :  { %v2147_v31 = vpop.xlane.xlu1 %2146 }
 0x4cc   :  { %v2930_v11 = vpack.c.bf16 %v2277_v7, %v2276_v60  ;;  %3428 = vrcp.f32 %v2147_v31 }
 0x4ce   :  { %2982 = vst [vmem:[#allocation10 + $0xd0] sm:$0xff] %v2930_v11  }
 0x4d2   :  { %v3423_v42 = vpop.eup %3422 }
 0x4d3   :  { %v2153_v10 = vpop.xlane.xlu0 %2152  ;;  %v2282_v19 = vmul.f32 %v3423_v42, %v4473_v18 }
 0x4d4   :  { %3430 = vrcp.f32 %v2153_v10 }
 0x4d5   :  { %v3425_v17 = vpop.eup %3424 }
 0x4d6   :  { %v2283_v50 = vmul.f32 %v3425_v17, %v4478_v41  ;;  %v3427_v8 = vpop.eup %3426 }
 0x4d7   :  { %v2155_v45 = vpop.xlane.xlu1 %2154  ;;  %v2157_v3 = vpop.xlane.xlu0 %2156  ;;  %v2280_v4 = vmul.f32 %v3427_v8, %v4480_v26 }
 0x4d8   :  { %v2945_v32 = vpack.c.bf16 %v2283_v50, %v2282_v19  ;;  %3432 = vrcp.f32 %v2155_v45 }
 0x4d9   :  { %v3429_v43 = vpop.eup %3428  ;;  %3434 = vrcp.f32 %v2157_v3 }
 0x4da   :  { %2985 = vst [vmem:[#allocation10 + $0xe8] sm:$0xff] %v2945_v32   ;;  %v2281_v54 = vmul.f32 %v3429_v43, %v4484_v24 }
 0x4db   :  { %v2159_v15 = vpop.xlane.xlu1 %2158 }
 0x4dc   :  { %v2940_v14 = vpack.c.bf16 %v2281_v54, %v2280_v4  ;;  %3436 = vrcp.f32 %v2159_v15 }
 0x4de   :  { %2984 = vst [vmem:[#allocation10 + $0xe0] sm:$0xff] %v2940_v14  }
 0x4e1   :  { %v3431_v18 = vpop.eup %3430 }
 0x4e2   :  { %v2284_v41 = vmul.f32 %v3431_v18, %v4487_v13 }
 0x4e5   :  { %v3433_v59 = vpop.eup %3432 }
 0x4e6   :  { %v2285_v40 = vmul.f32 %v3433_v59, %v4492_v58  ;;  %v3435_v33 = vpop.eup %3434 }
 0x4e7   :  { %v2286_v26 = vmul.f32 %v3435_v33, %v4489_v55 }
 0x4e8   :  { %v2950_v62 = vpack.c.bf16 %v2285_v40, %v2284_v41 }
 0x4e9   :  { %v3437_v21 = vpop.eup %3436 }
 0x4ea   :  { %2986 = vst [vmem:[#allocation10 + $0xf0] sm:$0xff] %v2950_v62   ;;  %v2287_v24 = vmul.f32 %v3437_v21, %v4498_v22 }
 0x4ec   :  { %v2955_v63 = vpack.c.bf16 %v2287_v24, %v2286_v26 }
 0x4ee   :  { %2987 = vst [vmem:[#allocation10 + $0xf8] sm:$0xff] %v2955_v63  }
 0x4ef   :  { %3529 = shalt.err (!%p3526_p10)
}
 0x4f0   :  { %2619 = dma.vmem_to_hbm [thread:$0]  %s2614_s25, 4096, %s4556_s7, [#allocation4], %s3551_s1, %s3551_s1, %s3552_s16  }
 0x4f1   :  { %3544 = dma.done.wait [#allocation4], 4096  }
 0x4f2   :  { %3545 = vsyncadd [#allocation4], 4294963200 }
 0x4f3   :  { %2623 = vsyncpa [#allocation3], 1 }
 0x4f4   :  { %2624 = vsyncpa [#allocation6], 1 }
 0x4f5   :  { %2625 = vsyncpa [#allocation9], 1 }
 0x4f6   :  { %2626 = vsyncpa [#allocation4], 1 }

</bundles_post_ra>
